<compile_context>
chip_gen: v5e
topology: v5e:2x2
jax: 0.10.0
libtpu: 0.0.40
codegen_flags: <defaults>
</compile_context>

<pallas_src>
import functools

import jax
import jax.numpy as jnp
from jax import lax
from jax.experimental import pallas as pl
from jax.experimental.pallas import tpu as pltpu


# ----------------------------------------------------------------------------
# Pallas kernel: one grid step = T_CHUNK timesteps of BOTH LSTM directions
# ----------------------------------------------------------------------------
def _bilstm_chunk_kernel(xf_ref, xb_ref, wih_f_ref, wih_b_ref,
                         whh_f_ref, whh_b_ref, bias_f_ref, bias_b_ref,
                         out_f_ref, out_b_ref,
                         hf_scr, cf_scr, hb_scr, cb_scr, gf_scr, gb_scr,
                         *, hidden, t_chunk, seq_len, seq_pad):
    """Grid axis 0 walks the (padded) sequence in chunks (sequential recurrence).

      fwd direction consumes chunk k       (times ascending within the chunk)
      bwd direction consumes chunk n-1-k   (times descending within the chunk)

    xf_ref/xb_ref : (T, B, D)  bf16  input chunks (fwd / bwd)
    wih_*_ref     : (D, 4H)    bf16  W_ih^T   (untiled, VMEM-resident)
    whh_*_ref     : (H, 4H)    bf16  W_hh^T   (untiled, VMEM-resident)
    bias_*_ref    : (1, 4H)    f32   b_ih + b_hh (untiled, VMEM-resident)
    out_*_ref     : (T, B, H)  bf16  per-timestep hidden outputs
    h*/c* scratch : (B, H)     f32   recurrent state, persists across grid steps
    g*_scr        : (T*B, 4H)  f32   chunk input->gate matmul staging
    """
    H, T = hidden, t_chunk
    B = hf_scr.shape[0]
    k = pl.program_id(0)
    n_chunks = pl.num_programs(0)

    @pl.when(k == 0)
    def _():
        hf_scr[...] = jnp.zeros_like(hf_scr)
        cf_scr[...] = jnp.zeros_like(cf_scr)
        hb_scr[...] = jnp.zeros_like(hb_scr)
        cb_scr[...] = jnp.zeros_like(cb_scr)

    # Chunk-level input-to-gate matmuls (independent of the recurrence):
    # one (T*B, D) @ (D, 4H) MXU pass per direction, bf16 operands, f32 acc,
    # staged in VMEM scratch so the unrolled recurrence does not spill vregs.
    xf = xf_ref[...].reshape(T * B, -1)
    xb = xb_ref[...].reshape(T * B, -1)
    gf_scr[...] = jnp.dot(xf, wih_f_ref[...],
                          preferred_element_type=jnp.float32) + bias_f_ref[...]
    gb_scr[...] = jnp.dot(xb, wih_b_ref[...],
                          preferred_element_type=jnp.float32) + bias_b_ref[...]

    def cell(gates, c):
        i_g = jax.nn.sigmoid(gates[:, 0 * H:1 * H])
        f_g = jax.nn.sigmoid(gates[:, 1 * H:2 * H])
        g_g = jnp.tanh(gates[:, 2 * H:3 * H])
        o_g = jax.nn.sigmoid(gates[:, 3 * H:4 * H])
        c_new = f_g * c + i_g * g_g
        h_new = o_g * jnp.tanh(c_new)
        return h_new, c_new

    # Only the bwd direction has to mask padded timesteps: padded times sit at
    # the END of the sequence, so they never feed any valid fwd step, but the
    # bwd recurrence starts there and must skip them (zero input still gives
    # gates = bias != 0).
    masked = seq_pad != seq_len
    bwd_t0 = (n_chunks - 1 - k) * T   # global time of local index 0, bwd chunk

    def step(i, carry):
        h_f, c_f, h_b, c_b = carry

        # forward direction: local time i (global k*T + i)
        off_f = pl.multiple_of(i * B, B)
        g_f = gf_scr[pl.ds(off_f, B), :] + jnp.dot(
            h_f.astype(jnp.bfloat16), whh_f_ref[...],
            preferred_element_type=jnp.float32)
        h_f, c_f = cell(g_f, c_f)
        out_f_ref[i] = h_f.astype(out_f_ref.dtype)

        # backward direction: local time T-1-i of the bwd chunk
        j = T - 1 - i
        off_b = pl.multiple_of(j * B, B)
        g_b = gb_scr[pl.ds(off_b, B), :] + jnp.dot(
            h_b.astype(jnp.bfloat16), whh_b_ref[...],
            preferred_element_type=jnp.float32)
        h_b_new, c_b_new = cell(g_b, c_b)
        if masked:
            valid = (bwd_t0 + j) < seq_len          # skip padded timesteps
            h_b = jnp.where(valid, h_b_new, h_b)
            c_b = jnp.where(valid, c_b_new, c_b)
        else:
            h_b, c_b = h_b_new, c_b_new
        out_b_ref[j] = h_b.astype(out_b_ref.dtype)

        return h_f, c_f, h_b, c_b

    carry = (hf_scr[...], cf_scr[...], hb_scr[...], cb_scr[...])
    h_f, c_f, h_b, c_b = lax.fori_loop(0, T, step, carry, unroll=True)

    hf_scr[...] = h_f
    cf_scr[...] = c_f
    hb_scr[...] = h_b
    cb_scr[...] = c_b


# ----------------------------------------------------------------------------
# Wrappers
# ----------------------------------------------------------------------------
def _bilstm_layer(x_tm, layer_params, *, t_chunk, seq_len):
    """x_tm: (S_pad, B, D) time-major bf16, B a multiple of 8, S_pad a multiple
    of t_chunk.  Returns (out_f, out_b), each (S_pad, B, H) bf16: out_f[t] is
    the fwd hidden after time t; out_b[t] is the bwd hidden after processing
    times seq_len-1 .. t (PyTorch bidirectional output placement)."""
    S_pad, B, D = x_tm.shape
    pf, pb = layer_params["fwd"], layer_params["bwd"]
    H = pf["whh_t"].shape[0]
    n_chunks = S_pad // t_chunk
    assert n_chunks * t_chunk == S_pad

    fwd_idx = lambda k: (k, 0, 0)
    bwd_idx = lambda k: (n_chunks - 1 - k, 0, 0)

    def resident():
        # Constant across the grid: whole array VMEM-resident, single copy,
        # no double-buffering.
        return pl.BlockSpec(memory_space=pltpu.MemorySpace.VMEM)

    out_f, out_b = pl.pallas_call(
        functools.partial(_bilstm_chunk_kernel, hidden=H, t_chunk=t_chunk,
                          seq_len=seq_len, seq_pad=S_pad),
        out_shape=(jax.ShapeDtypeStruct((S_pad, B, H), jnp.bfloat16),
                   jax.ShapeDtypeStruct((S_pad, B, H), jnp.bfloat16)),
        grid_spec=pltpu.PrefetchScalarGridSpec(
            num_scalar_prefetch=0,
            grid=(n_chunks,),
            in_specs=[
                pl.BlockSpec((t_chunk, B, D), fwd_idx),   # x, fwd chunk (bf16)
                pl.BlockSpec((t_chunk, B, D), bwd_idx),   # x, bwd chunk (bf16)
                resident(),                               # W_ih^T fwd (bf16)
                resident(),                               # W_ih^T bwd (bf16)
                resident(),                               # W_hh^T fwd (bf16)
                resident(),                               # W_hh^T bwd (bf16)
                resident(),                               # bias fwd (f32)
                resident(),                               # bias bwd (f32)
            ],
            out_specs=(
                pl.BlockSpec((t_chunk, B, H), fwd_idx),
                pl.BlockSpec((t_chunk, B, H), bwd_idx),
            ),
            scratch_shapes=[
                pltpu.VMEM((B, H), jnp.float32),                    # h fwd
                pltpu.VMEM((B, H), jnp.float32),                    # c fwd
                pltpu.VMEM((B, H), jnp.float32),                    # h bwd
                pltpu.VMEM((B, H), jnp.float32),                    # c bwd
                pltpu.VMEM((t_chunk * B, 4 * H), jnp.float32),      # gates fwd
                pltpu.VMEM((t_chunk * B, 4 * H), jnp.float32),      # gates bwd
            ],
        ),
        compiler_params=pltpu.CompilerParams(
            dimension_semantics=("arbitrary",),          # sequential recurrence
            vmem_limit_bytes=64 * 1024 * 1024),
    )(x_tm, x_tm,
      pf["wih_t"], pb["wih_t"], pf["whh_t"], pb["whh_t"],
      pf["bias"], pb["bias"])
    return out_f, out_b


def init_params(key, bert_hidden_size, num_classes, hidden_size, num_layers):
    """Deterministic synthetic parameters, PyTorch nn.LSTM shape conventions."""
    params = {"lstm": []}
    for layer in range(num_layers):
        d_in = bert_hidden_size if layer == 0 else 2 * hidden_size
        layer_p = {}
        for direction in ("fwd", "bwd"):
            key, k1, k2, k3, k4 = jax.random.split(key, 5)
            layer_p[direction] = {
                "w_ih": 0.1 * jax.random.normal(k1, (4 * hidden_size, d_in), jnp.float32),
                "w_hh": 0.1 * jax.random.normal(k2, (4 * hidden_size, hidden_size), jnp.float32),
                "b_ih": 0.1 * jax.random.normal(k3, (4 * hidden_size,), jnp.float32),
                "b_hh": 0.1 * jax.random.normal(k4, (4 * hidden_size,), jnp.float32),
            }
        params["lstm"].append(layer_p)
    key, kc1, kc2 = jax.random.split(key, 3)
    params["classifier"] = {
        "w": 0.1 * jax.random.normal(kc1, (num_classes, 2 * hidden_size), jnp.float32),
        "b": 0.1 * jax.random.normal(kc2, (num_classes,), jnp.float32),
    }
    return params


def prepare_params(params):
    """One-time parameter prep (hoisted out of the forward path): transpose the
    LSTM weights to (in, 4H) layout (4H on the lane axis), sum the two biases,
    cast the matmul operands to bf16, pre-transpose the classifier weight."""
    prepped = {"lstm": []}
    for layer_p in params["lstm"]:
        lp = {}
        for d in ("fwd", "bwd"):
            p = layer_p[d]
            lp[d] = {
                "wih_t": jnp.transpose(p["w_ih"]).astype(jnp.bfloat16),  # (D, 4H)
                "whh_t": jnp.transpose(p["w_hh"]).astype(jnp.bfloat16),  # (H, 4H)
                "bias": (p["b_ih"] + p["b_hh"]).reshape(1, -1).astype(jnp.float32),
            }
        prepped["lstm"].append(lp)
    prepped["classifier"] = {
        "w_t": jnp.transpose(params["classifier"]["w"]).astype(jnp.float32),
        "b": params["classifier"]["b"].astype(jnp.float32),
    }
    return prepped


def bert_bilstm_classifier_forward(prepped, embeddings, valid_mask=None,
                                   *, max_chunk=32):
    """embeddings: (batch, seq, bert_hidden) — batch_first, like PyTorch.
    Returns sigmoid class probabilities (batch, num_classes)."""
    # valid_mask is accepted but unused — the PyTorch forward never reads it.
    del valid_mask
    B0, S, _ = embeddings.shape
    # Time-major and bf16 once here (MXU consumes bf16; halves HBM/VMEM for x).
    x = jnp.transpose(embeddings, (1, 0, 2)).astype(jnp.bfloat16)

    # Pad batch to a sublane multiple (8) and sequence up to a chunk multiple.
    # Padded timesteps are masked inside the kernel for the bwd recurrence.
    B_pad = ((B0 + 7) // 8) * 8
    t_chunk = min(S, max_chunk)
    S_pad = ((S + t_chunk - 1) // t_chunk) * t_chunk
    if B_pad != B0 or S_pad != S:
        x = jnp.pad(x, ((0, S_pad - S), (0, B_pad - B0), (0, 0)))

    out_f = out_b = None
    n_layers = len(prepped["lstm"])
    for li, lp in enumerate(prepped["lstm"]):
        out_f, out_b = _bilstm_layer(x, lp, t_chunk=t_chunk, seq_len=S)
        if li + 1 < n_layers:
            # TODO(synk): inter-layer LSTM dropout omitted (eval-mode identity).
            x = jnp.concatenate([out_f, out_b], axis=-1)   # (S_pad, B_pad, 2H) bf16

    # hidden[-2] = last-layer fwd final (time S-1); hidden[-1] = bwd final (time 0)
    final_hidden = jnp.concatenate(
        [out_f[S - 1, :B0, :], out_b[0, :B0, :]], axis=1).astype(jnp.float32)
    # TODO(synk): nn.Dropout on final_hidden omitted (eval-mode identity).
    # Tiny classifier stays in plain JAX: sigmoid(x @ W^T + b).
    cls = prepped["classifier"]
    return jax.nn.sigmoid(final_hidden @ cls["w_t"] + cls["b"])


# ----------------------------------------------------------------------------
# Pure-JAX f32 reference (lax.scan) for correctness checking
# ----------------------------------------------------------------------------
def _ref_lstm_dir(x_tm, w_ih, w_hh, bias, reverse):
    H = w_hh.shape[1]
    xs = x_tm[::-1] if reverse else x_tm

    def step(carry, x_t):
        h, c = carry
        gates = x_t @ w_ih.T + h @ w_hh.T + bias
        i = jax.nn.sigmoid(gates[:, :H])
        f = jax.nn.sigmoid(gates[:, H:2 * H])
        g = jnp.tanh(gates[:, 2 * H:3 * H])
        o = jax.nn.sigmoid(gates[:, 3 * H:])
        c = f * c + i * g
        h = o * jnp.tanh(c)
        return (h, c), h

    B = x_tm.shape[1]
    (h, _), outs = lax.scan(step, (jnp.zeros((B, H)), jnp.zeros((B, H))), xs)
    if reverse:
        outs = outs[::-1]
    return outs, h


def _ref_forward(params, embeddings):
    x = jnp.transpose(embeddings, (1, 0, 2)).astype(jnp.float32)
    hf = hb = None
    for layer_p in params["lstm"]:
        pf, pb = layer_p["fwd"], layer_p["bwd"]
        of, hf = _ref_lstm_dir(x, pf["w_ih"], pf["w_hh"], pf["b_ih"] + pf["b_hh"], False)
        ob, hb = _ref_lstm_dir(x, pb["w_ih"], pb["w_hh"], pb["b_ih"] + pb["b_hh"], True)
        x = jnp.concatenate([of, ob], axis=-1)
    fh = jnp.concatenate([hf, hb], axis=1)
    return jax.nn.sigmoid(fh @ params["classifier"]["w"].T + params["classifier"]["b"])


# ----------------------------------------------------------------------------
if __name__ == "__main__":
    BERT_HIDDEN = 32
    HIDDEN = 32
    NUM_LAYERS = 2
    NUM_CLASSES = 4
    BATCH = 2
    SEQ = 8

    key = jax.random.PRNGKey(0)
    key, k_emb, k_par, k_emb2 = jax.random.split(key, 4)
    embeddings = jax.random.normal(k_emb, (BATCH, SEQ, BERT_HIDDEN), jnp.float32)
    params = init_params(k_par, BERT_HIDDEN, NUM_CLASSES, HIDDEN, NUM_LAYERS)
    prepped = prepare_params(params)   # one-time weight prep, outside forward

    out = jax.jit(bert_bilstm_classifier_forward)(prepped, embeddings)
    out = jax.block_until_ready(out)
    ref = _ref_forward(params, embeddings)
    assert out.shape == (BATCH, NUM_CLASSES), out.shape
    # Kernel uses bf16 matmul operands and bf16 inter-layer activations
    # (f32 gate math / cell state) vs the pure-f32 reference.
    assert jnp.allclose(out, ref, atol=3e-2, rtol=3e-2), (out, ref)

    # Also exercise the sequence-padding + in-kernel bwd-mask path (awkward S).
    emb2 = jax.random.normal(k_emb2, (3, 11, BERT_HIDDEN), jnp.float32)
    fwd2 = jax.jit(functools.partial(bert_bilstm_classifier_forward, max_chunk=4))
    out2 = jax.block_until_ready(fwd2(prepped, emb2))
    ref2 = _ref_forward(params, emb2)
    assert out2.shape == (3, NUM_CLASSES), out2.shape
    assert jnp.allclose(out2, ref2, atol=3e-2, rtol=3e-2), (out2, ref2)

    print("KERNEL_OK")
</pallas_src>

<mosaic_0001>
module attributes {stable_mosaic.version = 11 : i64} {
  func.func @_bilstm_chunk_kernel(%arg0: i32, %arg1: memref<8x8x32xbf16, #tpu.memory_space<vmem>>, %arg2: memref<8x8x32xbf16, #tpu.memory_space<vmem>>, %arg3: memref<32x128xbf16, #tpu.memory_space<vmem>>, %arg4: memref<32x128xbf16, #tpu.memory_space<vmem>>, %arg5: memref<32x128xbf16, #tpu.memory_space<vmem>>, %arg6: memref<32x128xbf16, #tpu.memory_space<vmem>>, %arg7: memref<1x128xf32, #tpu.memory_space<vmem>>, %arg8: memref<1x128xf32, #tpu.memory_space<vmem>>, %arg9: memref<8x8x32xbf16, #tpu.memory_space<vmem>>, %arg10: memref<8x8x32xbf16, #tpu.memory_space<vmem>>, %arg11: memref<8x32xf32, #tpu.memory_space<vmem>>, %arg12: memref<8x32xf32, #tpu.memory_space<vmem>>, %arg13: memref<8x32xf32, #tpu.memory_space<vmem>>, %arg14: memref<8x32xf32, #tpu.memory_space<vmem>>, %arg15: memref<64x128xf32, #tpu.memory_space<vmem>>, %arg16: memref<64x128xf32, #tpu.memory_space<vmem>>) attributes {dimension_semantics = [#tpu.dimension_semantics<arbitrary>], iteration_bounds = array<i64: 1>, scalar_prefetch = 0 : i64, scratch_operands = 6 : i64, tpu.core_type = #tpu.core_type<tc>, window_params = [{transform_indices = @transform_0, window_bounds = array<i64: 8, 8, 32>}, {transform_indices = @transform_1, window_bounds = array<i64: 8, 8, 32>}, {pipeline_mode = #tpu.pipeline_mode<synchronous>, transform_indices = @transform_2, window_bounds = array<i64: 32, 128>}, {pipeline_mode = #tpu.pipeline_mode<synchronous>, transform_indices = @transform_3, window_bounds = array<i64: 32, 128>}, {pipeline_mode = #tpu.pipeline_mode<synchronous>, transform_indices = @transform_4, window_bounds = array<i64: 32, 128>}, {pipeline_mode = #tpu.pipeline_mode<synchronous>, transform_indices = @transform_5, window_bounds = array<i64: 32, 128>}, {pipeline_mode = #tpu.pipeline_mode<synchronous>, transform_indices = @transform_6, window_bounds = array<i64: 1, 128>}, {pipeline_mode = #tpu.pipeline_mode<synchronous>, transform_indices = @transform_7, window_bounds = array<i64: 1, 128>}, {transform_indices = @transform_8, window_bounds = array<i64: 8, 8, 32>}, {transform_indices = @transform_9, window_bounds = array<i64: 8, 8, 32>}]} {
    %c0_i32 = arith.constant 0 : i32
    %0 = arith.cmpi eq, %arg0, %c0_i32 : i32
    %1 = arith.extui %0 : i1 to i32
    %c0_i32_0 = arith.constant 0 : i32
    %2 = arith.cmpi ne, %1, %c0_i32_0 : i32
    scf.if %2 {
      %cst_204 = arith.constant 0.000000e+00 : f32
      %643 = vector.broadcast %cst_204 : f32 to vector<8x32xf32>
      %c0_205 = arith.constant 0 : index
      %c0_206 = arith.constant 0 : index
      %644 = vector.load %arg11[%c0_205, %c0_206] : memref<8x32xf32, #tpu.memory_space<vmem>>, vector<8x32xf32>
      tpu.vector_store %arg11[%c0_205, %c0_206], %643 {strides = array<i32>} : memref<8x32xf32, #tpu.memory_space<vmem>>, vector<8x32xf32>,
      %cst_207 = arith.constant 0.000000e+00 : f32
      %645 = vector.broadcast %cst_207 : f32 to vector<8x32xf32>
      %c0_208 = arith.constant 0 : index
      %c0_209 = arith.constant 0 : index
      %646 = vector.load %arg12[%c0_208, %c0_209] : memref<8x32xf32, #tpu.memory_space<vmem>>, vector<8x32xf32>
      tpu.vector_store %arg12[%c0_208, %c0_209], %645 {strides = array<i32>} : memref<8x32xf32, #tpu.memory_space<vmem>>, vector<8x32xf32>,
      %cst_210 = arith.constant 0.000000e+00 : f32
      %647 = vector.broadcast %cst_210 : f32 to vector<8x32xf32>
      %c0_211 = arith.constant 0 : index
      %c0_212 = arith.constant 0 : index
      %648 = vector.load %arg13[%c0_211, %c0_212] : memref<8x32xf32, #tpu.memory_space<vmem>>, vector<8x32xf32>
      tpu.vector_store %arg13[%c0_211, %c0_212], %647 {strides = array<i32>} : memref<8x32xf32, #tpu.memory_space<vmem>>, vector<8x32xf32>,
      %cst_213 = arith.constant 0.000000e+00 : f32
      %649 = vector.broadcast %cst_213 : f32 to vector<8x32xf32>
      %c0_214 = arith.constant 0 : index
      %c0_215 = arith.constant 0 : index
      %650 = vector.load %arg14[%c0_214, %c0_215] : memref<8x32xf32, #tpu.memory_space<vmem>>, vector<8x32xf32>
      tpu.vector_store %arg14[%c0_214, %c0_215], %649 {strides = array<i32>} : memref<8x32xf32, #tpu.memory_space<vmem>>, vector<8x32xf32>,
    } else {
    }
    %c0 = arith.constant 0 : index
    %c0_1 = arith.constant 0 : index
    %c0_2 = arith.constant 0 : index
    %3 = vector.load %arg1[%c0, %c0_1, %c0_2] : memref<8x8x32xbf16, #tpu.memory_space<vmem>>, vector<8x8x32xbf16>
    %4 = vector.shape_cast %3 : vector<8x8x32xbf16> to vector<64x32xbf16>
    %c0_3 = arith.constant 0 : index
    %c0_4 = arith.constant 0 : index
    %c0_5 = arith.constant 0 : index
    %5 = vector.load %arg2[%c0_3, %c0_4, %c0_5] : memref<8x8x32xbf16, #tpu.memory_space<vmem>>, vector<8x8x32xbf16>
    %6 = vector.shape_cast %5 : vector<8x8x32xbf16> to vector<64x32xbf16>
    %c0_6 = arith.constant 0 : index
    %c0_7 = arith.constant 0 : index
    %7 = vector.load %arg3[%c0_6, %c0_7] : memref<32x128xbf16, #tpu.memory_space<vmem>>, vector<32x128xbf16>
    %cst = arith.constant dense<0.000000e+00> : vector<64x128xf32>
    %8 = tpu.matmul %4, %7, %cst {dimension_numbers = #tpu.dot_dimension_numbers<[1], [0], [0], [1], [0, 0, 1, 1], [], []>} : vector<64x32xbf16>, vector<32x128xbf16>, vector<64x128xf32> -> vector<64x128xf32>
    %c0_8 = arith.constant 0 : index
    %c0_9 = arith.constant 0 : index
    %9 = vector.load %arg7[%c0_8, %c0_9] : memref<1x128xf32, #tpu.memory_space<vmem>>, vector<1x128xf32>
    %10 = vector.broadcast %9 : vector<1x128xf32> to vector<64x128xf32>
    %11 = arith.addf %8, %10 : vector<64x128xf32>
    %c0_10 = arith.constant 0 : index
    %c0_11 = arith.constant 0 : index
    %12 = vector.load %arg15[%c0_10, %c0_11] : memref<64x128xf32, #tpu.memory_space<vmem>>, vector<64x128xf32>
    tpu.vector_store %arg15[%c0_10, %c0_11], %11 {strides = array<i32>} : memref<64x128xf32, #tpu.memory_space<vmem>>, vector<64x128xf32>,
    %c0_12 = arith.constant 0 : index
    %c0_13 = arith.constant 0 : index
    %13 = vector.load %arg4[%c0_12, %c0_13] : memref<32x128xbf16, #tpu.memory_space<vmem>>, vector<32x128xbf16>
    %cst_14 = arith.constant dense<0.000000e+00> : vector<64x128xf32>
    %14 = tpu.matmul %6, %13, %cst_14 {dimension_numbers = #tpu.dot_dimension_numbers<[1], [0], [0], [1], [0, 0, 1, 1], [], []>} : vector<64x32xbf16>, vector<32x128xbf16>, vector<64x128xf32> -> vector<64x128xf32>
    %c0_15 = arith.constant 0 : index
    %c0_16 = arith.constant 0 : index
    %15 = vector.load %arg8[%c0_15, %c0_16] : memref<1x128xf32, #tpu.memory_space<vmem>>, vector<1x128xf32>
    %16 = vector.broadcast %15 : vector<1x128xf32> to vector<64x128xf32>
    %17 = arith.addf %14, %16 : vector<64x128xf32>
    %c0_17 = arith.constant 0 : index
    %c0_18 = arith.constant 0 : index
    %18 = vector.load %arg16[%c0_17, %c0_18] : memref<64x128xf32, #tpu.memory_space<vmem>>, vector<64x128xf32>
    tpu.vector_store %arg16[%c0_17, %c0_18], %17 {strides = array<i32>} : memref<64x128xf32, #tpu.memory_space<vmem>>, vector<64x128xf32>,
    %c0_19 = arith.constant 0 : index
    %c0_20 = arith.constant 0 : index
    %19 = vector.load %arg11[%c0_19, %c0_20] : memref<8x32xf32, #tpu.memory_space<vmem>>, vector<8x32xf32>
    %c0_21 = arith.constant 0 : index
    %c0_22 = arith.constant 0 : index
    %20 = vector.load %arg12[%c0_21, %c0_22] : memref<8x32xf32, #tpu.memory_space<vmem>>, vector<8x32xf32>
    %c0_23 = arith.constant 0 : index
    %c0_24 = arith.constant 0 : index
    %21 = vector.load %arg13[%c0_23, %c0_24] : memref<8x32xf32, #tpu.memory_space<vmem>>, vector<8x32xf32>
    %c0_25 = arith.constant 0 : index
    %c0_26 = arith.constant 0 : index
    %22 = vector.load %arg14[%c0_25, %c0_26] : memref<8x32xf32, #tpu.memory_space<vmem>>, vector<8x32xf32>
    %c0_i32_27 = arith.constant 0 : i32
    %c8_i32 = arith.constant 8 : i32
    %23 = arith.muli %c0_i32_27, %c8_i32 : i32
    %24 = tpu.assume_multiple %23, 8 : i32
    %25 = arith.index_cast %24 : i32 to index
    %c0_28 = arith.constant 0 : index
    %26 = vector.load %arg15[%25, %c0_28] : memref<64x128xf32, #tpu.memory_space<vmem>>, vector<8x128xf32>
    %27 = arith.truncf %19 : vector<8x32xf32> to vector<8x32xbf16>
    %c0_29 = arith.constant 0 : index
    %c0_30 = arith.constant 0 : index
    %28 = vector.load %arg5[%c0_29, %c0_30] : memref<32x128xbf16, #tpu.memory_space<vmem>>, vector<32x128xbf16>
    %cst_31 = arith.constant dense<0.000000e+00> : vector<8x128xf32>
    %29 = tpu.matmul %27, %28, %cst_31 {dimension_numbers = #tpu.dot_dimension_numbers<[1], [0], [0], [1], [0, 0, 1, 1], [], []>} : vector<8x32xbf16>, vector<32x128xbf16>, vector<8x128xf32> -> vector<8x128xf32>
    %30 = arith.addf %26, %29 : vector<8x128xf32>
    %31 = vector.extract_strided_slice %30 {offsets = [0, 0], sizes = [8, 32], strides = [1, 1]} : vector<8x128xf32> to vector<8x32xf32>
    %32 = arith.negf %31 : vector<8x32xf32>
    %33 = math.exp %32 : vector<8x32xf32>
    %cst_32 = arith.constant 1.000000e+00 : f32
    %34 = vector.broadcast %cst_32 : f32 to vector<8x32xf32>
    %35 = arith.addf %34, %33 : vector<8x32xf32>
    %36 = arith.divf %34, %35 : vector<8x32xf32>
    %37 = vector.extract_strided_slice %30 {offsets = [0, 32], sizes = [8, 32], strides = [1, 1]} : vector<8x128xf32> to vector<8x32xf32>
    %38 = arith.negf %37 : vector<8x32xf32>
    %39 = math.exp %38 : vector<8x32xf32>
    %cst_33 = arith.constant 1.000000e+00 : f32
    %40 = vector.broadcast %cst_33 : f32 to vector<8x32xf32>
    %41 = arith.addf %40, %39 : vector<8x32xf32>
    %42 = arith.divf %40, %41 : vector<8x32xf32>
    %43 = vector.extract_strided_slice %30 {offsets = [0, 64], sizes = [8, 32], strides = [1, 1]} : vector<8x128xf32> to vector<8x32xf32>
    %44 = math.tanh %43 : vector<8x32xf32>
    %45 = vector.extract_strided_slice %30 {offsets = [0, 96], sizes = [8, 32], strides = [1, 1]} : vector<8x128xf32> to vector<8x32xf32>
    %46 = arith.negf %45 : vector<8x32xf32>
    %47 = math.exp %46 : vector<8x32xf32>
    %cst_34 = arith.constant 1.000000e+00 : f32
    %48 = vector.broadcast %cst_34 : f32 to vector<8x32xf32>
    %49 = arith.addf %48, %47 : vector<8x32xf32>
    %50 = arith.divf %48, %49 : vector<8x32xf32>
    %51 = arith.mulf %42, %20 : vector<8x32xf32>
    %52 = arith.mulf %36, %44 : vector<8x32xf32>
    %53 = arith.addf %51, %52 : vector<8x32xf32>
    %54 = math.tanh %53 : vector<8x32xf32>
    %55 = arith.mulf %50, %54 : vector<8x32xf32>
    %56 = arith.truncf %55 : vector<8x32xf32> to vector<8x32xbf16>
    %57 = arith.index_cast %c0_i32_27 : i32 to index
    %c0_35 = arith.constant 0 : index
    %c0_36 = arith.constant 0 : index
    %58 = vector.load %arg9[%57, %c0_35, %c0_36] : memref<8x8x32xbf16, #tpu.memory_space<vmem>>, vector<1x8x32xbf16>
    %59 = vector.shape_cast %58 : vector<1x8x32xbf16> to vector<8x32xbf16>
    %60 = vector.shape_cast %56 : vector<8x32xbf16> to vector<1x8x32xbf16>
    tpu.vector_store %arg9[%57, %c0_35, %c0_36], %60 {strides = array<i32>} : memref<8x8x32xbf16, #tpu.memory_space<vmem>>, vector<1x8x32xbf16>,
    %c7_i32 = arith.constant 7 : i32
    %61 = arith.subi %c7_i32, %c0_i32_27 : i32
    %c8_i32_37 = arith.constant 8 : i32
    %62 = arith.muli %61, %c8_i32_37 : i32
    %63 = tpu.assume_multiple %62, 8 : i32
    %64 = arith.index_cast %63 : i32 to index
    %c0_38 = arith.constant 0 : index
    %65 = vector.load %arg16[%64, %c0_38] : memref<64x128xf32, #tpu.memory_space<vmem>>, vector<8x128xf32>
    %66 = arith.truncf %21 : vector<8x32xf32> to vector<8x32xbf16>
    %c0_39 = arith.constant 0 : index
    %c0_40 = arith.constant 0 : index
    %67 = vector.load %arg6[%c0_39, %c0_40] : memref<32x128xbf16, #tpu.memory_space<vmem>>, vector<32x128xbf16>
    %cst_41 = arith.constant dense<0.000000e+00> : vector<8x128xf32>
    %68 = tpu.matmul %66, %67, %cst_41 {dimension_numbers = #tpu.dot_dimension_numbers<[1], [0], [0], [1], [0, 0, 1, 1], [], []>} : vector<8x32xbf16>, vector<32x128xbf16>, vector<8x128xf32> -> vector<8x128xf32>
    %69 = arith.addf %65, %68 : vector<8x128xf32>
    %70 = vector.extract_strided_slice %69 {offsets = [0, 0], sizes = [8, 32], strides = [1, 1]} : vector<8x128xf32> to vector<8x32xf32>
    %71 = arith.negf %70 : vector<8x32xf32>
    %72 = math.exp %71 : vector<8x32xf32>
    %cst_42 = arith.constant 1.000000e+00 : f32
    %73 = vector.broadcast %cst_42 : f32 to vector<8x32xf32>
    %74 = arith.addf %73, %72 : vector<8x32xf32>
    %75 = arith.divf %73, %74 : vector<8x32xf32>
    %76 = vector.extract_strided_slice %69 {offsets = [0, 32], sizes = [8, 32], strides = [1, 1]} : vector<8x128xf32> to vector<8x32xf32>
    %77 = arith.negf %76 : vector<8x32xf32>
    %78 = math.exp %77 : vector<8x32xf32>
    %cst_43 = arith.constant 1.000000e+00 : f32
    %79 = vector.broadcast %cst_43 : f32 to vector<8x32xf32>
    %80 = arith.addf %79, %78 : vector<8x32xf32>
    %81 = arith.divf %79, %80 : vector<8x32xf32>
    %82 = vector.extract_strided_slice %69 {offsets = [0, 64], sizes = [8, 32], strides = [1, 1]} : vector<8x128xf32> to vector<8x32xf32>
    %83 = math.tanh %82 : vector<8x32xf32>
    %84 = vector.extract_strided_slice %69 {offsets = [0, 96], sizes = [8, 32], strides = [1, 1]} : vector<8x128xf32> to vector<8x32xf32>
    %85 = arith.negf %84 : vector<8x32xf32>
    %86 = math.exp %85 : vector<8x32xf32>
    %cst_44 = arith.constant 1.000000e+00 : f32
    %87 = vector.broadcast %cst_44 : f32 to vector<8x32xf32>
    %88 = arith.addf %87, %86 : vector<8x32xf32>
    %89 = arith.divf %87, %88 : vector<8x32xf32>
    %90 = arith.mulf %81, %22 : vector<8x32xf32>
    %91 = arith.mulf %75, %83 : vector<8x32xf32>
    %92 = arith.addf %90, %91 : vector<8x32xf32>
    %93 = math.tanh %92 : vector<8x32xf32>
    %94 = arith.mulf %89, %93 : vector<8x32xf32>
    %95 = arith.truncf %94 : vector<8x32xf32> to vector<8x32xbf16>
    %96 = arith.index_cast %61 : i32 to index
    %c0_45 = arith.constant 0 : index
    %c0_46 = arith.constant 0 : index
    %97 = vector.load %arg10[%96, %c0_45, %c0_46] : memref<8x8x32xbf16, #tpu.memory_space<vmem>>, vector<1x8x32xbf16>
    %98 = vector.shape_cast %97 : vector<1x8x32xbf16> to vector<8x32xbf16>
    %99 = vector.shape_cast %95 : vector<8x32xbf16> to vector<1x8x32xbf16>
    tpu.vector_store %arg10[%96, %c0_45, %c0_46], %99 {strides = array<i32>} : memref<8x8x32xbf16, #tpu.memory_space<vmem>>, vector<1x8x32xbf16>,
    %c1_i32 = arith.constant 1 : i32
    %c8_i32_47 = arith.constant 8 : i32
    %100 = arith.muli %c1_i32, %c8_i32_47 : i32
    %101 = tpu.assume_multiple %100, 8 : i32
    %102 = arith.index_cast %101 : i32 to index
    %c0_48 = arith.constant 0 : index
    %103 = vector.load %arg15[%102, %c0_48] : memref<64x128xf32, #tpu.memory_space<vmem>>, vector<8x128xf32>
    %104 = arith.truncf %55 : vector<8x32xf32> to vector<8x32xbf16>
    %c0_49 = arith.constant 0 : index
    %c0_50 = arith.constant 0 : index
    %105 = vector.load %arg5[%c0_49, %c0_50] : memref<32x128xbf16, #tpu.memory_space<vmem>>, vector<32x128xbf16>
    %cst_51 = arith.constant dense<0.000000e+00> : vector<8x128xf32>
    %106 = tpu.matmul %104, %105, %cst_51 {dimension_numbers = #tpu.dot_dimension_numbers<[1], [0], [0], [1], [0, 0, 1, 1], [], []>} : vector<8x32xbf16>, vector<32x128xbf16>, vector<8x128xf32> -> vector<8x128xf32>
    %107 = arith.addf %103, %106 : vector<8x128xf32>
    %108 = vector.extract_strided_slice %107 {offsets = [0, 0], sizes = [8, 32], strides = [1, 1]} : vector<8x128xf32> to vector<8x32xf32>
    %109 = arith.negf %108 : vector<8x32xf32>
    %110 = math.exp %109 : vector<8x32xf32>
    %cst_52 = arith.constant 1.000000e+00 : f32
    %111 = vector.broadcast %cst_52 : f32 to vector<8x32xf32>
    %112 = arith.addf %111, %110 : vector<8x32xf32>
    %113 = arith.divf %111, %112 : vector<8x32xf32>
    %114 = vector.extract_strided_slice %107 {offsets = [0, 32], sizes = [8, 32], strides = [1, 1]} : vector<8x128xf32> to vector<8x32xf32>
    %115 = arith.negf %114 : vector<8x32xf32>
    %116 = math.exp %115 : vector<8x32xf32>
    %cst_53 = arith.constant 1.000000e+00 : f32
    %117 = vector.broadcast %cst_53 : f32 to vector<8x32xf32>
    %118 = arith.addf %117, %116 : vector<8x32xf32>
    %119 = arith.divf %117, %118 : vector<8x32xf32>
    %120 = vector.extract_strided_slice %107 {offsets = [0, 64], sizes = [8, 32], strides = [1, 1]} : vector<8x128xf32> to vector<8x32xf32>
    %121 = math.tanh %120 : vector<8x32xf32>
    %122 = vector.extract_strided_slice %107 {offsets = [0, 96], sizes = [8, 32], strides = [1, 1]} : vector<8x128xf32> to vector<8x32xf32>
    %123 = arith.negf %122 : vector<8x32xf32>
    %124 = math.exp %123 : vector<8x32xf32>
    %cst_54 = arith.constant 1.000000e+00 : f32
    %125 = vector.broadcast %cst_54 : f32 to vector<8x32xf32>
    %126 = arith.addf %125, %124 : vector<8x32xf32>
    %127 = arith.divf %125, %126 : vector<8x32xf32>
    %128 = arith.mulf %119, %53 : vector<8x32xf32>
    %129 = arith.mulf %113, %121 : vector<8x32xf32>
    %130 = arith.addf %128, %129 : vector<8x32xf32>
    %131 = math.tanh %130 : vector<8x32xf32>
    %132 = arith.mulf %127, %131 : vector<8x32xf32>
    %133 = arith.truncf %132 : vector<8x32xf32> to vector<8x32xbf16>
    %134 = arith.index_cast %c1_i32 : i32 to index
    %c0_55 = arith.constant 0 : index
    %c0_56 = arith.constant 0 : index
    %135 = vector.load %arg9[%134, %c0_55, %c0_56] : memref<8x8x32xbf16, #tpu.memory_space<vmem>>, vector<1x8x32xbf16>
    %136 = vector.shape_cast %135 : vector<1x8x32xbf16> to vector<8x32xbf16>
    %137 = vector.shape_cast %133 : vector<8x32xbf16> to vector<1x8x32xbf16>
    tpu.vector_store %arg9[%134, %c0_55, %c0_56], %137 {strides = array<i32>} : memref<8x8x32xbf16, #tpu.memory_space<vmem>>, vector<1x8x32xbf16>,
    %c7_i32_57 = arith.constant 7 : i32
    %138 = arith.subi %c7_i32_57, %c1_i32 : i32
    %c8_i32_58 = arith.constant 8 : i32
    %139 = arith.muli %138, %c8_i32_58 : i32
    %140 = tpu.assume_multiple %139, 8 : i32
    %141 = arith.index_cast %140 : i32 to index
    %c0_59 = arith.constant 0 : index
    %142 = vector.load %arg16[%141, %c0_59] : memref<64x128xf32, #tpu.memory_space<vmem>>, vector<8x128xf32>
    %143 = arith.truncf %94 : vector<8x32xf32> to vector<8x32xbf16>
    %c0_60 = arith.constant 0 : index
    %c0_61 = arith.constant 0 : index
    %144 = vector.load %arg6[%c0_60, %c0_61] : memref<32x128xbf16, #tpu.memory_space<vmem>>, vector<32x128xbf16>
    %cst_62 = arith.constant dense<0.000000e+00> : vector<8x128xf32>
    %145 = tpu.matmul %143, %144, %cst_62 {dimension_numbers = #tpu.dot_dimension_numbers<[1], [0], [0], [1], [0, 0, 1, 1], [], []>} : vector<8x32xbf16>, vector<32x128xbf16>, vector<8x128xf32> -> vector<8x128xf32>
    %146 = arith.addf %142, %145 : vector<8x128xf32>
    %147 = vector.extract_strided_slice %146 {offsets = [0, 0], sizes = [8, 32], strides = [1, 1]} : vector<8x128xf32> to vector<8x32xf32>
    %148 = arith.negf %147 : vector<8x32xf32>
    %149 = math.exp %148 : vector<8x32xf32>
    %cst_63 = arith.constant 1.000000e+00 : f32
    %150 = vector.broadcast %cst_63 : f32 to vector<8x32xf32>
    %151 = arith.addf %150, %149 : vector<8x32xf32>
    %152 = arith.divf %150, %151 : vector<8x32xf32>
    %153 = vector.extract_strided_slice %146 {offsets = [0, 32], sizes = [8, 32], strides = [1, 1]} : vector<8x128xf32> to vector<8x32xf32>
    %154 = arith.negf %153 : vector<8x32xf32>
    %155 = math.exp %154 : vector<8x32xf32>
    %cst_64 = arith.constant 1.000000e+00 : f32
    %156 = vector.broadcast %cst_64 : f32 to vector<8x32xf32>
    %157 = arith.addf %156, %155 : vector<8x32xf32>
    %158 = arith.divf %156, %157 : vector<8x32xf32>
    %159 = vector.extract_strided_slice %146 {offsets = [0, 64], sizes = [8, 32], strides = [1, 1]} : vector<8x128xf32> to vector<8x32xf32>
    %160 = math.tanh %159 : vector<8x32xf32>
    %161 = vector.extract_strided_slice %146 {offsets = [0, 96], sizes = [8, 32], strides = [1, 1]} : vector<8x128xf32> to vector<8x32xf32>
    %162 = arith.negf %161 : vector<8x32xf32>
    %163 = math.exp %162 : vector<8x32xf32>
    %cst_65 = arith.constant 1.000000e+00 : f32
    %164 = vector.broadcast %cst_65 : f32 to vector<8x32xf32>
    %165 = arith.addf %164, %163 : vector<8x32xf32>
    %166 = arith.divf %164, %165 : vector<8x32xf32>
    %167 = arith.mulf %158, %92 : vector<8x32xf32>
    %168 = arith.mulf %152, %160 : vector<8x32xf32>
    %169 = arith.addf %167, %168 : vector<8x32xf32>
    %170 = math.tanh %169 : vector<8x32xf32>
    %171 = arith.mulf %166, %170 : vector<8x32xf32>
    %172 = arith.truncf %171 : vector<8x32xf32> to vector<8x32xbf16>
    %173 = arith.index_cast %138 : i32 to index
    %c0_66 = arith.constant 0 : index
    %c0_67 = arith.constant 0 : index
    %174 = vector.load %arg10[%173, %c0_66, %c0_67] : memref<8x8x32xbf16, #tpu.memory_space<vmem>>, vector<1x8x32xbf16>
    %175 = vector.shape_cast %174 : vector<1x8x32xbf16> to vector<8x32xbf16>
    %176 = vector.shape_cast %172 : vector<8x32xbf16> to vector<1x8x32xbf16>
    tpu.vector_store %arg10[%173, %c0_66, %c0_67], %176 {strides = array<i32>} : memref<8x8x32xbf16, #tpu.memory_space<vmem>>, vector<1x8x32xbf16>,
    %c2_i32 = arith.constant 2 : i32
    %c8_i32_68 = arith.constant 8 : i32
    %177 = arith.muli %c2_i32, %c8_i32_68 : i32
    %178 = tpu.assume_multiple %177, 8 : i32
    %179 = arith.index_cast %178 : i32 to index
    %c0_69 = arith.constant 0 : index
    %180 = vector.load %arg15[%179, %c0_69] : memref<64x128xf32, #tpu.memory_space<vmem>>, vector<8x128xf32>
    %181 = arith.truncf %132 : vector<8x32xf32> to vector<8x32xbf16>
    %c0_70 = arith.constant 0 : index
    %c0_71 = arith.constant 0 : index
    %182 = vector.load %arg5[%c0_70, %c0_71] : memref<32x128xbf16, #tpu.memory_space<vmem>>, vector<32x128xbf16>
    %cst_72 = arith.constant dense<0.000000e+00> : vector<8x128xf32>
    %183 = tpu.matmul %181, %182, %cst_72 {dimension_numbers = #tpu.dot_dimension_numbers<[1], [0], [0], [1], [0, 0, 1, 1], [], []>} : vector<8x32xbf16>, vector<32x128xbf16>, vector<8x128xf32> -> vector<8x128xf32>
    %184 = arith.addf %180, %183 : vector<8x128xf32>
    %185 = vector.extract_strided_slice %184 {offsets = [0, 0], sizes = [8, 32], strides = [1, 1]} : vector<8x128xf32> to vector<8x32xf32>
    %186 = arith.negf %185 : vector<8x32xf32>
    %187 = math.exp %186 : vector<8x32xf32>
    %cst_73 = arith.constant 1.000000e+00 : f32
    %188 = vector.broadcast %cst_73 : f32 to vector<8x32xf32>
    %189 = arith.addf %188, %187 : vector<8x32xf32>
    %190 = arith.divf %188, %189 : vector<8x32xf32>
    %191 = vector.extract_strided_slice %184 {offsets = [0, 32], sizes = [8, 32], strides = [1, 1]} : vector<8x128xf32> to vector<8x32xf32>
    %192 = arith.negf %191 : vector<8x32xf32>
    %193 = math.exp %192 : vector<8x32xf32>
    %cst_74 = arith.constant 1.000000e+00 : f32
    %194 = vector.broadcast %cst_74 : f32 to vector<8x32xf32>
    %195 = arith.addf %194, %193 : vector<8x32xf32>
    %196 = arith.divf %194, %195 : vector<8x32xf32>
    %197 = vector.extract_strided_slice %184 {offsets = [0, 64], sizes = [8, 32], strides = [1, 1]} : vector<8x128xf32> to vector<8x32xf32>
    %198 = math.tanh %197 : vector<8x32xf32>
    %199 = vector.extract_strided_slice %184 {offsets = [0, 96], sizes = [8, 32], strides = [1, 1]} : vector<8x128xf32> to vector<8x32xf32>
    %200 = arith.negf %199 : vector<8x32xf32>
    %201 = math.exp %200 : vector<8x32xf32>
    %cst_75 = arith.constant 1.000000e+00 : f32
    %202 = vector.broadcast %cst_75 : f32 to vector<8x32xf32>
    %203 = arith.addf %202, %201 : vector<8x32xf32>
    %204 = arith.divf %202, %203 : vector<8x32xf32>
    %205 = arith.mulf %196, %130 : vector<8x32xf32>
    %206 = arith.mulf %190, %198 : vector<8x32xf32>
    %207 = arith.addf %205, %206 : vector<8x32xf32>
    %208 = math.tanh %207 : vector<8x32xf32>
    %209 = arith.mulf %204, %208 : vector<8x32xf32>
    %210 = arith.truncf %209 : vector<8x32xf32> to vector<8x32xbf16>
    %211 = arith.index_cast %c2_i32 : i32 to index
    %c0_76 = arith.constant 0 : index
    %c0_77 = arith.constant 0 : index
    %212 = vector.load %arg9[%211, %c0_76, %c0_77] : memref<8x8x32xbf16, #tpu.memory_space<vmem>>, vector<1x8x32xbf16>
    %213 = vector.shape_cast %212 : vector<1x8x32xbf16> to vector<8x32xbf16>
    %214 = vector.shape_cast %210 : vector<8x32xbf16> to vector<1x8x32xbf16>
    tpu.vector_store %arg9[%211, %c0_76, %c0_77], %214 {strides = array<i32>} : memref<8x8x32xbf16, #tpu.memory_space<vmem>>, vector<1x8x32xbf16>,
    %c7_i32_78 = arith.constant 7 : i32
    %215 = arith.subi %c7_i32_78, %c2_i32 : i32
    %c8_i32_79 = arith.constant 8 : i32
    %216 = arith.muli %215, %c8_i32_79 : i32
    %217 = tpu.assume_multiple %216, 8 : i32
    %218 = arith.index_cast %217 : i32 to index
    %c0_80 = arith.constant 0 : index
    %219 = vector.load %arg16[%218, %c0_80] : memref<64x128xf32, #tpu.memory_space<vmem>>, vector<8x128xf32>
    %220 = arith.truncf %171 : vector<8x32xf32> to vector<8x32xbf16>
    %c0_81 = arith.constant 0 : index
    %c0_82 = arith.constant 0 : index
    %221 = vector.load %arg6[%c0_81, %c0_82] : memref<32x128xbf16, #tpu.memory_space<vmem>>, vector<32x128xbf16>
    %cst_83 = arith.constant dense<0.000000e+00> : vector<8x128xf32>
    %222 = tpu.matmul %220, %221, %cst_83 {dimension_numbers = #tpu.dot_dimension_numbers<[1], [0], [0], [1], [0, 0, 1, 1], [], []>} : vector<8x32xbf16>, vector<32x128xbf16>, vector<8x128xf32> -> vector<8x128xf32>
    %223 = arith.addf %219, %222 : vector<8x128xf32>
    %224 = vector.extract_strided_slice %223 {offsets = [0, 0], sizes = [8, 32], strides = [1, 1]} : vector<8x128xf32> to vector<8x32xf32>
    %225 = arith.negf %224 : vector<8x32xf32>
    %226 = math.exp %225 : vector<8x32xf32>
    %cst_84 = arith.constant 1.000000e+00 : f32
    %227 = vector.broadcast %cst_84 : f32 to vector<8x32xf32>
    %228 = arith.addf %227, %226 : vector<8x32xf32>
    %229 = arith.divf %227, %228 : vector<8x32xf32>
    %230 = vector.extract_strided_slice %223 {offsets = [0, 32], sizes = [8, 32], strides = [1, 1]} : vector<8x128xf32> to vector<8x32xf32>
    %231 = arith.negf %230 : vector<8x32xf32>
    %232 = math.exp %231 : vector<8x32xf32>
    %cst_85 = arith.constant 1.000000e+00 : f32
    %233 = vector.broadcast %cst_85 : f32 to vector<8x32xf32>
    %234 = arith.addf %233, %232 : vector<8x32xf32>
    %235 = arith.divf %233, %234 : vector<8x32xf32>
    %236 = vector.extract_strided_slice %223 {offsets = [0, 64], sizes = [8, 32], strides = [1, 1]} : vector<8x128xf32> to vector<8x32xf32>
    %237 = math.tanh %236 : vector<8x32xf32>
    %238 = vector.extract_strided_slice %223 {offsets = [0, 96], sizes = [8, 32], strides = [1, 1]} : vector<8x128xf32> to vector<8x32xf32>
    %239 = arith.negf %238 : vector<8x32xf32>
    %240 = math.exp %239 : vector<8x32xf32>
    %cst_86 = arith.constant 1.000000e+00 : f32
    %241 = vector.broadcast %cst_86 : f32 to vector<8x32xf32>
    %242 = arith.addf %241, %240 : vector<8x32xf32>
    %243 = arith.divf %241, %242 : vector<8x32xf32>
    %244 = arith.mulf %235, %169 : vector<8x32xf32>
    %245 = arith.mulf %229, %237 : vector<8x32xf32>
    %246 = arith.addf %244, %245 : vector<8x32xf32>
    %247 = math.tanh %246 : vector<8x32xf32>
    %248 = arith.mulf %243, %247 : vector<8x32xf32>
    %249 = arith.truncf %248 : vector<8x32xf32> to vector<8x32xbf16>
    %250 = arith.index_cast %215 : i32 to index
    %c0_87 = arith.constant 0 : index
    %c0_88 = arith.constant 0 : index
    %251 = vector.load %arg10[%250, %c0_87, %c0_88] : memref<8x8x32xbf16, #tpu.memory_space<vmem>>, vector<1x8x32xbf16>
    %252 = vector.shape_cast %251 : vector<1x8x32xbf16> to vector<8x32xbf16>
    %253 = vector.shape_cast %249 : vector<8x32xbf16> to vector<1x8x32xbf16>
    tpu.vector_store %arg10[%250, %c0_87, %c0_88], %253 {strides = array<i32>} : memref<8x8x32xbf16, #tpu.memory_space<vmem>>, vector<1x8x32xbf16>,
    %c3_i32 = arith.constant 3 : i32
    %c8_i32_89 = arith.constant 8 : i32
    %254 = arith.muli %c3_i32, %c8_i32_89 : i32
    %255 = tpu.assume_multiple %254, 8 : i32
    %256 = arith.index_cast %255 : i32 to index
    %c0_90 = arith.constant 0 : index
    %257 = vector.load %arg15[%256, %c0_90] : memref<64x128xf32, #tpu.memory_space<vmem>>, vector<8x128xf32>
    %258 = arith.truncf %209 : vector<8x32xf32> to vector<8x32xbf16>
    %c0_91 = arith.constant 0 : index
    %c0_92 = arith.constant 0 : index
    %259 = vector.load %arg5[%c0_91, %c0_92] : memref<32x128xbf16, #tpu.memory_space<vmem>>, vector<32x128xbf16>
    %cst_93 = arith.constant dense<0.000000e+00> : vector<8x128xf32>
    %260 = tpu.matmul %258, %259, %cst_93 {dimension_numbers = #tpu.dot_dimension_numbers<[1], [0], [0], [1], [0, 0, 1, 1], [], []>} : vector<8x32xbf16>, vector<32x128xbf16>, vector<8x128xf32> -> vector<8x128xf32>
    %261 = arith.addf %257, %260 : vector<8x128xf32>
    %262 = vector.extract_strided_slice %261 {offsets = [0, 0], sizes = [8, 32], strides = [1, 1]} : vector<8x128xf32> to vector<8x32xf32>
    %263 = arith.negf %262 : vector<8x32xf32>
    %264 = math.exp %263 : vector<8x32xf32>
    %cst_94 = arith.constant 1.000000e+00 : f32
    %265 = vector.broadcast %cst_94 : f32 to vector<8x32xf32>
    %266 = arith.addf %265, %264 : vector<8x32xf32>
    %267 = arith.divf %265, %266 : vector<8x32xf32>
    %268 = vector.extract_strided_slice %261 {offsets = [0, 32], sizes = [8, 32], strides = [1, 1]} : vector<8x128xf32> to vector<8x32xf32>
    %269 = arith.negf %268 : vector<8x32xf32>
    %270 = math.exp %269 : vector<8x32xf32>
    %cst_95 = arith.constant 1.000000e+00 : f32
    %271 = vector.broadcast %cst_95 : f32 to vector<8x32xf32>
    %272 = arith.addf %271, %270 : vector<8x32xf32>
    %273 = arith.divf %271, %272 : vector<8x32xf32>
    %274 = vector.extract_strided_slice %261 {offsets = [0, 64], sizes = [8, 32], strides = [1, 1]} : vector<8x128xf32> to vector<8x32xf32>
    %275 = math.tanh %274 : vector<8x32xf32>
    %276 = vector.extract_strided_slice %261 {offsets = [0, 96], sizes = [8, 32], strides = [1, 1]} : vector<8x128xf32> to vector<8x32xf32>
    %277 = arith.negf %276 : vector<8x32xf32>
    %278 = math.exp %277 : vector<8x32xf32>
    %cst_96 = arith.constant 1.000000e+00 : f32
    %279 = vector.broadcast %cst_96 : f32 to vector<8x32xf32>
    %280 = arith.addf %279, %278 : vector<8x32xf32>
    %281 = arith.divf %279, %280 : vector<8x32xf32>
    %282 = arith.mulf %273, %207 : vector<8x32xf32>
    %283 = arith.mulf %267, %275 : vector<8x32xf32>
    %284 = arith.addf %282, %283 : vector<8x32xf32>
    %285 = math.tanh %284 : vector<8x32xf32>
    %286 = arith.mulf %281, %285 : vector<8x32xf32>
    %287 = arith.truncf %286 : vector<8x32xf32> to vector<8x32xbf16>
    %288 = arith.index_cast %c3_i32 : i32 to index
    %c0_97 = arith.constant 0 : index
    %c0_98 = arith.constant 0 : index
    %289 = vector.load %arg9[%288, %c0_97, %c0_98] : memref<8x8x32xbf16, #tpu.memory_space<vmem>>, vector<1x8x32xbf16>
    %290 = vector.shape_cast %289 : vector<1x8x32xbf16> to vector<8x32xbf16>
    %291 = vector.shape_cast %287 : vector<8x32xbf16> to vector<1x8x32xbf16>
    tpu.vector_store %arg9[%288, %c0_97, %c0_98], %291 {strides = array<i32>} : memref<8x8x32xbf16, #tpu.memory_space<vmem>>, vector<1x8x32xbf16>,
    %c7_i32_99 = arith.constant 7 : i32
    %292 = arith.subi %c7_i32_99, %c3_i32 : i32
    %c8_i32_100 = arith.constant 8 : i32
    %293 = arith.muli %292, %c8_i32_100 : i32
    %294 = tpu.assume_multiple %293, 8 : i32
    %295 = arith.index_cast %294 : i32 to index
    %c0_101 = arith.constant 0 : index
    %296 = vector.load %arg16[%295, %c0_101] : memref<64x128xf32, #tpu.memory_space<vmem>>, vector<8x128xf32>
    %297 = arith.truncf %248 : vector<8x32xf32> to vector<8x32xbf16>
    %c0_102 = arith.constant 0 : index
    %c0_103 = arith.constant 0 : index
    %298 = vector.load %arg6[%c0_102, %c0_103] : memref<32x128xbf16, #tpu.memory_space<vmem>>, vector<32x128xbf16>
    %cst_104 = arith.constant dense<0.000000e+00> : vector<8x128xf32>
    %299 = tpu.matmul %297, %298, %cst_104 {dimension_numbers = #tpu.dot_dimension_numbers<[1], [0], [0], [1], [0, 0, 1, 1], [], []>} : vector<8x32xbf16>, vector<32x128xbf16>, vector<8x128xf32> -> vector<8x128xf32>
    %300 = arith.addf %296, %299 : vector<8x128xf32>
    %301 = vector.extract_strided_slice %300 {offsets = [0, 0], sizes = [8, 32], strides = [1, 1]} : vector<8x128xf32> to vector<8x32xf32>
    %302 = arith.negf %301 : vector<8x32xf32>
    %303 = math.exp %302 : vector<8x32xf32>
    %cst_105 = arith.constant 1.000000e+00 : f32
    %304 = vector.broadcast %cst_105 : f32 to vector<8x32xf32>
    %305 = arith.addf %304, %303 : vector<8x32xf32>
    %306 = arith.divf %304, %305 : vector<8x32xf32>
    %307 = vector.extract_strided_slice %300 {offsets = [0, 32], sizes = [8, 32], strides = [1, 1]} : vector<8x128xf32> to vector<8x32xf32>
    %308 = arith.negf %307 : vector<8x32xf32>
    %309 = math.exp %308 : vector<8x32xf32>
    %cst_106 = arith.constant 1.000000e+00 : f32
    %310 = vector.broadcast %cst_106 : f32 to vector<8x32xf32>
    %311 = arith.addf %310, %309 : vector<8x32xf32>
    %312 = arith.divf %310, %311 : vector<8x32xf32>
    %313 = vector.extract_strided_slice %300 {offsets = [0, 64], sizes = [8, 32], strides = [1, 1]} : vector<8x128xf32> to vector<8x32xf32>
    %314 = math.tanh %313 : vector<8x32xf32>
    %315 = vector.extract_strided_slice %300 {offsets = [0, 96], sizes = [8, 32], strides = [1, 1]} : vector<8x128xf32> to vector<8x32xf32>
    %316 = arith.negf %315 : vector<8x32xf32>
    %317 = math.exp %316 : vector<8x32xf32>
    %cst_107 = arith.constant 1.000000e+00 : f32
    %318 = vector.broadcast %cst_107 : f32 to vector<8x32xf32>
    %319 = arith.addf %318, %317 : vector<8x32xf32>
    %320 = arith.divf %318, %319 : vector<8x32xf32>
    %321 = arith.mulf %312, %246 : vector<8x32xf32>
    %322 = arith.mulf %306, %314 : vector<8x32xf32>
    %323 = arith.addf %321, %322 : vector<8x32xf32>
    %324 = math.tanh %323 : vector<8x32xf32>
    %325 = arith.mulf %320, %324 : vector<8x32xf32>
    %326 = arith.truncf %325 : vector<8x32xf32> to vector<8x32xbf16>
    %327 = arith.index_cast %292 : i32 to index
    %c0_108 = arith.constant 0 : index
    %c0_109 = arith.constant 0 : index
    %328 = vector.load %arg10[%327, %c0_108, %c0_109] : memref<8x8x32xbf16, #tpu.memory_space<vmem>>, vector<1x8x32xbf16>
    %329 = vector.shape_cast %328 : vector<1x8x32xbf16> to vector<8x32xbf16>
    %330 = vector.shape_cast %326 : vector<8x32xbf16> to vector<1x8x32xbf16>
    tpu.vector_store %arg10[%327, %c0_108, %c0_109], %330 {strides = array<i32>} : memref<8x8x32xbf16, #tpu.memory_space<vmem>>, vector<1x8x32xbf16>,
    %c4_i32 = arith.constant 4 : i32
    %c8_i32_110 = arith.constant 8 : i32
    %331 = arith.muli %c4_i32, %c8_i32_110 : i32
    %332 = tpu.assume_multiple %331, 8 : i32
    %333 = arith.index_cast %332 : i32 to index
    %c0_111 = arith.constant 0 : index
    %334 = vector.load %arg15[%333, %c0_111] : memref<64x128xf32, #tpu.memory_space<vmem>>, vector<8x128xf32>
    %335 = arith.truncf %286 : vector<8x32xf32> to vector<8x32xbf16>
    %c0_112 = arith.constant 0 : index
    %c0_113 = arith.constant 0 : index
    %336 = vector.load %arg5[%c0_112, %c0_113] : memref<32x128xbf16, #tpu.memory_space<vmem>>, vector<32x128xbf16>
    %cst_114 = arith.constant dense<0.000000e+00> : vector<8x128xf32>
    %337 = tpu.matmul %335, %336, %cst_114 {dimension_numbers = #tpu.dot_dimension_numbers<[1], [0], [0], [1], [0, 0, 1, 1], [], []>} : vector<8x32xbf16>, vector<32x128xbf16>, vector<8x128xf32> -> vector<8x128xf32>
    %338 = arith.addf %334, %337 : vector<8x128xf32>
    %339 = vector.extract_strided_slice %338 {offsets = [0, 0], sizes = [8, 32], strides = [1, 1]} : vector<8x128xf32> to vector<8x32xf32>
    %340 = arith.negf %339 : vector<8x32xf32>
    %341 = math.exp %340 : vector<8x32xf32>
    %cst_115 = arith.constant 1.000000e+00 : f32
    %342 = vector.broadcast %cst_115 : f32 to vector<8x32xf32>
    %343 = arith.addf %342, %341 : vector<8x32xf32>
    %344 = arith.divf %342, %343 : vector<8x32xf32>
    %345 = vector.extract_strided_slice %338 {offsets = [0, 32], sizes = [8, 32], strides = [1, 1]} : vector<8x128xf32> to vector<8x32xf32>
    %346 = arith.negf %345 : vector<8x32xf32>
    %347 = math.exp %346 : vector<8x32xf32>
    %cst_116 = arith.constant 1.000000e+00 : f32
    %348 = vector.broadcast %cst_116 : f32 to vector<8x32xf32>
    %349 = arith.addf %348, %347 : vector<8x32xf32>
    %350 = arith.divf %348, %349 : vector<8x32xf32>
    %351 = vector.extract_strided_slice %338 {offsets = [0, 64], sizes = [8, 32], strides = [1, 1]} : vector<8x128xf32> to vector<8x32xf32>
    %352 = math.tanh %351 : vector<8x32xf32>
    %353 = vector.extract_strided_slice %338 {offsets = [0, 96], sizes = [8, 32], strides = [1, 1]} : vector<8x128xf32> to vector<8x32xf32>
    %354 = arith.negf %353 : vector<8x32xf32>
    %355 = math.exp %354 : vector<8x32xf32>
    %cst_117 = arith.constant 1.000000e+00 : f32
    %356 = vector.broadcast %cst_117 : f32 to vector<8x32xf32>
    %357 = arith.addf %356, %355 : vector<8x32xf32>
    %358 = arith.divf %356, %357 : vector<8x32xf32>
    %359 = arith.mulf %350, %284 : vector<8x32xf32>
    %360 = arith.mulf %344, %352 : vector<8x32xf32>
    %361 = arith.addf %359, %360 : vector<8x32xf32>
    %362 = math.tanh %361 : vector<8x32xf32>
    %363 = arith.mulf %358, %362 : vector<8x32xf32>
    %364 = arith.truncf %363 : vector<8x32xf32> to vector<8x32xbf16>
    %365 = arith.index_cast %c4_i32 : i32 to index
    %c0_118 = arith.constant 0 : index
    %c0_119 = arith.constant 0 : index
    %366 = vector.load %arg9[%365, %c0_118, %c0_119] : memref<8x8x32xbf16, #tpu.memory_space<vmem>>, vector<1x8x32xbf16>
    %367 = vector.shape_cast %366 : vector<1x8x32xbf16> to vector<8x32xbf16>
    %368 = vector.shape_cast %364 : vector<8x32xbf16> to vector<1x8x32xbf16>
    tpu.vector_store %arg9[%365, %c0_118, %c0_119], %368 {strides = array<i32>} : memref<8x8x32xbf16, #tpu.memory_space<vmem>>, vector<1x8x32xbf16>,
    %c7_i32_120 = arith.constant 7 : i32
    %369 = arith.subi %c7_i32_120, %c4_i32 : i32
    %c8_i32_121 = arith.constant 8 : i32
    %370 = arith.muli %369, %c8_i32_121 : i32
    %371 = tpu.assume_multiple %370, 8 : i32
    %372 = arith.index_cast %371 : i32 to index
    %c0_122 = arith.constant 0 : index
    %373 = vector.load %arg16[%372, %c0_122] : memref<64x128xf32, #tpu.memory_space<vmem>>, vector<8x128xf32>
    %374 = arith.truncf %325 : vector<8x32xf32> to vector<8x32xbf16>
    %c0_123 = arith.constant 0 : index
    %c0_124 = arith.constant 0 : index
    %375 = vector.load %arg6[%c0_123, %c0_124] : memref<32x128xbf16, #tpu.memory_space<vmem>>, vector<32x128xbf16>
    %cst_125 = arith.constant dense<0.000000e+00> : vector<8x128xf32>
    %376 = tpu.matmul %374, %375, %cst_125 {dimension_numbers = #tpu.dot_dimension_numbers<[1], [0], [0], [1], [0, 0, 1, 1], [], []>} : vector<8x32xbf16>, vector<32x128xbf16>, vector<8x128xf32> -> vector<8x128xf32>
    %377 = arith.addf %373, %376 : vector<8x128xf32>
    %378 = vector.extract_strided_slice %377 {offsets = [0, 0], sizes = [8, 32], strides = [1, 1]} : vector<8x128xf32> to vector<8x32xf32>
    %379 = arith.negf %378 : vector<8x32xf32>
    %380 = math.exp %379 : vector<8x32xf32>
    %cst_126 = arith.constant 1.000000e+00 : f32
    %381 = vector.broadcast %cst_126 : f32 to vector<8x32xf32>
    %382 = arith.addf %381, %380 : vector<8x32xf32>
    %383 = arith.divf %381, %382 : vector<8x32xf32>
    %384 = vector.extract_strided_slice %377 {offsets = [0, 32], sizes = [8, 32], strides = [1, 1]} : vector<8x128xf32> to vector<8x32xf32>
    %385 = arith.negf %384 : vector<8x32xf32>
    %386 = math.exp %385 : vector<8x32xf32>
    %cst_127 = arith.constant 1.000000e+00 : f32
    %387 = vector.broadcast %cst_127 : f32 to vector<8x32xf32>
    %388 = arith.addf %387, %386 : vector<8x32xf32>
    %389 = arith.divf %387, %388 : vector<8x32xf32>
    %390 = vector.extract_strided_slice %377 {offsets = [0, 64], sizes = [8, 32], strides = [1, 1]} : vector<8x128xf32> to vector<8x32xf32>
    %391 = math.tanh %390 : vector<8x32xf32>
    %392 = vector.extract_strided_slice %377 {offsets = [0, 96], sizes = [8, 32], strides = [1, 1]} : vector<8x128xf32> to vector<8x32xf32>
    %393 = arith.negf %392 : vector<8x32xf32>
    %394 = math.exp %393 : vector<8x32xf32>
    %cst_128 = arith.constant 1.000000e+00 : f32
    %395 = vector.broadcast %cst_128 : f32 to vector<8x32xf32>
    %396 = arith.addf %395, %394 : vector<8x32xf32>
    %397 = arith.divf %395, %396 : vector<8x32xf32>
    %398 = arith.mulf %389, %323 : vector<8x32xf32>
    %399 = arith.mulf %383, %391 : vector<8x32xf32>
    %400 = arith.addf %398, %399 : vector<8x32xf32>
    %401 = math.tanh %400 : vector<8x32xf32>
    %402 = arith.mulf %397, %401 : vector<8x32xf32>
    %403 = arith.truncf %402 : vector<8x32xf32> to vector<8x32xbf16>
    %404 = arith.index_cast %369 : i32 to index
    %c0_129 = arith.constant 0 : index
    %c0_130 = arith.constant 0 : index
    %405 = vector.load %arg10[%404, %c0_129, %c0_130] : memref<8x8x32xbf16, #tpu.memory_space<vmem>>, vector<1x8x32xbf16>
    %406 = vector.shape_cast %405 : vector<1x8x32xbf16> to vector<8x32xbf16>
    %407 = vector.shape_cast %403 : vector<8x32xbf16> to vector<1x8x32xbf16>
    tpu.vector_store %arg10[%404, %c0_129, %c0_130], %407 {strides = array<i32>} : memref<8x8x32xbf16, #tpu.memory_space<vmem>>, vector<1x8x32xbf16>,
    %c5_i32 = arith.constant 5 : i32
    %c8_i32_131 = arith.constant 8 : i32
    %408 = arith.muli %c5_i32, %c8_i32_131 : i32
    %409 = tpu.assume_multiple %408, 8 : i32
    %410 = arith.index_cast %409 : i32 to index
    %c0_132 = arith.constant 0 : index
    %411 = vector.load %arg15[%410, %c0_132] : memref<64x128xf32, #tpu.memory_space<vmem>>, vector<8x128xf32>
    %412 = arith.truncf %363 : vector<8x32xf32> to vector<8x32xbf16>
    %c0_133 = arith.constant 0 : index
    %c0_134 = arith.constant 0 : index
    %413 = vector.load %arg5[%c0_133, %c0_134] : memref<32x128xbf16, #tpu.memory_space<vmem>>, vector<32x128xbf16>
    %cst_135 = arith.constant dense<0.000000e+00> : vector<8x128xf32>
    %414 = tpu.matmul %412, %413, %cst_135 {dimension_numbers = #tpu.dot_dimension_numbers<[1], [0], [0], [1], [0, 0, 1, 1], [], []>} : vector<8x32xbf16>, vector<32x128xbf16>, vector<8x128xf32> -> vector<8x128xf32>
    %415 = arith.addf %411, %414 : vector<8x128xf32>
    %416 = vector.extract_strided_slice %415 {offsets = [0, 0], sizes = [8, 32], strides = [1, 1]} : vector<8x128xf32> to vector<8x32xf32>
    %417 = arith.negf %416 : vector<8x32xf32>
    %418 = math.exp %417 : vector<8x32xf32>
    %cst_136 = arith.constant 1.000000e+00 : f32
    %419 = vector.broadcast %cst_136 : f32 to vector<8x32xf32>
    %420 = arith.addf %419, %418 : vector<8x32xf32>
    %421 = arith.divf %419, %420 : vector<8x32xf32>
    %422 = vector.extract_strided_slice %415 {offsets = [0, 32], sizes = [8, 32], strides = [1, 1]} : vector<8x128xf32> to vector<8x32xf32>
    %423 = arith.negf %422 : vector<8x32xf32>
    %424 = math.exp %423 : vector<8x32xf32>
    %cst_137 = arith.constant 1.000000e+00 : f32
    %425 = vector.broadcast %cst_137 : f32 to vector<8x32xf32>
    %426 = arith.addf %425, %424 : vector<8x32xf32>
    %427 = arith.divf %425, %426 : vector<8x32xf32>
    %428 = vector.extract_strided_slice %415 {offsets = [0, 64], sizes = [8, 32], strides = [1, 1]} : vector<8x128xf32> to vector<8x32xf32>
    %429 = math.tanh %428 : vector<8x32xf32>
    %430 = vector.extract_strided_slice %415 {offsets = [0, 96], sizes = [8, 32], strides = [1, 1]} : vector<8x128xf32> to vector<8x32xf32>
    %431 = arith.negf %430 : vector<8x32xf32>
    %432 = math.exp %431 : vector<8x32xf32>
    %cst_138 = arith.constant 1.000000e+00 : f32
    %433 = vector.broadcast %cst_138 : f32 to vector<8x32xf32>
    %434 = arith.addf %433, %432 : vector<8x32xf32>
    %435 = arith.divf %433, %434 : vector<8x32xf32>
    %436 = arith.mulf %427, %361 : vector<8x32xf32>
    %437 = arith.mulf %421, %429 : vector<8x32xf32>
    %438 = arith.addf %436, %437 : vector<8x32xf32>
    %439 = math.tanh %438 : vector<8x32xf32>
    %440 = arith.mulf %435, %439 : vector<8x32xf32>
    %441 = arith.truncf %440 : vector<8x32xf32> to vector<8x32xbf16>
    %442 = arith.index_cast %c5_i32 : i32 to index
    %c0_139 = arith.constant 0 : index
    %c0_140 = arith.constant 0 : index
    %443 = vector.load %arg9[%442, %c0_139, %c0_140] : memref<8x8x32xbf16, #tpu.memory_space<vmem>>, vector<1x8x32xbf16>
    %444 = vector.shape_cast %443 : vector<1x8x32xbf16> to vector<8x32xbf16>
    %445 = vector.shape_cast %441 : vector<8x32xbf16> to vector<1x8x32xbf16>
    tpu.vector_store %arg9[%442, %c0_139, %c0_140], %445 {strides = array<i32>} : memref<8x8x32xbf16, #tpu.memory_space<vmem>>, vector<1x8x32xbf16>,
    %c7_i32_141 = arith.constant 7 : i32
    %446 = arith.subi %c7_i32_141, %c5_i32 : i32
    %c8_i32_142 = arith.constant 8 : i32
    %447 = arith.muli %446, %c8_i32_142 : i32
    %448 = tpu.assume_multiple %447, 8 : i32
    %449 = arith.index_cast %448 : i32 to index
    %c0_143 = arith.constant 0 : index
    %450 = vector.load %arg16[%449, %c0_143] : memref<64x128xf32, #tpu.memory_space<vmem>>, vector<8x128xf32>
    %451 = arith.truncf %402 : vector<8x32xf32> to vector<8x32xbf16>
    %c0_144 = arith.constant 0 : index
    %c0_145 = arith.constant 0 : index
    %452 = vector.load %arg6[%c0_144, %c0_145] : memref<32x128xbf16, #tpu.memory_space<vmem>>, vector<32x128xbf16>
    %cst_146 = arith.constant dense<0.000000e+00> : vector<8x128xf32>
    %453 = tpu.matmul %451, %452, %cst_146 {dimension_numbers = #tpu.dot_dimension_numbers<[1], [0], [0], [1], [0, 0, 1, 1], [], []>} : vector<8x32xbf16>, vector<32x128xbf16>, vector<8x128xf32> -> vector<8x128xf32>
    %454 = arith.addf %450, %453 : vector<8x128xf32>
    %455 = vector.extract_strided_slice %454 {offsets = [0, 0], sizes = [8, 32], strides = [1, 1]} : vector<8x128xf32> to vector<8x32xf32>
    %456 = arith.negf %455 : vector<8x32xf32>
    %457 = math.exp %456 : vector<8x32xf32>
    %cst_147 = arith.constant 1.000000e+00 : f32
    %458 = vector.broadcast %cst_147 : f32 to vector<8x32xf32>
    %459 = arith.addf %458, %457 : vector<8x32xf32>
    %460 = arith.divf %458, %459 : vector<8x32xf32>
    %461 = vector.extract_strided_slice %454 {offsets = [0, 32], sizes = [8, 32], strides = [1, 1]} : vector<8x128xf32> to vector<8x32xf32>
    %462 = arith.negf %461 : vector<8x32xf32>
    %463 = math.exp %462 : vector<8x32xf32>
    %cst_148 = arith.constant 1.000000e+00 : f32
    %464 = vector.broadcast %cst_148 : f32 to vector<8x32xf32>
    %465 = arith.addf %464, %463 : vector<8x32xf32>
    %466 = arith.divf %464, %465 : vector<8x32xf32>
    %467 = vector.extract_strided_slice %454 {offsets = [0, 64], sizes = [8, 32], strides = [1, 1]} : vector<8x128xf32> to vector<8x32xf32>
    %468 = math.tanh %467 : vector<8x32xf32>
    %469 = vector.extract_strided_slice %454 {offsets = [0, 96], sizes = [8, 32], strides = [1, 1]} : vector<8x128xf32> to vector<8x32xf32>
    %470 = arith.negf %469 : vector<8x32xf32>
    %471 = math.exp %470 : vector<8x32xf32>
    %cst_149 = arith.constant 1.000000e+00 : f32
    %472 = vector.broadcast %cst_149 : f32 to vector<8x32xf32>
    %473 = arith.addf %472, %471 : vector<8x32xf32>
    %474 = arith.divf %472, %473 : vector<8x32xf32>
    %475 = arith.mulf %466, %400 : vector<8x32xf32>
    %476 = arith.mulf %460, %468 : vector<8x32xf32>
    %477 = arith.addf %475, %476 : vector<8x32xf32>
    %478 = math.tanh %477 : vector<8x32xf32>
    %479 = arith.mulf %474, %478 : vector<8x32xf32>
    %480 = arith.truncf %479 : vector<8x32xf32> to vector<8x32xbf16>
    %481 = arith.index_cast %446 : i32 to index
    %c0_150 = arith.constant 0 : index
    %c0_151 = arith.constant 0 : index
    %482 = vector.load %arg10[%481, %c0_150, %c0_151] : memref<8x8x32xbf16, #tpu.memory_space<vmem>>, vector<1x8x32xbf16>
    %483 = vector.shape_cast %482 : vector<1x8x32xbf16> to vector<8x32xbf16>
    %484 = vector.shape_cast %480 : vector<8x32xbf16> to vector<1x8x32xbf16>
    tpu.vector_store %arg10[%481, %c0_150, %c0_151], %484 {strides = array<i32>} : memref<8x8x32xbf16, #tpu.memory_space<vmem>>, vector<1x8x32xbf16>,
    %c6_i32 = arith.constant 6 : i32
    %c8_i32_152 = arith.constant 8 : i32
    %485 = arith.muli %c6_i32, %c8_i32_152 : i32
    %486 = tpu.assume_multiple %485, 8 : i32
    %487 = arith.index_cast %486 : i32 to index
    %c0_153 = arith.constant 0 : index
    %488 = vector.load %arg15[%487, %c0_153] : memref<64x128xf32, #tpu.memory_space<vmem>>, vector<8x128xf32>
    %489 = arith.truncf %440 : vector<8x32xf32> to vector<8x32xbf16>
    %c0_154 = arith.constant 0 : index
    %c0_155 = arith.constant 0 : index
    %490 = vector.load %arg5[%c0_154, %c0_155] : memref<32x128xbf16, #tpu.memory_space<vmem>>, vector<32x128xbf16>
    %cst_156 = arith.constant dense<0.000000e+00> : vector<8x128xf32>
    %491 = tpu.matmul %489, %490, %cst_156 {dimension_numbers = #tpu.dot_dimension_numbers<[1], [0], [0], [1], [0, 0, 1, 1], [], []>} : vector<8x32xbf16>, vector<32x128xbf16>, vector<8x128xf32> -> vector<8x128xf32>
    %492 = arith.addf %488, %491 : vector<8x128xf32>
    %493 = vector.extract_strided_slice %492 {offsets = [0, 0], sizes = [8, 32], strides = [1, 1]} : vector<8x128xf32> to vector<8x32xf32>
    %494 = arith.negf %493 : vector<8x32xf32>
    %495 = math.exp %494 : vector<8x32xf32>
    %cst_157 = arith.constant 1.000000e+00 : f32
    %496 = vector.broadcast %cst_157 : f32 to vector<8x32xf32>
    %497 = arith.addf %496, %495 : vector<8x32xf32>
    %498 = arith.divf %496, %497 : vector<8x32xf32>
    %499 = vector.extract_strided_slice %492 {offsets = [0, 32], sizes = [8, 32], strides = [1, 1]} : vector<8x128xf32> to vector<8x32xf32>
    %500 = arith.negf %499 : vector<8x32xf32>
    %501 = math.exp %500 : vector<8x32xf32>
    %cst_158 = arith.constant 1.000000e+00 : f32
    %502 = vector.broadcast %cst_158 : f32 to vector<8x32xf32>
    %503 = arith.addf %502, %501 : vector<8x32xf32>
    %504 = arith.divf %502, %503 : vector<8x32xf32>
    %505 = vector.extract_strided_slice %492 {offsets = [0, 64], sizes = [8, 32], strides = [1, 1]} : vector<8x128xf32> to vector<8x32xf32>
    %506 = math.tanh %505 : vector<8x32xf32>
    %507 = vector.extract_strided_slice %492 {offsets = [0, 96], sizes = [8, 32], strides = [1, 1]} : vector<8x128xf32> to vector<8x32xf32>
    %508 = arith.negf %507 : vector<8x32xf32>
    %509 = math.exp %508 : vector<8x32xf32>
    %cst_159 = arith.constant 1.000000e+00 : f32
    %510 = vector.broadcast %cst_159 : f32 to vector<8x32xf32>
    %511 = arith.addf %510, %509 : vector<8x32xf32>
    %512 = arith.divf %510, %511 : vector<8x32xf32>
    %513 = arith.mulf %504, %438 : vector<8x32xf32>
    %514 = arith.mulf %498, %506 : vector<8x32xf32>
    %515 = arith.addf %513, %514 : vector<8x32xf32>
    %516 = math.tanh %515 : vector<8x32xf32>
    %517 = arith.mulf %512, %516 : vector<8x32xf32>
    %518 = arith.truncf %517 : vector<8x32xf32> to vector<8x32xbf16>
    %519 = arith.index_cast %c6_i32 : i32 to index
    %c0_160 = arith.constant 0 : index
    %c0_161 = arith.constant 0 : index
    %520 = vector.load %arg9[%519, %c0_160, %c0_161] : memref<8x8x32xbf16, #tpu.memory_space<vmem>>, vector<1x8x32xbf16>
    %521 = vector.shape_cast %520 : vector<1x8x32xbf16> to vector<8x32xbf16>
    %522 = vector.shape_cast %518 : vector<8x32xbf16> to vector<1x8x32xbf16>
    tpu.vector_store %arg9[%519, %c0_160, %c0_161], %522 {strides = array<i32>} : memref<8x8x32xbf16, #tpu.memory_space<vmem>>, vector<1x8x32xbf16>,
    %c7_i32_162 = arith.constant 7 : i32
    %523 = arith.subi %c7_i32_162, %c6_i32 : i32
    %c8_i32_163 = arith.constant 8 : i32
    %524 = arith.muli %523, %c8_i32_163 : i32
    %525 = tpu.assume_multiple %524, 8 : i32
    %526 = arith.index_cast %525 : i32 to index
    %c0_164 = arith.constant 0 : index
    %527 = vector.load %arg16[%526, %c0_164] : memref<64x128xf32, #tpu.memory_space<vmem>>, vector<8x128xf32>
    %528 = arith.truncf %479 : vector<8x32xf32> to vector<8x32xbf16>
    %c0_165 = arith.constant 0 : index
    %c0_166 = arith.constant 0 : index
    %529 = vector.load %arg6[%c0_165, %c0_166] : memref<32x128xbf16, #tpu.memory_space<vmem>>, vector<32x128xbf16>
    %cst_167 = arith.constant dense<0.000000e+00> : vector<8x128xf32>
    %530 = tpu.matmul %528, %529, %cst_167 {dimension_numbers = #tpu.dot_dimension_numbers<[1], [0], [0], [1], [0, 0, 1, 1], [], []>} : vector<8x32xbf16>, vector<32x128xbf16>, vector<8x128xf32> -> vector<8x128xf32>
    %531 = arith.addf %527, %530 : vector<8x128xf32>
    %532 = vector.extract_strided_slice %531 {offsets = [0, 0], sizes = [8, 32], strides = [1, 1]} : vector<8x128xf32> to vector<8x32xf32>
    %533 = arith.negf %532 : vector<8x32xf32>
    %534 = math.exp %533 : vector<8x32xf32>
    %cst_168 = arith.constant 1.000000e+00 : f32
    %535 = vector.broadcast %cst_168 : f32 to vector<8x32xf32>
    %536 = arith.addf %535, %534 : vector<8x32xf32>
    %537 = arith.divf %535, %536 : vector<8x32xf32>
    %538 = vector.extract_strided_slice %531 {offsets = [0, 32], sizes = [8, 32], strides = [1, 1]} : vector<8x128xf32> to vector<8x32xf32>
    %539 = arith.negf %538 : vector<8x32xf32>
    %540 = math.exp %539 : vector<8x32xf32>
    %cst_169 = arith.constant 1.000000e+00 : f32
    %541 = vector.broadcast %cst_169 : f32 to vector<8x32xf32>
    %542 = arith.addf %541, %540 : vector<8x32xf32>
    %543 = arith.divf %541, %542 : vector<8x32xf32>
    %544 = vector.extract_strided_slice %531 {offsets = [0, 64], sizes = [8, 32], strides = [1, 1]} : vector<8x128xf32> to vector<8x32xf32>
    %545 = math.tanh %544 : vector<8x32xf32>
    %546 = vector.extract_strided_slice %531 {offsets = [0, 96], sizes = [8, 32], strides = [1, 1]} : vector<8x128xf32> to vector<8x32xf32>
    %547 = arith.negf %546 : vector<8x32xf32>
    %548 = math.exp %547 : vector<8x32xf32>
    %cst_170 = arith.constant 1.000000e+00 : f32
    %549 = vector.broadcast %cst_170 : f32 to vector<8x32xf32>
    %550 = arith.addf %549, %548 : vector<8x32xf32>
    %551 = arith.divf %549, %550 : vector<8x32xf32>
    %552 = arith.mulf %543, %477 : vector<8x32xf32>
    %553 = arith.mulf %537, %545 : vector<8x32xf32>
    %554 = arith.addf %552, %553 : vector<8x32xf32>
    %555 = math.tanh %554 : vector<8x32xf32>
    %556 = arith.mulf %551, %555 : vector<8x32xf32>
    %557 = arith.truncf %556 : vector<8x32xf32> to vector<8x32xbf16>
    %558 = arith.index_cast %523 : i32 to index
    %c0_171 = arith.constant 0 : index
    %c0_172 = arith.constant 0 : index
    %559 = vector.load %arg10[%558, %c0_171, %c0_172] : memref<8x8x32xbf16, #tpu.memory_space<vmem>>, vector<1x8x32xbf16>
    %560 = vector.shape_cast %559 : vector<1x8x32xbf16> to vector<8x32xbf16>
    %561 = vector.shape_cast %557 : vector<8x32xbf16> to vector<1x8x32xbf16>
    tpu.vector_store %arg10[%558, %c0_171, %c0_172], %561 {strides = array<i32>} : memref<8x8x32xbf16, #tpu.memory_space<vmem>>, vector<1x8x32xbf16>,
    %c7_i32_173 = arith.constant 7 : i32
    %c8_i32_174 = arith.constant 8 : i32
    %562 = arith.muli %c7_i32_173, %c8_i32_174 : i32
    %563 = tpu.assume_multiple %562, 8 : i32
    %564 = arith.index_cast %563 : i32 to index
    %c0_175 = arith.constant 0 : index
    %565 = vector.load %arg15[%564, %c0_175] : memref<64x128xf32, #tpu.memory_space<vmem>>, vector<8x128xf32>
    %566 = arith.truncf %517 : vector<8x32xf32> to vector<8x32xbf16>
    %c0_176 = arith.constant 0 : index
    %c0_177 = arith.constant 0 : index
    %567 = vector.load %arg5[%c0_176, %c0_177] : memref<32x128xbf16, #tpu.memory_space<vmem>>, vector<32x128xbf16>
    %cst_178 = arith.constant dense<0.000000e+00> : vector<8x128xf32>
    %568 = tpu.matmul %566, %567, %cst_178 {dimension_numbers = #tpu.dot_dimension_numbers<[1], [0], [0], [1], [0, 0, 1, 1], [], []>} : vector<8x32xbf16>, vector<32x128xbf16>, vector<8x128xf32> -> vector<8x128xf32>
    %569 = arith.addf %565, %568 : vector<8x128xf32>
    %570 = vector.extract_strided_slice %569 {offsets = [0, 0], sizes = [8, 32], strides = [1, 1]} : vector<8x128xf32> to vector<8x32xf32>
    %571 = arith.negf %570 : vector<8x32xf32>
    %572 = math.exp %571 : vector<8x32xf32>
    %cst_179 = arith.constant 1.000000e+00 : f32
    %573 = vector.broadcast %cst_179 : f32 to vector<8x32xf32>
    %574 = arith.addf %573, %572 : vector<8x32xf32>
    %575 = arith.divf %573, %574 : vector<8x32xf32>
    %576 = vector.extract_strided_slice %569 {offsets = [0, 32], sizes = [8, 32], strides = [1, 1]} : vector<8x128xf32> to vector<8x32xf32>
    %577 = arith.negf %576 : vector<8x32xf32>
    %578 = math.exp %577 : vector<8x32xf32>
    %cst_180 = arith.constant 1.000000e+00 : f32
    %579 = vector.broadcast %cst_180 : f32 to vector<8x32xf32>
    %580 = arith.addf %579, %578 : vector<8x32xf32>
    %581 = arith.divf %579, %580 : vector<8x32xf32>
    %582 = vector.extract_strided_slice %569 {offsets = [0, 64], sizes = [8, 32], strides = [1, 1]} : vector<8x128xf32> to vector<8x32xf32>
    %583 = math.tanh %582 : vector<8x32xf32>
    %584 = vector.extract_strided_slice %569 {offsets = [0, 96], sizes = [8, 32], strides = [1, 1]} : vector<8x128xf32> to vector<8x32xf32>
    %585 = arith.negf %584 : vector<8x32xf32>
    %586 = math.exp %585 : vector<8x32xf32>
    %cst_181 = arith.constant 1.000000e+00 : f32
    %587 = vector.broadcast %cst_181 : f32 to vector<8x32xf32>
    %588 = arith.addf %587, %586 : vector<8x32xf32>
    %589 = arith.divf %587, %588 : vector<8x32xf32>
    %590 = arith.mulf %581, %515 : vector<8x32xf32>
    %591 = arith.mulf %575, %583 : vector<8x32xf32>
    %592 = arith.addf %590, %591 : vector<8x32xf32>
    %593 = math.tanh %592 : vector<8x32xf32>
    %594 = arith.mulf %589, %593 : vector<8x32xf32>
    %595 = arith.truncf %594 : vector<8x32xf32> to vector<8x32xbf16>
    %596 = arith.index_cast %c7_i32_173 : i32 to index
    %c0_182 = arith.constant 0 : index
    %c0_183 = arith.constant 0 : index
    %597 = vector.load %arg9[%596, %c0_182, %c0_183] : memref<8x8x32xbf16, #tpu.memory_space<vmem>>, vector<1x8x32xbf16>
    %598 = vector.shape_cast %597 : vector<1x8x32xbf16> to vector<8x32xbf16>
    %599 = vector.shape_cast %595 : vector<8x32xbf16> to vector<1x8x32xbf16>
    tpu.vector_store %arg9[%596, %c0_182, %c0_183], %599 {strides = array<i32>} : memref<8x8x32xbf16, #tpu.memory_space<vmem>>, vector<1x8x32xbf16>,
    %c7_i32_184 = arith.constant 7 : i32
    %600 = arith.subi %c7_i32_184, %c7_i32_173 : i32
    %c8_i32_185 = arith.constant 8 : i32
    %601 = arith.muli %600, %c8_i32_185 : i32
    %602 = tpu.assume_multiple %601, 8 : i32
    %603 = arith.index_cast %602 : i32 to index
    %c0_186 = arith.constant 0 : index
    %604 = vector.load %arg16[%603, %c0_186] : memref<64x128xf32, #tpu.memory_space<vmem>>, vector<8x128xf32>
    %605 = arith.truncf %556 : vector<8x32xf32> to vector<8x32xbf16>
    %c0_187 = arith.constant 0 : index
    %c0_188 = arith.constant 0 : index
    %606 = vector.load %arg6[%c0_187, %c0_188] : memref<32x128xbf16, #tpu.memory_space<vmem>>, vector<32x128xbf16>
    %cst_189 = arith.constant dense<0.000000e+00> : vector<8x128xf32>
    %607 = tpu.matmul %605, %606, %cst_189 {dimension_numbers = #tpu.dot_dimension_numbers<[1], [0], [0], [1], [0, 0, 1, 1], [], []>} : vector<8x32xbf16>, vector<32x128xbf16>, vector<8x128xf32> -> vector<8x128xf32>
    %608 = arith.addf %604, %607 : vector<8x128xf32>
    %609 = vector.extract_strided_slice %608 {offsets = [0, 0], sizes = [8, 32], strides = [1, 1]} : vector<8x128xf32> to vector<8x32xf32>
    %610 = arith.negf %609 : vector<8x32xf32>
    %611 = math.exp %610 : vector<8x32xf32>
    %cst_190 = arith.constant 1.000000e+00 : f32
    %612 = vector.broadcast %cst_190 : f32 to vector<8x32xf32>
    %613 = arith.addf %612, %611 : vector<8x32xf32>
    %614 = arith.divf %612, %613 : vector<8x32xf32>
    %615 = vector.extract_strided_slice %608 {offsets = [0, 32], sizes = [8, 32], strides = [1, 1]} : vector<8x128xf32> to vector<8x32xf32>
    %616 = arith.negf %615 : vector<8x32xf32>
    %617 = math.exp %616 : vector<8x32xf32>
    %cst_191 = arith.constant 1.000000e+00 : f32
    %618 = vector.broadcast %cst_191 : f32 to vector<8x32xf32>
    %619 = arith.addf %618, %617 : vector<8x32xf32>
    %620 = arith.divf %618, %619 : vector<8x32xf32>
    %621 = vector.extract_strided_slice %608 {offsets = [0, 64], sizes = [8, 32], strides = [1, 1]} : vector<8x128xf32> to vector<8x32xf32>
    %622 = math.tanh %621 : vector<8x32xf32>
    %623 = vector.extract_strided_slice %608 {offsets = [0, 96], sizes = [8, 32], strides = [1, 1]} : vector<8x128xf32> to vector<8x32xf32>
    %624 = arith.negf %623 : vector<8x32xf32>
    %625 = math.exp %624 : vector<8x32xf32>
    %cst_192 = arith.constant 1.000000e+00 : f32
    %626 = vector.broadcast %cst_192 : f32 to vector<8x32xf32>
    %627 = arith.addf %626, %625 : vector<8x32xf32>
    %628 = arith.divf %626, %627 : vector<8x32xf32>
    %629 = arith.mulf %620, %554 : vector<8x32xf32>
    %630 = arith.mulf %614, %622 : vector<8x32xf32>
    %631 = arith.addf %629, %630 : vector<8x32xf32>
    %632 = math.tanh %631 : vector<8x32xf32>
    %633 = arith.mulf %628, %632 : vector<8x32xf32>
    %634 = arith.truncf %633 : vector<8x32xf32> to vector<8x32xbf16>
    %635 = arith.index_cast %600 : i32 to index
    %c0_193 = arith.constant 0 : index
    %c0_194 = arith.constant 0 : index
    %636 = vector.load %arg10[%635, %c0_193, %c0_194] : memref<8x8x32xbf16, #tpu.memory_space<vmem>>, vector<1x8x32xbf16>
    %637 = vector.shape_cast %636 : vector<1x8x32xbf16> to vector<8x32xbf16>
    %638 = vector.shape_cast %634 : vector<8x32xbf16> to vector<1x8x32xbf16>
    tpu.vector_store %arg10[%635, %c0_193, %c0_194], %638 {strides = array<i32>} : memref<8x8x32xbf16, #tpu.memory_space<vmem>>, vector<1x8x32xbf16>,
    %c8_i32_195 = arith.constant 8 : i32
    %c0_196 = arith.constant 0 : index
    %c0_197 = arith.constant 0 : index
    %639 = vector.load %arg11[%c0_196, %c0_197] : memref<8x32xf32, #tpu.memory_space<vmem>>, vector<8x32xf32>
    tpu.vector_store %arg11[%c0_196, %c0_197], %594 {strides = array<i32>} : memref<8x32xf32, #tpu.memory_space<vmem>>, vector<8x32xf32>,
    %c0_198 = arith.constant 0 : index
    %c0_199 = arith.constant 0 : index
    %640 = vector.load %arg12[%c0_198, %c0_199] : memref<8x32xf32, #tpu.memory_space<vmem>>, vector<8x32xf32>
    tpu.vector_store %arg12[%c0_198, %c0_199], %592 {strides = array<i32>} : memref<8x32xf32, #tpu.memory_space<vmem>>, vector<8x32xf32>,
    %c0_200 = arith.constant 0 : index
    %c0_201 = arith.constant 0 : index
    %641 = vector.load %arg13[%c0_200, %c0_201] : memref<8x32xf32, #tpu.memory_space<vmem>>, vector<8x32xf32>
    tpu.vector_store %arg13[%c0_200, %c0_201], %633 {strides = array<i32>} : memref<8x32xf32, #tpu.memory_space<vmem>>, vector<8x32xf32>,
    %c0_202 = arith.constant 0 : index
    %c0_203 = arith.constant 0 : index
    %642 = vector.load %arg14[%c0_202, %c0_203] : memref<8x32xf32, #tpu.memory_space<vmem>>, vector<8x32xf32>
    tpu.vector_store %arg14[%c0_202, %c0_203], %631 {strides = array<i32>} : memref<8x32xf32, #tpu.memory_space<vmem>>, vector<8x32xf32>,
    return
  }
  func.func @transform_0(%arg0: i32) -> (i32, i32, i32) {
    %c0_i32 = arith.constant 0 : i32
    %c0_i32_0 = arith.constant 0 : i32
    %c0_i32_1 = arith.constant 0 : i32
    return %arg0, %c0_i32, %c0_i32_0 : i32, i32, i32
  }
  func.func @transform_1(%arg0: i32) -> (i32, i32, i32) {
    %c0_i32 = arith.constant 0 : i32
    %0 = arith.subi %c0_i32, %arg0 : i32
    %c0_i32_0 = arith.constant 0 : i32
    %c0_i32_1 = arith.constant 0 : i32
    %c0_i32_2 = arith.constant 0 : i32
    return %0, %c0_i32_0, %c0_i32_1 : i32, i32, i32
  }
  func.func @transform_2(%arg0: i32) -> (i32, i32) {
    %c0_i32 = arith.constant 0 : i32
    %c0_i32_0 = arith.constant 0 : i32
    %c0_i32_1 = arith.constant 0 : i32
    return %c0_i32, %c0_i32_0 : i32, i32
  }
  func.func @transform_3(%arg0: i32) -> (i32, i32) {
    %c0_i32 = arith.constant 0 : i32
    %c0_i32_0 = arith.constant 0 : i32
    %c0_i32_1 = arith.constant 0 : i32
    return %c0_i32, %c0_i32_0 : i32, i32
  }
  func.func @transform_4(%arg0: i32) -> (i32, i32) {
    %c0_i32 = arith.constant 0 : i32
    %c0_i32_0 = arith.constant 0 : i32
    %c0_i32_1 = arith.constant 0 : i32
    return %c0_i32, %c0_i32_0 : i32, i32
  }
  func.func @transform_5(%arg0: i32) -> (i32, i32) {
    %c0_i32 = arith.constant 0 : i32
    %c0_i32_0 = arith.constant 0 : i32
    %c0_i32_1 = arith.constant 0 : i32
    return %c0_i32, %c0_i32_0 : i32, i32
  }
  func.func @transform_6(%arg0: i32) -> (i32, i32) {
    %c0_i32 = arith.constant 0 : i32
    %c0_i32_0 = arith.constant 0 : i32
    %c0_i32_1 = arith.constant 0 : i32
    return %c0_i32, %c0_i32_0 : i32, i32
  }
  func.func @transform_7(%arg0: i32) -> (i32, i32) {
    %c0_i32 = arith.constant 0 : i32
    %c0_i32_0 = arith.constant 0 : i32
    %c0_i32_1 = arith.constant 0 : i32
    return %c0_i32, %c0_i32_0 : i32, i32
  }
  func.func @transform_8(%arg0: i32) -> (i32, i32, i32) {
    %c0_i32 = arith.constant 0 : i32
    %c0_i32_0 = arith.constant 0 : i32
    %c0_i32_1 = arith.constant 0 : i32
    return %arg0, %c0_i32, %c0_i32_0 : i32, i32, i32
  }
  func.func @transform_9(%arg0: i32) -> (i32, i32, i32) {
    %c0_i32 = arith.constant 0 : i32
    %0 = arith.subi %c0_i32, %arg0 : i32
    %c0_i32_0 = arith.constant 0 : i32
    %c0_i32_1 = arith.constant 0 : i32
    %c0_i32_2 = arith.constant 0 : i32
    return %0, %c0_i32_0, %c0_i32_1 : i32, i32, i32
  }
}

module attributes {stable_mosaic.version = 11 : i64} {
  func.func @_bilstm_chunk_kernel(%arg0: i32, %arg1: memref<8x8x64xbf16, #tpu.memory_space<vmem>>, %arg2: memref<8x8x64xbf16, #tpu.memory_space<vmem>>, %arg3: memref<64x128xbf16, #tpu.memory_space<vmem>>, %arg4: memref<64x128xbf16, #tpu.memory_space<vmem>>, %arg5: memref<32x128xbf16, #tpu.memory_space<vmem>>, %arg6: memref<32x128xbf16, #tpu.memory_space<vmem>>, %arg7: memref<1x128xf32, #tpu.memory_space<vmem>>, %arg8: memref<1x128xf32, #tpu.memory_space<vmem>>, %arg9: memref<8x8x32xbf16, #tpu.memory_space<vmem>>, %arg10: memref<8x8x32xbf16, #tpu.memory_space<vmem>>, %arg11: memref<8x32xf32, #tpu.memory_space<vmem>>, %arg12: memref<8x32xf32, #tpu.memory_space<vmem>>, %arg13: memref<8x32xf32, #tpu.memory_space<vmem>>, %arg14: memref<8x32xf32, #tpu.memory_space<vmem>>, %arg15: memref<64x128xf32, #tpu.memory_space<vmem>>, %arg16: memref<64x128xf32, #tpu.memory_space<vmem>>) attributes {dimension_semantics = [#tpu.dimension_semantics<arbitrary>], iteration_bounds = array<i64: 1>, scalar_prefetch = 0 : i64, scratch_operands = 6 : i64, tpu.core_type = #tpu.core_type<tc>, window_params = [{transform_indices = @transform_0, window_bounds = array<i64: 8, 8, 64>}, {transform_indices = @transform_1, window_bounds = array<i64: 8, 8, 64>}, {pipeline_mode = #tpu.pipeline_mode<synchronous>, transform_indices = @transform_2, window_bounds = array<i64: 64, 128>}, {pipeline_mode = #tpu.pipeline_mode<synchronous>, transform_indices = @transform_3, window_bounds = array<i64: 64, 128>}, {pipeline_mode = #tpu.pipeline_mode<synchronous>, transform_indices = @transform_4, window_bounds = array<i64: 32, 128>}, {pipeline_mode = #tpu.pipeline_mode<synchronous>, transform_indices = @transform_5, window_bounds = array<i64: 32, 128>}, {pipeline_mode = #tpu.pipeline_mode<synchronous>, transform_indices = @transform_6, window_bounds = array<i64: 1, 128>}, {pipeline_mode = #tpu.pipeline_mode<synchronous>, transform_indices = @transform_7, window_bounds = array<i64: 1, 128>}, {transform_indices = @transform_8, window_bounds = array<i64: 8, 8, 32>}, {transform_indices = @transform_9, window_bounds = array<i64: 8, 8, 32>}]} {
    %c0_i32 = arith.constant 0 : i32
    %0 = arith.cmpi eq, %arg0, %c0_i32 : i32
    %1 = arith.extui %0 : i1 to i32
    %c0_i32_0 = arith.constant 0 : i32
    %2 = arith.cmpi ne, %1, %c0_i32_0 : i32
    scf.if %2 {
      %cst_204 = arith.constant 0.000000e+00 : f32
      %643 = vector.broadcast %cst_204 : f32 to vector<8x32xf32>
      %c0_205 = arith.constant 0 : index
      %c0_206 = arith.constant 0 : index
      %644 = vector.load %arg11[%c0_205, %c0_206] : memref<8x32xf32, #tpu.memory_space<vmem>>, vector<8x32xf32>
      tpu.vector_store %arg11[%c0_205, %c0_206], %643 {strides = array<i32>} : memref<8x32xf32, #tpu.memory_space<vmem>>, vector<8x32xf32>,
      %cst_207 = arith.constant 0.000000e+00 : f32
      %645 = vector.broadcast %cst_207 : f32 to vector<8x32xf32>
      %c0_208 = arith.constant 0 : index
      %c0_209 = arith.constant 0 : index
      %646 = vector.load %arg12[%c0_208, %c0_209] : memref<8x32xf32, #tpu.memory_space<vmem>>, vector<8x32xf32>
      tpu.vector_store %arg12[%c0_208, %c0_209], %645 {strides = array<i32>} : memref<8x32xf32, #tpu.memory_space<vmem>>, vector<8x32xf32>,
      %cst_210 = arith.constant 0.000000e+00 : f32
      %647 = vector.broadcast %cst_210 : f32 to vector<8x32xf32>
      %c0_211 = arith.constant 0 : index
      %c0_212 = arith.constant 0 : index
      %648 = vector.load %arg13[%c0_211, %c0_212] : memref<8x32xf32, #tpu.memory_space<vmem>>, vector<8x32xf32>
      tpu.vector_store %arg13[%c0_211, %c0_212], %647 {strides = array<i32>} : memref<8x32xf32, #tpu.memory_space<vmem>>, vector<8x32xf32>,
      %cst_213 = arith.constant 0.000000e+00 : f32
      %649 = vector.broadcast %cst_213 : f32 to vector<8x32xf32>
      %c0_214 = arith.constant 0 : index
      %c0_215 = arith.constant 0 : index
      %650 = vector.load %arg14[%c0_214, %c0_215] : memref<8x32xf32, #tpu.memory_space<vmem>>, vector<8x32xf32>
      tpu.vector_store %arg14[%c0_214, %c0_215], %649 {strides = array<i32>} : memref<8x32xf32, #tpu.memory_space<vmem>>, vector<8x32xf32>,
    } else {
    }
    %c0 = arith.constant 0 : index
    %c0_1 = arith.constant 0 : index
    %c0_2 = arith.constant 0 : index
    %3 = vector.load %arg1[%c0, %c0_1, %c0_2] : memref<8x8x64xbf16, #tpu.memory_space<vmem>>, vector<8x8x64xbf16>
    %4 = vector.shape_cast %3 : vector<8x8x64xbf16> to vector<64x64xbf16>
    %c0_3 = arith.constant 0 : index
    %c0_4 = arith.constant 0 : index
    %c0_5 = arith.constant 0 : index
    %5 = vector.load %arg2[%c0_3, %c0_4, %c0_5] : memref<8x8x64xbf16, #tpu.memory_space<vmem>>, vector<8x8x64xbf16>
    %6 = vector.shape_cast %5 : vector<8x8x64xbf16> to vector<64x64xbf16>
    %c0_6 = arith.constant 0 : index
    %c0_7 = arith.constant 0 : index
    %7 = vector.load %arg3[%c0_6, %c0_7] : memref<64x128xbf16, #tpu.memory_space<vmem>>, vector<64x128xbf16>
    %cst = arith.constant dense<0.000000e+00> : vector<64x128xf32>
    %8 = tpu.matmul %4, %7, %cst {dimension_numbers = #tpu.dot_dimension_numbers<[1], [0], [0], [1], [0, 0, 1, 1], [], []>} : vector<64x64xbf16>, vector<64x128xbf16>, vector<64x128xf32> -> vector<64x128xf32>
    %c0_8 = arith.constant 0 : index
    %c0_9 = arith.constant 0 : index
    %9 = vector.load %arg7[%c0_8, %c0_9] : memref<1x128xf32, #tpu.memory_space<vmem>>, vector<1x128xf32>
    %10 = vector.broadcast %9 : vector<1x128xf32> to vector<64x128xf32>
    %11 = arith.addf %8, %10 : vector<64x128xf32>
    %c0_10 = arith.constant 0 : index
    %c0_11 = arith.constant 0 : index
    %12 = vector.load %arg15[%c0_10, %c0_11] : memref<64x128xf32, #tpu.memory_space<vmem>>, vector<64x128xf32>
    tpu.vector_store %arg15[%c0_10, %c0_11], %11 {strides = array<i32>} : memref<64x128xf32, #tpu.memory_space<vmem>>, vector<64x128xf32>,
    %c0_12 = arith.constant 0 : index
    %c0_13 = arith.constant 0 : index
    %13 = vector.load %arg4[%c0_12, %c0_13] : memref<64x128xbf16, #tpu.memory_space<vmem>>, vector<64x128xbf16>
    %cst_14 = arith.constant dense<0.000000e+00> : vector<64x128xf32>
    %14 = tpu.matmul %6, %13, %cst_14 {dimension_numbers = #tpu.dot_dimension_numbers<[1], [0], [0], [1], [0, 0, 1, 1], [], []>} : vector<64x64xbf16>, vector<64x128xbf16>, vector<64x128xf32> -> vector<64x128xf32>
    %c0_15 = arith.constant 0 : index
    %c0_16 = arith.constant 0 : index
    %15 = vector.load %arg8[%c0_15, %c0_16] : memref<1x128xf32, #tpu.memory_space<vmem>>, vector<1x128xf32>
    %16 = vector.broadcast %15 : vector<1x128xf32> to vector<64x128xf32>
    %17 = arith.addf %14, %16 : vector<64x128xf32>
    %c0_17 = arith.constant 0 : index
    %c0_18 = arith.constant 0 : index
    %18 = vector.load %arg16[%c0_17, %c0_18] : memref<64x128xf32, #tpu.memory_space<vmem>>, vector<64x128xf32>
    tpu.vector_store %arg16[%c0_17, %c0_18], %17 {strides = array<i32>} : memref<64x128xf32, #tpu.memory_space<vmem>>, vector<64x128xf32>,
    %c0_19 = arith.constant 0 : index
    %c0_20 = arith.constant 0 : index
    %19 = vector.load %arg11[%c0_19, %c0_20] : memref<8x32xf32, #tpu.memory_space<vmem>>, vector<8x32xf32>
    %c0_21 = arith.constant 0 : index
    %c0_22 = arith.constant 0 : index
    %20 = vector.load %arg12[%c0_21, %c0_22] : memref<8x32xf32, #tpu.memory_space<vmem>>, vector<8x32xf32>
    %c0_23 = arith.constant 0 : index
    %c0_24 = arith.constant 0 : index
    %21 = vector.load %arg13[%c0_23, %c0_24] : memref<8x32xf32, #tpu.memory_space<vmem>>, vector<8x32xf32>
    %c0_25 = arith.constant 0 : index
    %c0_26 = arith.constant 0 : index
    %22 = vector.load %arg14[%c0_25, %c0_26] : memref<8x32xf32, #tpu.memory_space<vmem>>, vector<8x32xf32>
    %c0_i32_27 = arith.constant 0 : i32
    %c8_i32 = arith.constant 8 : i32
    %23 = arith.muli %c0_i32_27, %c8_i32 : i32
    %24 = tpu.assume_multiple %23, 8 : i32
    %25 = arith.index_cast %24 : i32 to index
    %c0_28 = arith.constant 0 : index
    %26 = vector.load %arg15[%25, %c0_28] : memref<64x128xf32, #tpu.memory_space<vmem>>, vector<8x128xf32>
    %27 = arith.truncf %19 : vector<8x32xf32> to vector<8x32xbf16>
    %c0_29 = arith.constant 0 : index
    %c0_30 = arith.constant 0 : index
    %28 = vector.load %arg5[%c0_29, %c0_30] : memref<32x128xbf16, #tpu.memory_space<vmem>>, vector<32x128xbf16>
    %cst_31 = arith.constant dense<0.000000e+00> : vector<8x128xf32>
    %29 = tpu.matmul %27, %28, %cst_31 {dimension_numbers = #tpu.dot_dimension_numbers<[1], [0], [0], [1], [0, 0, 1, 1], [], []>} : vector<8x32xbf16>, vector<32x128xbf16>, vector<8x128xf32> -> vector<8x128xf32>
    %30 = arith.addf %26, %29 : vector<8x128xf32>
    %31 = vector.extract_strided_slice %30 {offsets = [0, 0], sizes = [8, 32], strides = [1, 1]} : vector<8x128xf32> to vector<8x32xf32>
    %32 = arith.negf %31 : vector<8x32xf32>
    %33 = math.exp %32 : vector<8x32xf32>
    %cst_32 = arith.constant 1.000000e+00 : f32
    %34 = vector.broadcast %cst_32 : f32 to vector<8x32xf32>
    %35 = arith.addf %34, %33 : vector<8x32xf32>
    %36 = arith.divf %34, %35 : vector<8x32xf32>
    %37 = vector.extract_strided_slice %30 {offsets = [0, 32], sizes = [8, 32], strides = [1, 1]} : vector<8x128xf32> to vector<8x32xf32>
    %38 = arith.negf %37 : vector<8x32xf32>
    %39 = math.exp %38 : vector<8x32xf32>
    %cst_33 = arith.constant 1.000000e+00 : f32
    %40 = vector.broadcast %cst_33 : f32 to vector<8x32xf32>
    %41 = arith.addf %40, %39 : vector<8x32xf32>
    %42 = arith.divf %40, %41 : vector<8x32xf32>
    %43 = vector.extract_strided_slice %30 {offsets = [0, 64], sizes = [8, 32], strides = [1, 1]} : vector<8x128xf32> to vector<8x32xf32>
    %44 = math.tanh %43 : vector<8x32xf32>
    %45 = vector.extract_strided_slice %30 {offsets = [0, 96], sizes = [8, 32], strides = [1, 1]} : vector<8x128xf32> to vector<8x32xf32>
    %46 = arith.negf %45 : vector<8x32xf32>
    %47 = math.exp %46 : vector<8x32xf32>
    %cst_34 = arith.constant 1.000000e+00 : f32
    %48 = vector.broadcast %cst_34 : f32 to vector<8x32xf32>
    %49 = arith.addf %48, %47 : vector<8x32xf32>
    %50 = arith.divf %48, %49 : vector<8x32xf32>
    %51 = arith.mulf %42, %20 : vector<8x32xf32>
    %52 = arith.mulf %36, %44 : vector<8x32xf32>
    %53 = arith.addf %51, %52 : vector<8x32xf32>
    %54 = math.tanh %53 : vector<8x32xf32>
    %55 = arith.mulf %50, %54 : vector<8x32xf32>
    %56 = arith.truncf %55 : vector<8x32xf32> to vector<8x32xbf16>
    %57 = arith.index_cast %c0_i32_27 : i32 to index
    %c0_35 = arith.constant 0 : index
    %c0_36 = arith.constant 0 : index
    %58 = vector.load %arg9[%57, %c0_35, %c0_36] : memref<8x8x32xbf16, #tpu.memory_space<vmem>>, vector<1x8x32xbf16>
    %59 = vector.shape_cast %58 : vector<1x8x32xbf16> to vector<8x32xbf16>
    %60 = vector.shape_cast %56 : vector<8x32xbf16> to vector<1x8x32xbf16>
    tpu.vector_store %arg9[%57, %c0_35, %c0_36], %60 {strides = array<i32>} : memref<8x8x32xbf16, #tpu.memory_space<vmem>>, vector<1x8x32xbf16>,
    %c7_i32 = arith.constant 7 : i32
    %61 = arith.subi %c7_i32, %c0_i32_27 : i32
    %c8_i32_37 = arith.constant 8 : i32
    %62 = arith.muli %61, %c8_i32_37 : i32
    %63 = tpu.assume_multiple %62, 8 : i32
    %64 = arith.index_cast %63 : i32 to index
    %c0_38 = arith.constant 0 : index
    %65 = vector.load %arg16[%64, %c0_38] : memref<64x128xf32, #tpu.memory_space<vmem>>, vector<8x128xf32>
    %66 = arith.truncf %21 : vector<8x32xf32> to vector<8x32xbf16>
    %c0_39 = arith.constant 0 : index
    %c0_40 = arith.constant 0 : index
    %67 = vector.load %arg6[%c0_39, %c0_40] : memref<32x128xbf16, #tpu.memory_space<vmem>>, vector<32x128xbf16>
    %cst_41 = arith.constant dense<0.000000e+00> : vector<8x128xf32>
    %68 = tpu.matmul %66, %67, %cst_41 {dimension_numbers = #tpu.dot_dimension_numbers<[1], [0], [0], [1], [0, 0, 1, 1], [], []>} : vector<8x32xbf16>, vector<32x128xbf16>, vector<8x128xf32> -> vector<8x128xf32>
    %69 = arith.addf %65, %68 : vector<8x128xf32>
    %70 = vector.extract_strided_slice %69 {offsets = [0, 0], sizes = [8, 32], strides = [1, 1]} : vector<8x128xf32> to vector<8x32xf32>
    %71 = arith.negf %70 : vector<8x32xf32>
    %72 = math.exp %71 : vector<8x32xf32>
    %cst_42 = arith.constant 1.000000e+00 : f32
    %73 = vector.broadcast %cst_42 : f32 to vector<8x32xf32>
    %74 = arith.addf %73, %72 : vector<8x32xf32>
    %75 = arith.divf %73, %74 : vector<8x32xf32>
    %76 = vector.extract_strided_slice %69 {offsets = [0, 32], sizes = [8, 32], strides = [1, 1]} : vector<8x128xf32> to vector<8x32xf32>
    %77 = arith.negf %76 : vector<8x32xf32>
    %78 = math.exp %77 : vector<8x32xf32>
    %cst_43 = arith.constant 1.000000e+00 : f32
    %79 = vector.broadcast %cst_43 : f32 to vector<8x32xf32>
    %80 = arith.addf %79, %78 : vector<8x32xf32>
    %81 = arith.divf %79, %80 : vector<8x32xf32>
    %82 = vector.extract_strided_slice %69 {offsets = [0, 64], sizes = [8, 32], strides = [1, 1]} : vector<8x128xf32> to vector<8x32xf32>
    %83 = math.tanh %82 : vector<8x32xf32>
    %84 = vector.extract_strided_slice %69 {offsets = [0, 96], sizes = [8, 32], strides = [1, 1]} : vector<8x128xf32> to vector<8x32xf32>
    %85 = arith.negf %84 : vector<8x32xf32>
    %86 = math.exp %85 : vector<8x32xf32>
    %cst_44 = arith.constant 1.000000e+00 : f32
    %87 = vector.broadcast %cst_44 : f32 to vector<8x32xf32>
    %88 = arith.addf %87, %86 : vector<8x32xf32>
    %89 = arith.divf %87, %88 : vector<8x32xf32>
    %90 = arith.mulf %81, %22 : vector<8x32xf32>
    %91 = arith.mulf %75, %83 : vector<8x32xf32>
    %92 = arith.addf %90, %91 : vector<8x32xf32>
    %93 = math.tanh %92 : vector<8x32xf32>
    %94 = arith.mulf %89, %93 : vector<8x32xf32>
    %95 = arith.truncf %94 : vector<8x32xf32> to vector<8x32xbf16>
    %96 = arith.index_cast %61 : i32 to index
    %c0_45 = arith.constant 0 : index
    %c0_46 = arith.constant 0 : index
    %97 = vector.load %arg10[%96, %c0_45, %c0_46] : memref<8x8x32xbf16, #tpu.memory_space<vmem>>, vector<1x8x32xbf16>
    %98 = vector.shape_cast %97 : vector<1x8x32xbf16> to vector<8x32xbf16>
    %99 = vector.shape_cast %95 : vector<8x32xbf16> to vector<1x8x32xbf16>
    tpu.vector_store %arg10[%96, %c0_45, %c0_46], %99 {strides = array<i32>} : memref<8x8x32xbf16, #tpu.memory_space<vmem>>, vector<1x8x32xbf16>,
    %c1_i32 = arith.constant 1 : i32
    %c8_i32_47 = arith.constant 8 : i32
    %100 = arith.muli %c1_i32, %c8_i32_47 : i32
    %101 = tpu.assume_multiple %100, 8 : i32
    %102 = arith.index_cast %101 : i32 to index
    %c0_48 = arith.constant 0 : index
    %103 = vector.load %arg15[%102, %c0_48] : memref<64x128xf32, #tpu.memory_space<vmem>>, vector<8x128xf32>
    %104 = arith.truncf %55 : vector<8x32xf32> to vector<8x32xbf16>
    %c0_49 = arith.constant 0 : index
    %c0_50 = arith.constant 0 : index
    %105 = vector.load %arg5[%c0_49, %c0_50] : memref<32x128xbf16, #tpu.memory_space<vmem>>, vector<32x128xbf16>
    %cst_51 = arith.constant dense<0.000000e+00> : vector<8x128xf32>
    %106 = tpu.matmul %104, %105, %cst_51 {dimension_numbers = #tpu.dot_dimension_numbers<[1], [0], [0], [1], [0, 0, 1, 1], [], []>} : vector<8x32xbf16>, vector<32x128xbf16>, vector<8x128xf32> -> vector<8x128xf32>
    %107 = arith.addf %103, %106 : vector<8x128xf32>
    %108 = vector.extract_strided_slice %107 {offsets = [0, 0], sizes = [8, 32], strides = [1, 1]} : vector<8x128xf32> to vector<8x32xf32>
    %109 = arith.negf %108 : vector<8x32xf32>
    %110 = math.exp %109 : vector<8x32xf32>
    %cst_52 = arith.constant 1.000000e+00 : f32
    %111 = vector.broadcast %cst_52 : f32 to vector<8x32xf32>
    %112 = arith.addf %111, %110 : vector<8x32xf32>
    %113 = arith.divf %111, %112 : vector<8x32xf32>
    %114 = vector.extract_strided_slice %107 {offsets = [0, 32], sizes = [8, 32], strides = [1, 1]} : vector<8x128xf32> to vector<8x32xf32>
    %115 = arith.negf %114 : vector<8x32xf32>
    %116 = math.exp %115 : vector<8x32xf32>
    %cst_53 = arith.constant 1.000000e+00 : f32
    %117 = vector.broadcast %cst_53 : f32 to vector<8x32xf32>
    %118 = arith.addf %117, %116 : vector<8x32xf32>
    %119 = arith.divf %117, %118 : vector<8x32xf32>
    %120 = vector.extract_strided_slice %107 {offsets = [0, 64], sizes = [8, 32], strides = [1, 1]} : vector<8x128xf32> to vector<8x32xf32>
    %121 = math.tanh %120 : vector<8x32xf32>
    %122 = vector.extract_strided_slice %107 {offsets = [0, 96], sizes = [8, 32], strides = [1, 1]} : vector<8x128xf32> to vector<8x32xf32>
    %123 = arith.negf %122 : vector<8x32xf32>
    %124 = math.exp %123 : vector<8x32xf32>
    %cst_54 = arith.constant 1.000000e+00 : f32
    %125 = vector.broadcast %cst_54 : f32 to vector<8x32xf32>
    %126 = arith.addf %125, %124 : vector<8x32xf32>
    %127 = arith.divf %125, %126 : vector<8x32xf32>
    %128 = arith.mulf %119, %53 : vector<8x32xf32>
    %129 = arith.mulf %113, %121 : vector<8x32xf32>
    %130 = arith.addf %128, %129 : vector<8x32xf32>
    %131 = math.tanh %130 : vector<8x32xf32>
    %132 = arith.mulf %127, %131 : vector<8x32xf32>
    %133 = arith.truncf %132 : vector<8x32xf32> to vector<8x32xbf16>
    %134 = arith.index_cast %c1_i32 : i32 to index
    %c0_55 = arith.constant 0 : index
    %c0_56 = arith.constant 0 : index
    %135 = vector.load %arg9[%134, %c0_55, %c0_56] : memref<8x8x32xbf16, #tpu.memory_space<vmem>>, vector<1x8x32xbf16>
    %136 = vector.shape_cast %135 : vector<1x8x32xbf16> to vector<8x32xbf16>
    %137 = vector.shape_cast %133 : vector<8x32xbf16> to vector<1x8x32xbf16>
    tpu.vector_store %arg9[%134, %c0_55, %c0_56], %137 {strides = array<i32>} : memref<8x8x32xbf16, #tpu.memory_space<vmem>>, vector<1x8x32xbf16>,
    %c7_i32_57 = arith.constant 7 : i32
    %138 = arith.subi %c7_i32_57, %c1_i32 : i32
    %c8_i32_58 = arith.constant 8 : i32
    %139 = arith.muli %138, %c8_i32_58 : i32
    %140 = tpu.assume_multiple %139, 8 : i32
    %141 = arith.index_cast %140 : i32 to index
    %c0_59 = arith.constant 0 : index
    %142 = vector.load %arg16[%141, %c0_59] : memref<64x128xf32, #tpu.memory_space<vmem>>, vector<8x128xf32>
    %143 = arith.truncf %94 : vector<8x32xf32> to vector<8x32xbf16>
    %c0_60 = arith.constant 0 : index
    %c0_61 = arith.constant 0 : index
    %144 = vector.load %arg6[%c0_60, %c0_61] : memref<32x128xbf16, #tpu.memory_space<vmem>>, vector<32x128xbf16>
    %cst_62 = arith.constant dense<0.000000e+00> : vector<8x128xf32>
    %145 = tpu.matmul %143, %144, %cst_62 {dimension_numbers = #tpu.dot_dimension_numbers<[1], [0], [0], [1], [0, 0, 1, 1], [], []>} : vector<8x32xbf16>, vector<32x128xbf16>, vector<8x128xf32> -> vector<8x128xf32>
    %146 = arith.addf %142, %145 : vector<8x128xf32>
    %147 = vector.extract_strided_slice %146 {offsets = [0, 0], sizes = [8, 32], strides = [1, 1]} : vector<8x128xf32> to vector<8x32xf32>
    %148 = arith.negf %147 : vector<8x32xf32>
    %149 = math.exp %148 : vector<8x32xf32>
    %cst_63 = arith.constant 1.000000e+00 : f32
    %150 = vector.broadcast %cst_63 : f32 to vector<8x32xf32>
    %151 = arith.addf %150, %149 : vector<8x32xf32>
    %152 = arith.divf %150, %151 : vector<8x32xf32>
    %153 = vector.extract_strided_slice %146 {offsets = [0, 32], sizes = [8, 32], strides = [1, 1]} : vector<8x128xf32> to vector<8x32xf32>
    %154 = arith.negf %153 : vector<8x32xf32>
    %155 = math.exp %154 : vector<8x32xf32>
    %cst_64 = arith.constant 1.000000e+00 : f32
    %156 = vector.broadcast %cst_64 : f32 to vector<8x32xf32>
    %157 = arith.addf %156, %155 : vector<8x32xf32>
    %158 = arith.divf %156, %157 : vector<8x32xf32>
    %159 = vector.extract_strided_slice %146 {offsets = [0, 64], sizes = [8, 32], strides = [1, 1]} : vector<8x128xf32> to vector<8x32xf32>
    %160 = math.tanh %159 : vector<8x32xf32>
    %161 = vector.extract_strided_slice %146 {offsets = [0, 96], sizes = [8, 32], strides = [1, 1]} : vector<8x128xf32> to vector<8x32xf32>
    %162 = arith.negf %161 : vector<8x32xf32>
    %163 = math.exp %162 : vector<8x32xf32>
    %cst_65 = arith.constant 1.000000e+00 : f32
    %164 = vector.broadcast %cst_65 : f32 to vector<8x32xf32>
    %165 = arith.addf %164, %163 : vector<8x32xf32>
    %166 = arith.divf %164, %165 : vector<8x32xf32>
    %167 = arith.mulf %158, %92 : vector<8x32xf32>
    %168 = arith.mulf %152, %160 : vector<8x32xf32>
    %169 = arith.addf %167, %168 : vector<8x32xf32>
    %170 = math.tanh %169 : vector<8x32xf32>
    %171 = arith.mulf %166, %170 : vector<8x32xf32>
    %172 = arith.truncf %171 : vector<8x32xf32> to vector<8x32xbf16>
    %173 = arith.index_cast %138 : i32 to index
    %c0_66 = arith.constant 0 : index
    %c0_67 = arith.constant 0 : index
    %174 = vector.load %arg10[%173, %c0_66, %c0_67] : memref<8x8x32xbf16, #tpu.memory_space<vmem>>, vector<1x8x32xbf16>
    %175 = vector.shape_cast %174 : vector<1x8x32xbf16> to vector<8x32xbf16>
    %176 = vector.shape_cast %172 : vector<8x32xbf16> to vector<1x8x32xbf16>
    tpu.vector_store %arg10[%173, %c0_66, %c0_67], %176 {strides = array<i32>} : memref<8x8x32xbf16, #tpu.memory_space<vmem>>, vector<1x8x32xbf16>,
    %c2_i32 = arith.constant 2 : i32
    %c8_i32_68 = arith.constant 8 : i32
    %177 = arith.muli %c2_i32, %c8_i32_68 : i32
    %178 = tpu.assume_multiple %177, 8 : i32
    %179 = arith.index_cast %178 : i32 to index
    %c0_69 = arith.constant 0 : index
    %180 = vector.load %arg15[%179, %c0_69] : memref<64x128xf32, #tpu.memory_space<vmem>>, vector<8x128xf32>
    %181 = arith.truncf %132 : vector<8x32xf32> to vector<8x32xbf16>
    %c0_70 = arith.constant 0 : index
    %c0_71 = arith.constant 0 : index
    %182 = vector.load %arg5[%c0_70, %c0_71] : memref<32x128xbf16, #tpu.memory_space<vmem>>, vector<32x128xbf16>
    %cst_72 = arith.constant dense<0.000000e+00> : vector<8x128xf32>
    %183 = tpu.matmul %181, %182, %cst_72 {dimension_numbers = #tpu.dot_dimension_numbers<[1], [0], [0], [1], [0, 0, 1, 1], [], []>} : vector<8x32xbf16>, vector<32x128xbf16>, vector<8x128xf32> -> vector<8x128xf32>
    %184 = arith.addf %180, %183 : vector<8x128xf32>
    %185 = vector.extract_strided_slice %184 {offsets = [0, 0], sizes = [8, 32], strides = [1, 1]} : vector<8x128xf32> to vector<8x32xf32>
    %186 = arith.negf %185 : vector<8x32xf32>
    %187 = math.exp %186 : vector<8x32xf32>
    %cst_73 = arith.constant 1.000000e+00 : f32
    %188 = vector.broadcast %cst_73 : f32 to vector<8x32xf32>
    %189 = arith.addf %188, %187 : vector<8x32xf32>
    %190 = arith.divf %188, %189 : vector<8x32xf32>
    %191 = vector.extract_strided_slice %184 {offsets = [0, 32], sizes = [8, 32], strides = [1, 1]} : vector<8x128xf32> to vector<8x32xf32>
    %192 = arith.negf %191 : vector<8x32xf32>
    %193 = math.exp %192 : vector<8x32xf32>
    %cst_74 = arith.constant 1.000000e+00 : f32
    %194 = vector.broadcast %cst_74 : f32 to vector<8x32xf32>
    %195 = arith.addf %194, %193 : vector<8x32xf32>
    %196 = arith.divf %194, %195 : vector<8x32xf32>
    %197 = vector.extract_strided_slice %184 {offsets = [0, 64], sizes = [8, 32], strides = [1, 1]} : vector<8x128xf32> to vector<8x32xf32>
    %198 = math.tanh %197 : vector<8x32xf32>
    %199 = vector.extract_strided_slice %184 {offsets = [0, 96], sizes = [8, 32], strides = [1, 1]} : vector<8x128xf32> to vector<8x32xf32>
    %200 = arith.negf %199 : vector<8x32xf32>
    %201 = math.exp %200 : vector<8x32xf32>
    %cst_75 = arith.constant 1.000000e+00 : f32
    %202 = vector.broadcast %cst_75 : f32 to vector<8x32xf32>
    %203 = arith.addf %202, %201 : vector<8x32xf32>
    %204 = arith.divf %202, %203 : vector<8x32xf32>
    %205 = arith.mulf %196, %130 : vector<8x32xf32>
    %206 = arith.mulf %190, %198 : vector<8x32xf32>
    %207 = arith.addf %205, %206 : vector<8x32xf32>
    %208 = math.tanh %207 : vector<8x32xf32>
    %209 = arith.mulf %204, %208 : vector<8x32xf32>
    %210 = arith.truncf %209 : vector<8x32xf32> to vector<8x32xbf16>
    %211 = arith.index_cast %c2_i32 : i32 to index
    %c0_76 = arith.constant 0 : index
    %c0_77 = arith.constant 0 : index
    %212 = vector.load %arg9[%211, %c0_76, %c0_77] : memref<8x8x32xbf16, #tpu.memory_space<vmem>>, vector<1x8x32xbf16>
    %213 = vector.shape_cast %212 : vector<1x8x32xbf16> to vector<8x32xbf16>
    %214 = vector.shape_cast %210 : vector<8x32xbf16> to vector<1x8x32xbf16>
    tpu.vector_store %arg9[%211, %c0_76, %c0_77], %214 {strides = array<i32>} : memref<8x8x32xbf16, #tpu.memory_space<vmem>>, vector<1x8x32xbf16>,
    %c7_i32_78 = arith.constant 7 : i32
    %215 = arith.subi %c7_i32_78, %c2_i32 : i32
    %c8_i32_79 = arith.constant 8 : i32
    %216 = arith.muli %215, %c8_i32_79 : i32
    %217 = tpu.assume_multiple %216, 8 : i32
    %218 = arith.index_cast %217 : i32 to index
    %c0_80 = arith.constant 0 : index
    %219 = vector.load %arg16[%218, %c0_80] : memref<64x128xf32, #tpu.memory_space<vmem>>, vector<8x128xf32>
    %220 = arith.truncf %171 : vector<8x32xf32> to vector<8x32xbf16>
    %c0_81 = arith.constant 0 : index
    %c0_82 = arith.constant 0 : index
    %221 = vector.load %arg6[%c0_81, %c0_82] : memref<32x128xbf16, #tpu.memory_space<vmem>>, vector<32x128xbf16>
    %cst_83 = arith.constant dense<0.000000e+00> : vector<8x128xf32>
    %222 = tpu.matmul %220, %221, %cst_83 {dimension_numbers = #tpu.dot_dimension_numbers<[1], [0], [0], [1], [0, 0, 1, 1], [], []>} : vector<8x32xbf16>, vector<32x128xbf16>, vector<8x128xf32> -> vector<8x128xf32>
    %223 = arith.addf %219, %222 : vector<8x128xf32>
    %224 = vector.extract_strided_slice %223 {offsets = [0, 0], sizes = [8, 32], strides = [1, 1]} : vector<8x128xf32> to vector<8x32xf32>
    %225 = arith.negf %224 : vector<8x32xf32>
    %226 = math.exp %225 : vector<8x32xf32>
    %cst_84 = arith.constant 1.000000e+00 : f32
    %227 = vector.broadcast %cst_84 : f32 to vector<8x32xf32>
    %228 = arith.addf %227, %226 : vector<8x32xf32>
    %229 = arith.divf %227, %228 : vector<8x32xf32>
    %230 = vector.extract_strided_slice %223 {offsets = [0, 32], sizes = [8, 32], strides = [1, 1]} : vector<8x128xf32> to vector<8x32xf32>
    %231 = arith.negf %230 : vector<8x32xf32>
    %232 = math.exp %231 : vector<8x32xf32>
    %cst_85 = arith.constant 1.000000e+00 : f32
    %233 = vector.broadcast %cst_85 : f32 to vector<8x32xf32>
    %234 = arith.addf %233, %232 : vector<8x32xf32>
    %235 = arith.divf %233, %234 : vector<8x32xf32>
    %236 = vector.extract_strided_slice %223 {offsets = [0, 64], sizes = [8, 32], strides = [1, 1]} : vector<8x128xf32> to vector<8x32xf32>
    %237 = math.tanh %236 : vector<8x32xf32>
    %238 = vector.extract_strided_slice %223 {offsets = [0, 96], sizes = [8, 32], strides = [1, 1]} : vector<8x128xf32> to vector<8x32xf32>
    %239 = arith.negf %238 : vector<8x32xf32>
    %240 = math.exp %239 : vector<8x32xf32>
    %cst_86 = arith.constant 1.000000e+00 : f32
    %241 = vector.broadcast %cst_86 : f32 to vector<8x32xf32>
    %242 = arith.addf %241, %240 : vector<8x32xf32>
    %243 = arith.divf %241, %242 : vector<8x32xf32>
    %244 = arith.mulf %235, %169 : vector<8x32xf32>
    %245 = arith.mulf %229, %237 : vector<8x32xf32>
    %246 = arith.addf %244, %245 : vector<8x32xf32>
    %247 = math.tanh %246 : vector<8x32xf32>
    %248 = arith.mulf %243, %247 : vector<8x32xf32>
    %249 = arith.truncf %248 : vector<8x32xf32> to vector<8x32xbf16>
    %250 = arith.index_cast %215 : i32 to index
    %c0_87 = arith.constant 0 : index
    %c0_88 = arith.constant 0 : index
    %251 = vector.load %arg10[%250, %c0_87, %c0_88] : memref<8x8x32xbf16, #tpu.memory_space<vmem>>, vector<1x8x32xbf16>
    %252 = vector.shape_cast %251 : vector<1x8x32xbf16> to vector<8x32xbf16>
    %253 = vector.shape_cast %249 : vector<8x32xbf16> to vector<1x8x32xbf16>
    tpu.vector_store %arg10[%250, %c0_87, %c0_88], %253 {strides = array<i32>} : memref<8x8x32xbf16, #tpu.memory_space<vmem>>, vector<1x8x32xbf16>,
    %c3_i32 = arith.constant 3 : i32
    %c8_i32_89 = arith.constant 8 : i32
    %254 = arith.muli %c3_i32, %c8_i32_89 : i32
    %255 = tpu.assume_multiple %254, 8 : i32
    %256 = arith.index_cast %255 : i32 to index
    %c0_90 = arith.constant 0 : index
    %257 = vector.load %arg15[%256, %c0_90] : memref<64x128xf32, #tpu.memory_space<vmem>>, vector<8x128xf32>
    %258 = arith.truncf %209 : vector<8x32xf32> to vector<8x32xbf16>
    %c0_91 = arith.constant 0 : index
    %c0_92 = arith.constant 0 : index
    %259 = vector.load %arg5[%c0_91, %c0_92] : memref<32x128xbf16, #tpu.memory_space<vmem>>, vector<32x128xbf16>
    %cst_93 = arith.constant dense<0.000000e+00> : vector<8x128xf32>
    %260 = tpu.matmul %258, %259, %cst_93 {dimension_numbers = #tpu.dot_dimension_numbers<[1], [0], [0], [1], [0, 0, 1, 1], [], []>} : vector<8x32xbf16>, vector<32x128xbf16>, vector<8x128xf32> -> vector<8x128xf32>
    %261 = arith.addf %257, %260 : vector<8x128xf32>
    %262 = vector.extract_strided_slice %261 {offsets = [0, 0], sizes = [8, 32], strides = [1, 1]} : vector<8x128xf32> to vector<8x32xf32>
    %263 = arith.negf %262 : vector<8x32xf32>
    %264 = math.exp %263 : vector<8x32xf32>
    %cst_94 = arith.constant 1.000000e+00 : f32
    %265 = vector.broadcast %cst_94 : f32 to vector<8x32xf32>
    %266 = arith.addf %265, %264 : vector<8x32xf32>
    %267 = arith.divf %265, %266 : vector<8x32xf32>
    %268 = vector.extract_strided_slice %261 {offsets = [0, 32], sizes = [8, 32], strides = [1, 1]} : vector<8x128xf32> to vector<8x32xf32>
    %269 = arith.negf %268 : vector<8x32xf32>
    %270 = math.exp %269 : vector<8x32xf32>
    %cst_95 = arith.constant 1.000000e+00 : f32
    %271 = vector.broadcast %cst_95 : f32 to vector<8x32xf32>
    %272 = arith.addf %271, %270 : vector<8x32xf32>
    %273 = arith.divf %271, %272 : vector<8x32xf32>
    %274 = vector.extract_strided_slice %261 {offsets = [0, 64], sizes = [8, 32], strides = [1, 1]} : vector<8x128xf32> to vector<8x32xf32>
    %275 = math.tanh %274 : vector<8x32xf32>
    %276 = vector.extract_strided_slice %261 {offsets = [0, 96], sizes = [8, 32], strides = [1, 1]} : vector<8x128xf32> to vector<8x32xf32>
    %277 = arith.negf %276 : vector<8x32xf32>
    %278 = math.exp %277 : vector<8x32xf32>
    %cst_96 = arith.constant 1.000000e+00 : f32
    %279 = vector.broadcast %cst_96 : f32 to vector<8x32xf32>
    %280 = arith.addf %279, %278 : vector<8x32xf32>
    %281 = arith.divf %279, %280 : vector<8x32xf32>
    %282 = arith.mulf %273, %207 : vector<8x32xf32>
    %283 = arith.mulf %267, %275 : vector<8x32xf32>
    %284 = arith.addf %282, %283 : vector<8x32xf32>
    %285 = math.tanh %284 : vector<8x32xf32>
    %286 = arith.mulf %281, %285 : vector<8x32xf32>
    %287 = arith.truncf %286 : vector<8x32xf32> to vector<8x32xbf16>
    %288 = arith.index_cast %c3_i32 : i32 to index
    %c0_97 = arith.constant 0 : index
    %c0_98 = arith.constant 0 : index
    %289 = vector.load %arg9[%288, %c0_97, %c0_98] : memref<8x8x32xbf16, #tpu.memory_space<vmem>>, vector<1x8x32xbf16>
    %290 = vector.shape_cast %289 : vector<1x8x32xbf16> to vector<8x32xbf16>
    %291 = vector.shape_cast %287 : vector<8x32xbf16> to vector<1x8x32xbf16>
    tpu.vector_store %arg9[%288, %c0_97, %c0_98], %291 {strides = array<i32>} : memref<8x8x32xbf16, #tpu.memory_space<vmem>>, vector<1x8x32xbf16>,
    %c7_i32_99 = arith.constant 7 : i32
    %292 = arith.subi %c7_i32_99, %c3_i32 : i32
    %c8_i32_100 = arith.constant 8 : i32
    %293 = arith.muli %292, %c8_i32_100 : i32
    %294 = tpu.assume_multiple %293, 8 : i32
    %295 = arith.index_cast %294 : i32 to index
    %c0_101 = arith.constant 0 : index
    %296 = vector.load %arg16[%295, %c0_101] : memref<64x128xf32, #tpu.memory_space<vmem>>, vector<8x128xf32>
    %297 = arith.truncf %248 : vector<8x32xf32> to vector<8x32xbf16>
    %c0_102 = arith.constant 0 : index
    %c0_103 = arith.constant 0 : index
    %298 = vector.load %arg6[%c0_102, %c0_103] : memref<32x128xbf16, #tpu.memory_space<vmem>>, vector<32x128xbf16>
    %cst_104 = arith.constant dense<0.000000e+00> : vector<8x128xf32>
    %299 = tpu.matmul %297, %298, %cst_104 {dimension_numbers = #tpu.dot_dimension_numbers<[1], [0], [0], [1], [0, 0, 1, 1], [], []>} : vector<8x32xbf16>, vector<32x128xbf16>, vector<8x128xf32> -> vector<8x128xf32>
    %300 = arith.addf %296, %299 : vector<8x128xf32>
    %301 = vector.extract_strided_slice %300 {offsets = [0, 0], sizes = [8, 32], strides = [1, 1]} : vector<8x128xf32> to vector<8x32xf32>
    %302 = arith.negf %301 : vector<8x32xf32>
    %303 = math.exp %302 : vector<8x32xf32>
    %cst_105 = arith.constant 1.000000e+00 : f32
    %304 = vector.broadcast %cst_105 : f32 to vector<8x32xf32>
    %305 = arith.addf %304, %303 : vector<8x32xf32>
    %306 = arith.divf %304, %305 : vector<8x32xf32>
    %307 = vector.extract_strided_slice %300 {offsets = [0, 32], sizes = [8, 32], strides = [1, 1]} : vector<8x128xf32> to vector<8x32xf32>
    %308 = arith.negf %307 : vector<8x32xf32>
    %309 = math.exp %308 : vector<8x32xf32>
    %cst_106 = arith.constant 1.000000e+00 : f32
    %310 = vector.broadcast %cst_106 : f32 to vector<8x32xf32>
    %311 = arith.addf %310, %309 : vector<8x32xf32>
    %312 = arith.divf %310, %311 : vector<8x32xf32>
    %313 = vector.extract_strided_slice %300 {offsets = [0, 64], sizes = [8, 32], strides = [1, 1]} : vector<8x128xf32> to vector<8x32xf32>
    %314 = math.tanh %313 : vector<8x32xf32>
    %315 = vector.extract_strided_slice %300 {offsets = [0, 96], sizes = [8, 32], strides = [1, 1]} : vector<8x128xf32> to vector<8x32xf32>
    %316 = arith.negf %315 : vector<8x32xf32>
    %317 = math.exp %316 : vector<8x32xf32>
    %cst_107 = arith.constant 1.000000e+00 : f32
    %318 = vector.broadcast %cst_107 : f32 to vector<8x32xf32>
    %319 = arith.addf %318, %317 : vector<8x32xf32>
    %320 = arith.divf %318, %319 : vector<8x32xf32>
    %321 = arith.mulf %312, %246 : vector<8x32xf32>
    %322 = arith.mulf %306, %314 : vector<8x32xf32>
    %323 = arith.addf %321, %322 : vector<8x32xf32>
    %324 = math.tanh %323 : vector<8x32xf32>
    %325 = arith.mulf %320, %324 : vector<8x32xf32>
    %326 = arith.truncf %325 : vector<8x32xf32> to vector<8x32xbf16>
    %327 = arith.index_cast %292 : i32 to index
    %c0_108 = arith.constant 0 : index
    %c0_109 = arith.constant 0 : index
    %328 = vector.load %arg10[%327, %c0_108, %c0_109] : memref<8x8x32xbf16, #tpu.memory_space<vmem>>, vector<1x8x32xbf16>
    %329 = vector.shape_cast %328 : vector<1x8x32xbf16> to vector<8x32xbf16>
    %330 = vector.shape_cast %326 : vector<8x32xbf16> to vector<1x8x32xbf16>
    tpu.vector_store %arg10[%327, %c0_108, %c0_109], %330 {strides = array<i32>} : memref<8x8x32xbf16, #tpu.memory_space<vmem>>, vector<1x8x32xbf16>,
    %c4_i32 = arith.constant 4 : i32
    %c8_i32_110 = arith.constant 8 : i32
    %331 = arith.muli %c4_i32, %c8_i32_110 : i32
    %332 = tpu.assume_multiple %331, 8 : i32
    %333 = arith.index_cast %332 : i32 to index
    %c0_111 = arith.constant 0 : index
    %334 = vector.load %arg15[%333, %c0_111] : memref<64x128xf32, #tpu.memory_space<vmem>>, vector<8x128xf32>
    %335 = arith.truncf %286 : vector<8x32xf32> to vector<8x32xbf16>
    %c0_112 = arith.constant 0 : index
    %c0_113 = arith.constant 0 : index
    %336 = vector.load %arg5[%c0_112, %c0_113] : memref<32x128xbf16, #tpu.memory_space<vmem>>, vector<32x128xbf16>
    %cst_114 = arith.constant dense<0.000000e+00> : vector<8x128xf32>
    %337 = tpu.matmul %335, %336, %cst_114 {dimension_numbers = #tpu.dot_dimension_numbers<[1], [0], [0], [1], [0, 0, 1, 1], [], []>} : vector<8x32xbf16>, vector<32x128xbf16>, vector<8x128xf32> -> vector<8x128xf32>
    %338 = arith.addf %334, %337 : vector<8x128xf32>
    %339 = vector.extract_strided_slice %338 {offsets = [0, 0], sizes = [8, 32], strides = [1, 1]} : vector<8x128xf32> to vector<8x32xf32>
    %340 = arith.negf %339 : vector<8x32xf32>
    %341 = math.exp %340 : vector<8x32xf32>
    %cst_115 = arith.constant 1.000000e+00 : f32
    %342 = vector.broadcast %cst_115 : f32 to vector<8x32xf32>
    %343 = arith.addf %342, %341 : vector<8x32xf32>
    %344 = arith.divf %342, %343 : vector<8x32xf32>
    %345 = vector.extract_strided_slice %338 {offsets = [0, 32], sizes = [8, 32], strides = [1, 1]} : vector<8x128xf32> to vector<8x32xf32>
    %346 = arith.negf %345 : vector<8x32xf32>
    %347 = math.exp %346 : vector<8x32xf32>
    %cst_116 = arith.constant 1.000000e+00 : f32
    %348 = vector.broadcast %cst_116 : f32 to vector<8x32xf32>
    %349 = arith.addf %348, %347 : vector<8x32xf32>
    %350 = arith.divf %348, %349 : vector<8x32xf32>
    %351 = vector.extract_strided_slice %338 {offsets = [0, 64], sizes = [8, 32], strides = [1, 1]} : vector<8x128xf32> to vector<8x32xf32>
    %352 = math.tanh %351 : vector<8x32xf32>
    %353 = vector.extract_strided_slice %338 {offsets = [0, 96], sizes = [8, 32], strides = [1, 1]} : vector<8x128xf32> to vector<8x32xf32>
    %354 = arith.negf %353 : vector<8x32xf32>
    %355 = math.exp %354 : vector<8x32xf32>
    %cst_117 = arith.constant 1.000000e+00 : f32
    %356 = vector.broadcast %cst_117 : f32 to vector<8x32xf32>
    %357 = arith.addf %356, %355 : vector<8x32xf32>
    %358 = arith.divf %356, %357 : vector<8x32xf32>
    %359 = arith.mulf %350, %284 : vector<8x32xf32>
    %360 = arith.mulf %344, %352 : vector<8x32xf32>
    %361 = arith.addf %359, %360 : vector<8x32xf32>
    %362 = math.tanh %361 : vector<8x32xf32>
    %363 = arith.mulf %358, %362 : vector<8x32xf32>
    %364 = arith.truncf %363 : vector<8x32xf32> to vector<8x32xbf16>
    %365 = arith.index_cast %c4_i32 : i32 to index
    %c0_118 = arith.constant 0 : index
    %c0_119 = arith.constant 0 : index
    %366 = vector.load %arg9[%365, %c0_118, %c0_119] : memref<8x8x32xbf16, #tpu.memory_space<vmem>>, vector<1x8x32xbf16>
    %367 = vector.shape_cast %366 : vector<1x8x32xbf16> to vector<8x32xbf16>
    %368 = vector.shape_cast %364 : vector<8x32xbf16> to vector<1x8x32xbf16>
    tpu.vector_store %arg9[%365, %c0_118, %c0_119], %368 {strides = array<i32>} : memref<8x8x32xbf16, #tpu.memory_space<vmem>>, vector<1x8x32xbf16>,
    %c7_i32_120 = arith.constant 7 : i32
    %369 = arith.subi %c7_i32_120, %c4_i32 : i32
    %c8_i32_121 = arith.constant 8 : i32
    %370 = arith.muli %369, %c8_i32_121 : i32
    %371 = tpu.assume_multiple %370, 8 : i32
    %372 = arith.index_cast %371 : i32 to index
    %c0_122 = arith.constant 0 : index
    %373 = vector.load %arg16[%372, %c0_122] : memref<64x128xf32, #tpu.memory_space<vmem>>, vector<8x128xf32>
    %374 = arith.truncf %325 : vector<8x32xf32> to vector<8x32xbf16>
    %c0_123 = arith.constant 0 : index
    %c0_124 = arith.constant 0 : index
    %375 = vector.load %arg6[%c0_123, %c0_124] : memref<32x128xbf16, #tpu.memory_space<vmem>>, vector<32x128xbf16>
    %cst_125 = arith.constant dense<0.000000e+00> : vector<8x128xf32>
    %376 = tpu.matmul %374, %375, %cst_125 {dimension_numbers = #tpu.dot_dimension_numbers<[1], [0], [0], [1], [0, 0, 1, 1], [], []>} : vector<8x32xbf16>, vector<32x128xbf16>, vector<8x128xf32> -> vector<8x128xf32>
    %377 = arith.addf %373, %376 : vector<8x128xf32>
    %378 = vector.extract_strided_slice %377 {offsets = [0, 0], sizes = [8, 32], strides = [1, 1]} : vector<8x128xf32> to vector<8x32xf32>
    %379 = arith.negf %378 : vector<8x32xf32>
    %380 = math.exp %379 : vector<8x32xf32>
    %cst_126 = arith.constant 1.000000e+00 : f32
    %381 = vector.broadcast %cst_126 : f32 to vector<8x32xf32>
    %382 = arith.addf %381, %380 : vector<8x32xf32>
    %383 = arith.divf %381, %382 : vector<8x32xf32>
    %384 = vector.extract_strided_slice %377 {offsets = [0, 32], sizes = [8, 32], strides = [1, 1]} : vector<8x128xf32> to vector<8x32xf32>
    %385 = arith.negf %384 : vector<8x32xf32>
    %386 = math.exp %385 : vector<8x32xf32>
    %cst_127 = arith.constant 1.000000e+00 : f32
    %387 = vector.broadcast %cst_127 : f32 to vector<8x32xf32>
    %388 = arith.addf %387, %386 : vector<8x32xf32>
    %389 = arith.divf %387, %388 : vector<8x32xf32>
    %390 = vector.extract_strided_slice %377 {offsets = [0, 64], sizes = [8, 32], strides = [1, 1]} : vector<8x128xf32> to vector<8x32xf32>
    %391 = math.tanh %390 : vector<8x32xf32>
    %392 = vector.extract_strided_slice %377 {offsets = [0, 96], sizes = [8, 32], strides = [1, 1]} : vector<8x128xf32> to vector<8x32xf32>
    %393 = arith.negf %392 : vector<8x32xf32>
    %394 = math.exp %393 : vector<8x32xf32>
    %cst_128 = arith.constant 1.000000e+00 : f32
    %395 = vector.broadcast %cst_128 : f32 to vector<8x32xf32>
    %396 = arith.addf %395, %394 : vector<8x32xf32>
    %397 = arith.divf %395, %396 : vector<8x32xf32>
    %398 = arith.mulf %389, %323 : vector<8x32xf32>
    %399 = arith.mulf %383, %391 : vector<8x32xf32>
    %400 = arith.addf %398, %399 : vector<8x32xf32>
    %401 = math.tanh %400 : vector<8x32xf32>
    %402 = arith.mulf %397, %401 : vector<8x32xf32>
    %403 = arith.truncf %402 : vector<8x32xf32> to vector<8x32xbf16>
    %404 = arith.index_cast %369 : i32 to index
    %c0_129 = arith.constant 0 : index
    %c0_130 = arith.constant 0 : index
    %405 = vector.load %arg10[%404, %c0_129, %c0_130] : memref<8x8x32xbf16, #tpu.memory_space<vmem>>, vector<1x8x32xbf16>
    %406 = vector.shape_cast %405 : vector<1x8x32xbf16> to vector<8x32xbf16>
    %407 = vector.shape_cast %403 : vector<8x32xbf16> to vector<1x8x32xbf16>
    tpu.vector_store %arg10[%404, %c0_129, %c0_130], %407 {strides = array<i32>} : memref<8x8x32xbf16, #tpu.memory_space<vmem>>, vector<1x8x32xbf16>,
    %c5_i32 = arith.constant 5 : i32
    %c8_i32_131 = arith.constant 8 : i32
    %408 = arith.muli %c5_i32, %c8_i32_131 : i32
    %409 = tpu.assume_multiple %408, 8 : i32
    %410 = arith.index_cast %409 : i32 to index
    %c0_132 = arith.constant 0 : index
    %411 = vector.load %arg15[%410, %c0_132] : memref<64x128xf32, #tpu.memory_space<vmem>>, vector<8x128xf32>
    %412 = arith.truncf %363 : vector<8x32xf32> to vector<8x32xbf16>
    %c0_133 = arith.constant 0 : index
    %c0_134 = arith.constant 0 : index
    %413 = vector.load %arg5[%c0_133, %c0_134] : memref<32x128xbf16, #tpu.memory_space<vmem>>, vector<32x128xbf16>
    %cst_135 = arith.constant dense<0.000000e+00> : vector<8x128xf32>
    %414 = tpu.matmul %412, %413, %cst_135 {dimension_numbers = #tpu.dot_dimension_numbers<[1], [0], [0], [1], [0, 0, 1, 1], [], []>} : vector<8x32xbf16>, vector<32x128xbf16>, vector<8x128xf32> -> vector<8x128xf32>
    %415 = arith.addf %411, %414 : vector<8x128xf32>
    %416 = vector.extract_strided_slice %415 {offsets = [0, 0], sizes = [8, 32], strides = [1, 1]} : vector<8x128xf32> to vector<8x32xf32>
    %417 = arith.negf %416 : vector<8x32xf32>
    %418 = math.exp %417 : vector<8x32xf32>
    %cst_136 = arith.constant 1.000000e+00 : f32
    %419 = vector.broadcast %cst_136 : f32 to vector<8x32xf32>
    %420 = arith.addf %419, %418 : vector<8x32xf32>
    %421 = arith.divf %419, %420 : vector<8x32xf32>
    %422 = vector.extract_strided_slice %415 {offsets = [0, 32], sizes = [8, 32], strides = [1, 1]} : vector<8x128xf32> to vector<8x32xf32>
    %423 = arith.negf %422 : vector<8x32xf32>
    %424 = math.exp %423 : vector<8x32xf32>
    %cst_137 = arith.constant 1.000000e+00 : f32
    %425 = vector.broadcast %cst_137 : f32 to vector<8x32xf32>
    %426 = arith.addf %425, %424 : vector<8x32xf32>
    %427 = arith.divf %425, %426 : vector<8x32xf32>
    %428 = vector.extract_strided_slice %415 {offsets = [0, 64], sizes = [8, 32], strides = [1, 1]} : vector<8x128xf32> to vector<8x32xf32>
    %429 = math.tanh %428 : vector<8x32xf32>
    %430 = vector.extract_strided_slice %415 {offsets = [0, 96], sizes = [8, 32], strides = [1, 1]} : vector<8x128xf32> to vector<8x32xf32>
    %431 = arith.negf %430 : vector<8x32xf32>
    %432 = math.exp %431 : vector<8x32xf32>
    %cst_138 = arith.constant 1.000000e+00 : f32
    %433 = vector.broadcast %cst_138 : f32 to vector<8x32xf32>
    %434 = arith.addf %433, %432 : vector<8x32xf32>
    %435 = arith.divf %433, %434 : vector<8x32xf32>
    %436 = arith.mulf %427, %361 : vector<8x32xf32>
    %437 = arith.mulf %421, %429 : vector<8x32xf32>
    %438 = arith.addf %436, %437 : vector<8x32xf32>
    %439 = math.tanh %438 : vector<8x32xf32>
    %440 = arith.mulf %435, %439 : vector<8x32xf32>
    %441 = arith.truncf %440 : vector<8x32xf32> to vector<8x32xbf16>
    %442 = arith.index_cast %c5_i32 : i32 to index
    %c0_139 = arith.constant 0 : index
    %c0_140 = arith.constant 0 : index
    %443 = vector.load %arg9[%442, %c0_139, %c0_140] : memref<8x8x32xbf16, #tpu.memory_space<vmem>>, vector<1x8x32xbf16>
    %444 = vector.shape_cast %443 : vector<1x8x32xbf16> to vector<8x32xbf16>
    %445 = vector.shape_cast %441 : vector<8x32xbf16> to vector<1x8x32xbf16>
    tpu.vector_store %arg9[%442, %c0_139, %c0_140], %445 {strides = array<i32>} : memref<8x8x32xbf16, #tpu.memory_space<vmem>>, vector<1x8x32xbf16>,
    %c7_i32_141 = arith.constant 7 : i32
    %446 = arith.subi %c7_i32_141, %c5_i32 : i32
    %c8_i32_142 = arith.constant 8 : i32
    %447 = arith.muli %446, %c8_i32_142 : i32
    %448 = tpu.assume_multiple %447, 8 : i32
    %449 = arith.index_cast %448 : i32 to index
    %c0_143 = arith.constant 0 : index
    %450 = vector.load %arg16[%449, %c0_143] : memref<64x128xf32, #tpu.memory_space<vmem>>, vector<8x128xf32>
    %451 = arith.truncf %402 : vector<8x32xf32> to vector<8x32xbf16>
    %c0_144 = arith.constant 0 : index
    %c0_145 = arith.constant 0 : index
    %452 = vector.load %arg6[%c0_144, %c0_145] : memref<32x128xbf16, #tpu.memory_space<vmem>>, vector<32x128xbf16>
    %cst_146 = arith.constant dense<0.000000e+00> : vector<8x128xf32>
    %453 = tpu.matmul %451, %452, %cst_146 {dimension_numbers = #tpu.dot_dimension_numbers<[1], [0], [0], [1], [0, 0, 1, 1], [], []>} : vector<8x32xbf16>, vector<32x128xbf16>, vector<8x128xf32> -> vector<8x128xf32>
    %454 = arith.addf %450, %453 : vector<8x128xf32>
    %455 = vector.extract_strided_slice %454 {offsets = [0, 0], sizes = [8, 32], strides = [1, 1]} : vector<8x128xf32> to vector<8x32xf32>
    %456 = arith.negf %455 : vector<8x32xf32>
    %457 = math.exp %456 : vector<8x32xf32>
    %cst_147 = arith.constant 1.000000e+00 : f32
    %458 = vector.broadcast %cst_147 : f32 to vector<8x32xf32>
    %459 = arith.addf %458, %457 : vector<8x32xf32>
    %460 = arith.divf %458, %459 : vector<8x32xf32>
    %461 = vector.extract_strided_slice %454 {offsets = [0, 32], sizes = [8, 32], strides = [1, 1]} : vector<8x128xf32> to vector<8x32xf32>
    %462 = arith.negf %461 : vector<8x32xf32>
    %463 = math.exp %462 : vector<8x32xf32>
    %cst_148 = arith.constant 1.000000e+00 : f32
    %464 = vector.broadcast %cst_148 : f32 to vector<8x32xf32>
    %465 = arith.addf %464, %463 : vector<8x32xf32>
    %466 = arith.divf %464, %465 : vector<8x32xf32>
    %467 = vector.extract_strided_slice %454 {offsets = [0, 64], sizes = [8, 32], strides = [1, 1]} : vector<8x128xf32> to vector<8x32xf32>
    %468 = math.tanh %467 : vector<8x32xf32>
    %469 = vector.extract_strided_slice %454 {offsets = [0, 96], sizes = [8, 32], strides = [1, 1]} : vector<8x128xf32> to vector<8x32xf32>
    %470 = arith.negf %469 : vector<8x32xf32>
    %471 = math.exp %470 : vector<8x32xf32>
    %cst_149 = arith.constant 1.000000e+00 : f32
    %472 = vector.broadcast %cst_149 : f32 to vector<8x32xf32>
    %473 = arith.addf %472, %471 : vector<8x32xf32>
    %474 = arith.divf %472, %473 : vector<8x32xf32>
    %475 = arith.mulf %466, %400 : vector<8x32xf32>
    %476 = arith.mulf %460, %468 : vector<8x32xf32>
    %477 = arith.addf %475, %476 : vector<8x32xf32>
    %478 = math.tanh %477 : vector<8x32xf32>
    %479 = arith.mulf %474, %478 : vector<8x32xf32>
    %480 = arith.truncf %479 : vector<8x32xf32> to vector<8x32xbf16>
    %481 = arith.index_cast %446 : i32 to index
    %c0_150 = arith.constant 0 : index
    %c0_151 = arith.constant 0 : index
    %482 = vector.load %arg10[%481, %c0_150, %c0_151] : memref<8x8x32xbf16, #tpu.memory_space<vmem>>, vector<1x8x32xbf16>
    %483 = vector.shape_cast %482 : vector<1x8x32xbf16> to vector<8x32xbf16>
    %484 = vector.shape_cast %480 : vector<8x32xbf16> to vector<1x8x32xbf16>
    tpu.vector_store %arg10[%481, %c0_150, %c0_151], %484 {strides = array<i32>} : memref<8x8x32xbf16, #tpu.memory_space<vmem>>, vector<1x8x32xbf16>,
    %c6_i32 = arith.constant 6 : i32
    %c8_i32_152 = arith.constant 8 : i32
    %485 = arith.muli %c6_i32, %c8_i32_152 : i32
    %486 = tpu.assume_multiple %485, 8 : i32
    %487 = arith.index_cast %486 : i32 to index
    %c0_153 = arith.constant 0 : index
    %488 = vector.load %arg15[%487, %c0_153] : memref<64x128xf32, #tpu.memory_space<vmem>>, vector<8x128xf32>
    %489 = arith.truncf %440 : vector<8x32xf32> to vector<8x32xbf16>
    %c0_154 = arith.constant 0 : index
    %c0_155 = arith.constant 0 : index
    %490 = vector.load %arg5[%c0_154, %c0_155] : memref<32x128xbf16, #tpu.memory_space<vmem>>, vector<32x128xbf16>
    %cst_156 = arith.constant dense<0.000000e+00> : vector<8x128xf32>
    %491 = tpu.matmul %489, %490, %cst_156 {dimension_numbers = #tpu.dot_dimension_numbers<[1], [0], [0], [1], [0, 0, 1, 1], [], []>} : vector<8x32xbf16>, vector<32x128xbf16>, vector<8x128xf32> -> vector<8x128xf32>
    %492 = arith.addf %488, %491 : vector<8x128xf32>
    %493 = vector.extract_strided_slice %492 {offsets = [0, 0], sizes = [8, 32], strides = [1, 1]} : vector<8x128xf32> to vector<8x32xf32>
    %494 = arith.negf %493 : vector<8x32xf32>
    %495 = math.exp %494 : vector<8x32xf32>
    %cst_157 = arith.constant 1.000000e+00 : f32
    %496 = vector.broadcast %cst_157 : f32 to vector<8x32xf32>
    %497 = arith.addf %496, %495 : vector<8x32xf32>
    %498 = arith.divf %496, %497 : vector<8x32xf32>
    %499 = vector.extract_strided_slice %492 {offsets = [0, 32], sizes = [8, 32], strides = [1, 1]} : vector<8x128xf32> to vector<8x32xf32>
    %500 = arith.negf %499 : vector<8x32xf32>
    %501 = math.exp %500 : vector<8x32xf32>
    %cst_158 = arith.constant 1.000000e+00 : f32
    %502 = vector.broadcast %cst_158 : f32 to vector<8x32xf32>
    %503 = arith.addf %502, %501 : vector<8x32xf32>
    %504 = arith.divf %502, %503 : vector<8x32xf32>
    %505 = vector.extract_strided_slice %492 {offsets = [0, 64], sizes = [8, 32], strides = [1, 1]} : vector<8x128xf32> to vector<8x32xf32>
    %506 = math.tanh %505 : vector<8x32xf32>
    %507 = vector.extract_strided_slice %492 {offsets = [0, 96], sizes = [8, 32], strides = [1, 1]} : vector<8x128xf32> to vector<8x32xf32>
    %508 = arith.negf %507 : vector<8x32xf32>
    %509 = math.exp %508 : vector<8x32xf32>
    %cst_159 = arith.constant 1.000000e+00 : f32
    %510 = vector.broadcast %cst_159 : f32 to vector<8x32xf32>
    %511 = arith.addf %510, %509 : vector<8x32xf32>
    %512 = arith.divf %510, %511 : vector<8x32xf32>
    %513 = arith.mulf %504, %438 : vector<8x32xf32>
    %514 = arith.mulf %498, %506 : vector<8x32xf32>
    %515 = arith.addf %513, %514 : vector<8x32xf32>
    %516 = math.tanh %515 : vector<8x32xf32>
    %517 = arith.mulf %512, %516 : vector<8x32xf32>
    %518 = arith.truncf %517 : vector<8x32xf32> to vector<8x32xbf16>
    %519 = arith.index_cast %c6_i32 : i32 to index
    %c0_160 = arith.constant 0 : index
    %c0_161 = arith.constant 0 : index
    %520 = vector.load %arg9[%519, %c0_160, %c0_161] : memref<8x8x32xbf16, #tpu.memory_space<vmem>>, vector<1x8x32xbf16>
    %521 = vector.shape_cast %520 : vector<1x8x32xbf16> to vector<8x32xbf16>
    %522 = vector.shape_cast %518 : vector<8x32xbf16> to vector<1x8x32xbf16>
    tpu.vector_store %arg9[%519, %c0_160, %c0_161], %522 {strides = array<i32>} : memref<8x8x32xbf16, #tpu.memory_space<vmem>>, vector<1x8x32xbf16>,
    %c7_i32_162 = arith.constant 7 : i32
    %523 = arith.subi %c7_i32_162, %c6_i32 : i32
    %c8_i32_163 = arith.constant 8 : i32
    %524 = arith.muli %523, %c8_i32_163 : i32
    %525 = tpu.assume_multiple %524, 8 : i32
    %526 = arith.index_cast %525 : i32 to index
    %c0_164 = arith.constant 0 : index
    %527 = vector.load %arg16[%526, %c0_164] : memref<64x128xf32, #tpu.memory_space<vmem>>, vector<8x128xf32>
    %528 = arith.truncf %479 : vector<8x32xf32> to vector<8x32xbf16>
    %c0_165 = arith.constant 0 : index
    %c0_166 = arith.constant 0 : index
    %529 = vector.load %arg6[%c0_165, %c0_166] : memref<32x128xbf16, #tpu.memory_space<vmem>>, vector<32x128xbf16>
    %cst_167 = arith.constant dense<0.000000e+00> : vector<8x128xf32>
    %530 = tpu.matmul %528, %529, %cst_167 {dimension_numbers = #tpu.dot_dimension_numbers<[1], [0], [0], [1], [0, 0, 1, 1], [], []>} : vector<8x32xbf16>, vector<32x128xbf16>, vector<8x128xf32> -> vector<8x128xf32>
    %531 = arith.addf %527, %530 : vector<8x128xf32>
    %532 = vector.extract_strided_slice %531 {offsets = [0, 0], sizes = [8, 32], strides = [1, 1]} : vector<8x128xf32> to vector<8x32xf32>
    %533 = arith.negf %532 : vector<8x32xf32>
    %534 = math.exp %533 : vector<8x32xf32>
    %cst_168 = arith.constant 1.000000e+00 : f32
    %535 = vector.broadcast %cst_168 : f32 to vector<8x32xf32>
    %536 = arith.addf %535, %534 : vector<8x32xf32>
    %537 = arith.divf %535, %536 : vector<8x32xf32>
    %538 = vector.extract_strided_slice %531 {offsets = [0, 32], sizes = [8, 32], strides = [1, 1]} : vector<8x128xf32> to vector<8x32xf32>
    %539 = arith.negf %538 : vector<8x32xf32>
    %540 = math.exp %539 : vector<8x32xf32>
    %cst_169 = arith.constant 1.000000e+00 : f32
    %541 = vector.broadcast %cst_169 : f32 to vector<8x32xf32>
    %542 = arith.addf %541, %540 : vector<8x32xf32>
    %543 = arith.divf %541, %542 : vector<8x32xf32>
    %544 = vector.extract_strided_slice %531 {offsets = [0, 64], sizes = [8, 32], strides = [1, 1]} : vector<8x128xf32> to vector<8x32xf32>
    %545 = math.tanh %544 : vector<8x32xf32>
    %546 = vector.extract_strided_slice %531 {offsets = [0, 96], sizes = [8, 32], strides = [1, 1]} : vector<8x128xf32> to vector<8x32xf32>
    %547 = arith.negf %546 : vector<8x32xf32>
    %548 = math.exp %547 : vector<8x32xf32>
    %cst_170 = arith.constant 1.000000e+00 : f32
    %549 = vector.broadcast %cst_170 : f32 to vector<8x32xf32>
    %550 = arith.addf %549, %548 : vector<8x32xf32>
    %551 = arith.divf %549, %550 : vector<8x32xf32>
    %552 = arith.mulf %543, %477 : vector<8x32xf32>
    %553 = arith.mulf %537, %545 : vector<8x32xf32>
    %554 = arith.addf %552, %553 : vector<8x32xf32>
    %555 = math.tanh %554 : vector<8x32xf32>
    %556 = arith.mulf %551, %555 : vector<8x32xf32>
    %557 = arith.truncf %556 : vector<8x32xf32> to vector<8x32xbf16>
    %558 = arith.index_cast %523 : i32 to index
    %c0_171 = arith.constant 0 : index
    %c0_172 = arith.constant 0 : index
    %559 = vector.load %arg10[%558, %c0_171, %c0_172] : memref<8x8x32xbf16, #tpu.memory_space<vmem>>, vector<1x8x32xbf16>
    %560 = vector.shape_cast %559 : vector<1x8x32xbf16> to vector<8x32xbf16>
    %561 = vector.shape_cast %557 : vector<8x32xbf16> to vector<1x8x32xbf16>
    tpu.vector_store %arg10[%558, %c0_171, %c0_172], %561 {strides = array<i32>} : memref<8x8x32xbf16, #tpu.memory_space<vmem>>, vector<1x8x32xbf16>,
    %c7_i32_173 = arith.constant 7 : i32
    %c8_i32_174 = arith.constant 8 : i32
    %562 = arith.muli %c7_i32_173, %c8_i32_174 : i32
    %563 = tpu.assume_multiple %562, 8 : i32
    %564 = arith.index_cast %563 : i32 to index
    %c0_175 = arith.constant 0 : index
    %565 = vector.load %arg15[%564, %c0_175] : memref<64x128xf32, #tpu.memory_space<vmem>>, vector<8x128xf32>
    %566 = arith.truncf %517 : vector<8x32xf32> to vector<8x32xbf16>
    %c0_176 = arith.constant 0 : index
    %c0_177 = arith.constant 0 : index
    %567 = vector.load %arg5[%c0_176, %c0_177] : memref<32x128xbf16, #tpu.memory_space<vmem>>, vector<32x128xbf16>
    %cst_178 = arith.constant dense<0.000000e+00> : vector<8x128xf32>
    %568 = tpu.matmul %566, %567, %cst_178 {dimension_numbers = #tpu.dot_dimension_numbers<[1], [0], [0], [1], [0, 0, 1, 1], [], []>} : vector<8x32xbf16>, vector<32x128xbf16>, vector<8x128xf32> -> vector<8x128xf32>
    %569 = arith.addf %565, %568 : vector<8x128xf32>
    %570 = vector.extract_strided_slice %569 {offsets = [0, 0], sizes = [8, 32], strides = [1, 1]} : vector<8x128xf32> to vector<8x32xf32>
    %571 = arith.negf %570 : vector<8x32xf32>
    %572 = math.exp %571 : vector<8x32xf32>
    %cst_179 = arith.constant 1.000000e+00 : f32
    %573 = vector.broadcast %cst_179 : f32 to vector<8x32xf32>
    %574 = arith.addf %573, %572 : vector<8x32xf32>
    %575 = arith.divf %573, %574 : vector<8x32xf32>
    %576 = vector.extract_strided_slice %569 {offsets = [0, 32], sizes = [8, 32], strides = [1, 1]} : vector<8x128xf32> to vector<8x32xf32>
    %577 = arith.negf %576 : vector<8x32xf32>
    %578 = math.exp %577 : vector<8x32xf32>
    %cst_180 = arith.constant 1.000000e+00 : f32
    %579 = vector.broadcast %cst_180 : f32 to vector<8x32xf32>
    %580 = arith.addf %579, %578 : vector<8x32xf32>
    %581 = arith.divf %579, %580 : vector<8x32xf32>
    %582 = vector.extract_strided_slice %569 {offsets = [0, 64], sizes = [8, 32], strides = [1, 1]} : vector<8x128xf32> to vector<8x32xf32>
    %583 = math.tanh %582 : vector<8x32xf32>
    %584 = vector.extract_strided_slice %569 {offsets = [0, 96], sizes = [8, 32], strides = [1, 1]} : vector<8x128xf32> to vector<8x32xf32>
    %585 = arith.negf %584 : vector<8x32xf32>
    %586 = math.exp %585 : vector<8x32xf32>
    %cst_181 = arith.constant 1.000000e+00 : f32
    %587 = vector.broadcast %cst_181 : f32 to vector<8x32xf32>
    %588 = arith.addf %587, %586 : vector<8x32xf32>
    %589 = arith.divf %587, %588 : vector<8x32xf32>
    %590 = arith.mulf %581, %515 : vector<8x32xf32>
    %591 = arith.mulf %575, %583 : vector<8x32xf32>
    %592 = arith.addf %590, %591 : vector<8x32xf32>
    %593 = math.tanh %592 : vector<8x32xf32>
    %594 = arith.mulf %589, %593 : vector<8x32xf32>
    %595 = arith.truncf %594 : vector<8x32xf32> to vector<8x32xbf16>
    %596 = arith.index_cast %c7_i32_173 : i32 to index
    %c0_182 = arith.constant 0 : index
    %c0_183 = arith.constant 0 : index
    %597 = vector.load %arg9[%596, %c0_182, %c0_183] : memref<8x8x32xbf16, #tpu.memory_space<vmem>>, vector<1x8x32xbf16>
    %598 = vector.shape_cast %597 : vector<1x8x32xbf16> to vector<8x32xbf16>
    %599 = vector.shape_cast %595 : vector<8x32xbf16> to vector<1x8x32xbf16>
    tpu.vector_store %arg9[%596, %c0_182, %c0_183], %599 {strides = array<i32>} : memref<8x8x32xbf16, #tpu.memory_space<vmem>>, vector<1x8x32xbf16>,
    %c7_i32_184 = arith.constant 7 : i32
    %600 = arith.subi %c7_i32_184, %c7_i32_173 : i32
    %c8_i32_185 = arith.constant 8 : i32
    %601 = arith.muli %600, %c8_i32_185 : i32
    %602 = tpu.assume_multiple %601, 8 : i32
    %603 = arith.index_cast %602 : i32 to index
    %c0_186 = arith.constant 0 : index
    %604 = vector.load %arg16[%603, %c0_186] : memref<64x128xf32, #tpu.memory_space<vmem>>, vector<8x128xf32>
    %605 = arith.truncf %556 : vector<8x32xf32> to vector<8x32xbf16>
    %c0_187 = arith.constant 0 : index
    %c0_188 = arith.constant 0 : index
    %606 = vector.load %arg6[%c0_187, %c0_188] : memref<32x128xbf16, #tpu.memory_space<vmem>>, vector<32x128xbf16>
    %cst_189 = arith.constant dense<0.000000e+00> : vector<8x128xf32>
    %607 = tpu.matmul %605, %606, %cst_189 {dimension_numbers = #tpu.dot_dimension_numbers<[1], [0], [0], [1], [0, 0, 1, 1], [], []>} : vector<8x32xbf16>, vector<32x128xbf16>, vector<8x128xf32> -> vector<8x128xf32>
    %608 = arith.addf %604, %607 : vector<8x128xf32>
    %609 = vector.extract_strided_slice %608 {offsets = [0, 0], sizes = [8, 32], strides = [1, 1]} : vector<8x128xf32> to vector<8x32xf32>
    %610 = arith.negf %609 : vector<8x32xf32>
    %611 = math.exp %610 : vector<8x32xf32>
    %cst_190 = arith.constant 1.000000e+00 : f32
    %612 = vector.broadcast %cst_190 : f32 to vector<8x32xf32>
    %613 = arith.addf %612, %611 : vector<8x32xf32>
    %614 = arith.divf %612, %613 : vector<8x32xf32>
    %615 = vector.extract_strided_slice %608 {offsets = [0, 32], sizes = [8, 32], strides = [1, 1]} : vector<8x128xf32> to vector<8x32xf32>
    %616 = arith.negf %615 : vector<8x32xf32>
    %617 = math.exp %616 : vector<8x32xf32>
    %cst_191 = arith.constant 1.000000e+00 : f32
    %618 = vector.broadcast %cst_191 : f32 to vector<8x32xf32>
    %619 = arith.addf %618, %617 : vector<8x32xf32>
    %620 = arith.divf %618, %619 : vector<8x32xf32>
    %621 = vector.extract_strided_slice %608 {offsets = [0, 64], sizes = [8, 32], strides = [1, 1]} : vector<8x128xf32> to vector<8x32xf32>
    %622 = math.tanh %621 : vector<8x32xf32>
    %623 = vector.extract_strided_slice %608 {offsets = [0, 96], sizes = [8, 32], strides = [1, 1]} : vector<8x128xf32> to vector<8x32xf32>
    %624 = arith.negf %623 : vector<8x32xf32>
    %625 = math.exp %624 : vector<8x32xf32>
    %cst_192 = arith.constant 1.000000e+00 : f32
    %626 = vector.broadcast %cst_192 : f32 to vector<8x32xf32>
    %627 = arith.addf %626, %625 : vector<8x32xf32>
    %628 = arith.divf %626, %627 : vector<8x32xf32>
    %629 = arith.mulf %620, %554 : vector<8x32xf32>
    %630 = arith.mulf %614, %622 : vector<8x32xf32>
    %631 = arith.addf %629, %630 : vector<8x32xf32>
    %632 = math.tanh %631 : vector<8x32xf32>
    %633 = arith.mulf %628, %632 : vector<8x32xf32>
    %634 = arith.truncf %633 : vector<8x32xf32> to vector<8x32xbf16>
    %635 = arith.index_cast %600 : i32 to index
    %c0_193 = arith.constant 0 : index
    %c0_194 = arith.constant 0 : index
    %636 = vector.load %arg10[%635, %c0_193, %c0_194] : memref<8x8x32xbf16, #tpu.memory_space<vmem>>, vector<1x8x32xbf16>
    %637 = vector.shape_cast %636 : vector<1x8x32xbf16> to vector<8x32xbf16>
    %638 = vector.shape_cast %634 : vector<8x32xbf16> to vector<1x8x32xbf16>
    tpu.vector_store %arg10[%635, %c0_193, %c0_194], %638 {strides = array<i32>} : memref<8x8x32xbf16, #tpu.memory_space<vmem>>, vector<1x8x32xbf16>,
    %c8_i32_195 = arith.constant 8 : i32
    %c0_196 = arith.constant 0 : index
    %c0_197 = arith.constant 0 : index
    %639 = vector.load %arg11[%c0_196, %c0_197] : memref<8x32xf32, #tpu.memory_space<vmem>>, vector<8x32xf32>
    tpu.vector_store %arg11[%c0_196, %c0_197], %594 {strides = array<i32>} : memref<8x32xf32, #tpu.memory_space<vmem>>, vector<8x32xf32>,
    %c0_198 = arith.constant 0 : index
    %c0_199 = arith.constant 0 : index
    %640 = vector.load %arg12[%c0_198, %c0_199] : memref<8x32xf32, #tpu.memory_space<vmem>>, vector<8x32xf32>
    tpu.vector_store %arg12[%c0_198, %c0_199], %592 {strides = array<i32>} : memref<8x32xf32, #tpu.memory_space<vmem>>, vector<8x32xf32>,
    %c0_200 = arith.constant 0 : index
    %c0_201 = arith.constant 0 : index
    %641 = vector.load %arg13[%c0_200, %c0_201] : memref<8x32xf32, #tpu.memory_space<vmem>>, vector<8x32xf32>
    tpu.vector_store %arg13[%c0_200, %c0_201], %633 {strides = array<i32>} : memref<8x32xf32, #tpu.memory_space<vmem>>, vector<8x32xf32>,
    %c0_202 = arith.constant 0 : index
    %c0_203 = arith.constant 0 : index
    %642 = vector.load %arg14[%c0_202, %c0_203] : memref<8x32xf32, #tpu.memory_space<vmem>>, vector<8x32xf32>
    tpu.vector_store %arg14[%c0_202, %c0_203], %631 {strides = array<i32>} : memref<8x32xf32, #tpu.memory_space<vmem>>, vector<8x32xf32>,
    return
  }
  func.func @transform_0(%arg0: i32) -> (i32, i32, i32) {
    %c0_i32 = arith.constant 0 : i32
    %c0_i32_0 = arith.constant 0 : i32
    %c0_i32_1 = arith.constant 0 : i32
    return %arg0, %c0_i32, %c0_i32_0 : i32, i32, i32
  }
  func.func @transform_1(%arg0: i32) -> (i32, i32, i32) {
    %c0_i32 = arith.constant 0 : i32
    %0 = arith.subi %c0_i32, %arg0 : i32
    %c0_i32_0 = arith.constant 0 : i32
    %c0_i32_1 = arith.constant 0 : i32
    %c0_i32_2 = arith.constant 0 : i32
    return %0, %c0_i32_0, %c0_i32_1 : i32, i32, i32
  }
  func.func @transform_2(%arg0: i32) -> (i32, i32) {
    %c0_i32 = arith.constant 0 : i32
    %c0_i32_0 = arith.constant 0 : i32
    %c0_i32_1 = arith.constant 0 : i32
    return %c0_i32, %c0_i32_0 : i32, i32
  }
  func.func @transform_3(%arg0: i32) -> (i32, i32) {
    %c0_i32 = arith.constant 0 : i32
    %c0_i32_0 = arith.constant 0 : i32
    %c0_i32_1 = arith.constant 0 : i32
    return %c0_i32, %c0_i32_0 : i32, i32
  }
  func.func @transform_4(%arg0: i32) -> (i32, i32) {
    %c0_i32 = arith.constant 0 : i32
    %c0_i32_0 = arith.constant 0 : i32
    %c0_i32_1 = arith.constant 0 : i32
    return %c0_i32, %c0_i32_0 : i32, i32
  }
  func.func @transform_5(%arg0: i32) -> (i32, i32) {
    %c0_i32 = arith.constant 0 : i32
    %c0_i32_0 = arith.constant 0 : i32
    %c0_i32_1 = arith.constant 0 : i32
    return %c0_i32, %c0_i32_0 : i32, i32
  }
  func.func @transform_6(%arg0: i32) -> (i32, i32) {
    %c0_i32 = arith.constant 0 : i32
    %c0_i32_0 = arith.constant 0 : i32
    %c0_i32_1 = arith.constant 0 : i32
    return %c0_i32, %c0_i32_0 : i32, i32
  }
  func.func @transform_7(%arg0: i32) -> (i32, i32) {
    %c0_i32 = arith.constant 0 : i32
    %c0_i32_0 = arith.constant 0 : i32
    %c0_i32_1 = arith.constant 0 : i32
    return %c0_i32, %c0_i32_0 : i32, i32
  }
  func.func @transform_8(%arg0: i32) -> (i32, i32, i32) {
    %c0_i32 = arith.constant 0 : i32
    %c0_i32_0 = arith.constant 0 : i32
    %c0_i32_1 = arith.constant 0 : i32
    return %arg0, %c0_i32, %c0_i32_0 : i32, i32, i32
  }
  func.func @transform_9(%arg0: i32) -> (i32, i32, i32) {
    %c0_i32 = arith.constant 0 : i32
    %0 = arith.subi %c0_i32, %arg0 : i32
    %c0_i32_0 = arith.constant 0 : i32
    %c0_i32_1 = arith.constant 0 : i32
    %c0_i32_2 = arith.constant 0 : i32
    return %0, %c0_i32_0, %c0_i32_1 : i32, i32, i32
  }
}

</mosaic_0001>

<bundles_post_ra>
// kernel: bert_bilstm_classifier_forward.2
= control target key start
LH: loop header
LB: loop body
LE: loop exit
PB: predicated region body
PF: predicated region fallthrough
CT: control target
= control target key end

     0   :  { %vm72_vm0 = vcmask 261120   ;;  %v2068_v3 = vmov 0.0   ;;  %s2069_s29 = smov 32   ;;  %s2071_s19 = smov 96   ;;  %s2600_s3 = inlined_call_operand.vmem [shape: bf16[32,128], index: 3, kind: input, shape index: {}]   ;;  %s2601_s4 = inlined_call_operand.vmem [shape: bf16[32,128], index: 4, kind: input, shape index: {}]   ;;  %s2602_s2 = inlined_call_operand.vmem [shape: bf16[32,128], index: 2, kind: input, shape index: {}]   ;;  %s2603_s1 = inlined_call_operand.vmem [shape: bf16[8,8,32], index: 1, kind: input, shape index: {}, may-alias: {0,1}]   ;;  %s2604_s7 = inlined_call_operand.vmem [shape: f32[1,128], index: 7, kind: input, shape index: {}]   ;;  %s2605_s0 = inlined_call_operand.vmem [shape: bf16[8,8,32], index: 0, kind: input, shape index: {}, may-alias: {0,1}]   ;;  %s2606_s5 = inlined_call_operand.vmem [shape: bf16[32,128], index: 5, kind: input, shape index: {}]   ;;  %s2607_s6 = inlined_call_operand.vmem [shape: f32[1,128], index: 6, kind: input, shape index: {}]   ;;  %s2608_s9 = inlined_call_operand.vmem [shape: bf16[8,8,32], index: 9, kind: output, shape index: {1}]   ;;  %s2609_s8 = inlined_call_operand.vmem [shape: bf16[8,8,32], index: 8, kind: output, shape index: {0}]  }
   0x1   :  { %v1900_v0 = vld [vmem:[%s2600_s3 + $0x8] sm:$0xff]  ;;  %73 = vst.msk [vmem:[#allocation2] sm:$0xff] %vm72_vm0, %v2068_v3  ;;  %v1899_v4 = vld [vmem:[%s2600_s3] sm:$0xff]  ;;  %v1895_v18 = vld [vmem:[%s2603_s1 + $0x10] sm:$0xff] }
   0x2   :  { %v1902_v1 = vld [vmem:[%s2601_s4 + $0x8] sm:$0xff]  ;;  %74 = vst.msk [vmem:[#allocation3] sm:$0xff] %vm72_vm0, %v2068_v3  ;;  %241 = vmatpush.bf16.msra.mxu1 %v1900_v0  ;;  %v1901_v5 = vld [vmem:[%s2601_s4] sm:$0xff]  ;;  %v1896_v19 = vld [vmem:[%s2603_s1 + $0x18] sm:$0xff] }
   0x3   :  { %v1898_v2 = vld [vmem:[%s2602_s2 + $0x8] sm:$0xff]  ;;  %303 = vmatpush.bf16.msra.mxu2 %v1902_v1  ;;  %75 = vst.msk [vmem:[#allocation4] sm:$0xff] %vm72_vm0, %v2068_v3  ;;  %v1897_v6 = vld [vmem:[%s2602_s2] sm:$0xff] }
   0x4   :  { %152 = vmatpush.bf16.msra.mxu0 %v1898_v2  ;;  %76 = vst.msk [vmem:[#allocation5] sm:$0xff] %vm72_vm0, %v2068_v3  ;;  %v1893_v7 = vld [vmem:[%s2603_s1] sm:$0xff]  ;;  %v1904_v11 = vld [vmem:[%s2606_s5 + $0x8] sm:$0xff] }
   0x5   :  { %v1889_v8 = vld [vmem:[%s2605_s0] sm:$0xff]  ;;  %387 = vmatpush.bf16.msra.mxu3 %v1904_v11  ;;  %v1894_v15 = vld [vmem:[%s2603_s1 + $0x8] sm:$0xff]  ;;  %s2070_s1 = smov 64  }
   0x6   :  { %242 = vmatpush.bf16.msra.mxu1 %v1899_v4  ;;  %v1903_v12 = vld [vmem:[%s2606_s5] sm:$0xff] }
   0x7   :  { %304 = vmatpush.bf16.msra.mxu2 %v1901_v5  ;;  %v1937_v20 = vld [vmem:[%s2604_s7] ss:$0 sm:$0xff] }
   0x8   :  { %v272_v9 = vld [vmem:[#allocation2] sm:$0xff]  ;;  %153 = vmatpush.bf16.msra.mxu0 %v1897_v6 }
   0x9   :  { %v277_v10 = vpack.c.bf16 %v272_v9, %v272_v9  ;;  %1711 = vmatmul.msk.bf16.vlgmr.msra.gmra.mxu1 %vm72_vm0, %v1893_v7  ;;  %388 = vmatpush.bf16.msra.mxu3 %v1903_v12  ;;  %v273_v16 = vld [vmem:[#allocation3] sm:$0xff]  ;;  %v2180_v22 = vld [vmem:[%s2607_s6] ss:$0 sm:$0xff] }
   0xa   :  { %v274_v13 = vld [vmem:[#allocation4] sm:$0xff]  ;;  %332 = vrot.lane.b32.xlu1 %v273_v16, %s2069_s29 }
   0xb   :  { %1723 = vmatmul.msk.bf16.vlgmr.msra.gmra.mxu2 %vm72_vm0, %v277_v10  ;;  %1683 = vmatmul.msk.bf16.vlgmr.msra.gmra.mxu0 %vm72_vm0, %v1889_v8  ;;  %v361_v14 = vpack.c.bf16 %v274_v13, %v274_v13  ;;  %v275_v17 = vld [vmem:[#allocation5] sm:$0xff] }
   0xd   :  { %1733 = vmatmul.msk.bf16.vlgmr.msra.gmra.mxu3 %vm72_vm0, %v361_v14 }
  0x12   :  { %416 = vrot.lane.b32.xlu1 %v275_v17, %s2069_s29 }
  0x19   :  { %1712 = vmatmul.msk.bf16.gmra.mxu1 %vm72_vm0, %v1894_v15 }
  0x29   :  { %1713 = vmatmul.msk.bf16.gmra.mxu1 %vm72_vm0, %v1895_v18 }
  0x39   :  { %1714 = vmatmul.msk.bf16.gmra.mxu1 %vm72_vm0, %v1896_v19 }
  0x7c   :  { %v333_v14 = vpop.permute.xlu1 %332 }
  0x84   :  { %v417_v19 = vpop.permute.xlu1 %416 }
  0x86   :  { %v244_v21 = vpop.f32.mrf.mxu1 }
  0x87   :  { %v2182_v23 = vadd.f32 %v1937_v20, %v244_v21 }
  0x88   :  { %v155_v24 = vpop.f32.mrf.mxu0 }
  0x89   :  { %v156_v25 = vadd.f32 %v2180_v22, %v155_v24 }
  0x8e   :  { %v306_v26 = vpop.f32.mrf.mxu2  ;;  %v246_v28 = vpop.f32.mrf.mxu1 }
  0x8f   :  { %v310_v27 = vadd.f32 %v306_v26, %v156_v25  ;;  %v2185_v29 = vadd.f32 %v1937_v20, %v246_v28 }
  0x90   :  { %v390_v34 = vpop.f32.mrf.mxu3 }
  0x91   :  { %1939 = vtanh.f32 %v310_v27  ;;  %v1724_v48 = vmul.f32 -1.442695, %v310_v27 }
  0x96   :  { %v308_v30 = vpop.f32.mrf.mxu2  ;;  %v249_v32 = vpop.f32.mrf.mxu1 }
  0x97   :  { %v1940_v31 = vpop.eup %1939  ;;  %v2187_v33 = vadd.f32 %v1937_v20, %v249_v32  ;;  %v1906_v32 = vld [vmem:[%s2601_s4 + $0x8] sm:$0xff] }
  0x98   :  { %337 = vrot.lane.b32.xlu0 %v1940_v31, %s2070_s1  ;;  %v392_v37 = vpop.f32.mrf.mxu3  ;;  %474 = vmatpush.bf16.msrb.mxu2 %v1906_v32 }
  0x9e   :  { %v251_v35 = vpop.f32.mrf.mxu1 }
  0x9f   :  { %v2190_v36 = vadd.f32 %v1937_v20, %v251_v35 }
  0xa6   :  { %v254_v38 = vpop.f32.mrf.mxu1 }
  0xa7   :  { %v2192_v39 = vadd.f32 %v1937_v20, %v254_v38 }
  0xae   :  { %v256_v40 = vpop.f32.mrf.mxu1 }
  0xaf   :  { %v2194_v41 = vadd.f32 %v1937_v20, %v256_v40 }
  0xb6   :  { %v259_v42 = vpop.f32.mrf.mxu1 }
  0xb7   :  { %v2196_v43 = vadd.f32 %v1937_v20, %v259_v42 }
  0xbe   :  { %v261_v44 = vpop.f32.mrf.mxu1 }
  0xbf   :  { %v262_v45 = vadd.f32 %v1937_v20, %v261_v44  ;;  %v1908_v44 = vld [vmem:[%s2606_s5 + $0x8] sm:$0xff] }
  0xc0   :  { %557 = vmatpush.bf16.msrb.mxu3 %v1908_v44 }
  0xc1   :  { %v394_v46 = vadd.f32 %v390_v34, %v262_v45  ;;  %v1905_v34 = vld [vmem:[%s2601_s4] sm:$0xff] }
  0xc2   :  { %475 = vmatpush.bf16.msrb.mxu2 %v1905_v34  ;;  %v1907_v45 = vld [vmem:[%s2606_s5] sm:$0xff] }
  0xc3   :  { %1941 = vtanh.f32 %v394_v46  ;;  %v1734_v63 = vmul.f32 -1.442695, %v394_v46 }
  0xc4   :  { %1943 = vpow2.f32 %v1724_v48  ;;  %558 = vmatpush.bf16.msrb.mxu3 %v1907_v45  ;;  %v157_v48 = vpop.f32.mrf.mxu0 }
  0xc9   :  { %v1942_v47 = vpop.eup %1941 }
  0xca   :  { %421 = vrot.lane.b32.xlu0 %v1942_v47, %s2070_s1  ;;  %v1944_v49 = vpop.eup %1943 }
  0xcb   :  { %v314_v50 = vadd.f32 1.0, %v1944_v49  ;;  %v158_v49 = vadd.f32 %v2180_v22, %v157_v48 }
  0xcd   :  { %1945 = vrcp.f32 %v314_v50  ;;  %vm320_vm1 = vweird.f32 %v314_v50  ;;  %v326_v55 = vand.u32 2147483648, %v314_v50  ;;  %v324_v57 = vand.u32 2147483647, %v314_v50 }
  0xce   :  { %1947 = vpow2.f32 %v1734_v63 }
  0xcf   :  { %v327_v58 = vor.u32 1.1754944e-38, %v326_v55  ;;  %vm325_vm4 = vcmp.eq.f32.partialorder %v324_v57, 8.507059e+37 }
  0xd3   :  { %v1946_v51 = vpop.eup %1945 }
  0xd4   :  { %v316_v52 = vmul.f32 %v1946_v51, %v314_v50  ;;  %vm321_vm2 = vweird.f32 %v1946_v51  ;;  %v1948_v0 = vpop.eup %1947 }
  0xd5   :  { %vm322_vm3 = vmor %vm320_vm1, %vm321_vm2  ;;  %v398_v1 = vadd.f32 1.0, %v1948_v0 }
  0xd6   :  { %v317_v53 = vsub.f32 1.0, %v316_v52 }
  0xd7   :  { %1949 = vrcp.f32 %v398_v1  ;;  %v410_v7 = vand.u32 2147483648, %v398_v1  ;;  %vm404_vm6 = vweird.f32 %v398_v1  ;;  %v408_v8 = vand.u32 2147483647, %v398_v1 }
  0xd8   :  { %v318_v54 = vmul.f32 %v1946_v51, %v317_v53 }
  0xd9   :  { %v411_v10 = vor.u32 1.1754944e-38, %v410_v7  ;;  %vm409_vm8 = vcmp.eq.f32.partialorder %v408_v8, 8.507059e+37 }
  0xda   :  { %v319_v56 = vadd.f32 %v1946_v51, %v318_v54 }
  0xdc   :  { %v323_v59 = vsel %vm322_vm3, %v1946_v51, %v319_v56 }
  0xdd   :  { %v328_v60 = vsel %vm325_vm4, %v327_v58, %v323_v59  ;;  %v1950_v2 = vpop.eup %1949 }
  0xde   :  { %v400_v3 = vmul.f32 %v1950_v2, %v398_v1  ;;  %vm405_vm5 = vweird.f32 %v1950_v2  ;;  %v335_v15 = vmul.f32 %v333_v14, %v328_v60 }
  0xdf   :  { %vm406_vm7 = vmor %vm404_vm6, %vm405_vm5 }
  0xe0   :  { %v401_v4 = vsub.f32 1.0, %v400_v3 }
  0xe2   :  { %v402_v5 = vmul.f32 %v1950_v2, %v401_v4 }
  0xe4   :  { %v403_v6 = vadd.f32 %v1950_v2, %v402_v5 }
  0xe6   :  { %v407_v9 = vsel %vm406_vm7, %v1950_v2, %v403_v6 }
  0xe7   :  { %v412_v11 = vsel %vm409_vm8, %v411_v10, %v407_v9 }
  0xe8   :  { %v419_v20 = vmul.f32 %v417_v19, %v412_v11 }
 0x10a   :  { %v338_v61 = vpop.permute.xlu0 %337 }
 0x10b   :  { %v340_v62 = vmul.f32 %v338_v61, %v328_v60 }
 0x10d   :  { %342 = vrot.lane.b32.xlu2 %v340_v62, %s2069_s29 }
 0x13c   :  { %v422_v12 = vpop.permute.xlu0 %421 }
 0x13d   :  { %v424_v13 = vmul.f32 %v422_v12, %v412_v11 }
 0x13f   :  { %426 = vrot.lane.b32.xlu2 %v424_v13, %s2069_s29 }
 0x167   :  { %v343_v16 = vpop.permute.xlu2 %342 }
 0x168   :  { %v2201_v17 = vadd.f32 %v343_v16, %v335_v15 }
 0x16a   :  { %1951 = vtanh.f32 %v2201_v17 }
 0x170   :  { %v1952_v18 = vpop.eup %1951 }
 0x171   :  { %348 = vrot.lane.b32.xlu0 %v1952_v18, %s2070_s1 }
 0x199   :  { %v427_v21 = vpop.permute.xlu2 %426 }
 0x19a   :  { %v2205_v24 = vadd.f32 %v427_v21, %v419_v20 }
 0x19c   :  { %1953 = vtanh.f32 %v2205_v24 }
 0x1a2   :  { %v1954_v25 = vpop.eup %1953 }
 0x1a3   :  { %432 = vrot.lane.b32.xlu1 %v1954_v25, %s2070_s1 }
 0x1e3   :  { %v349_v26 = vpop.permute.xlu0 %348 }
 0x1e4   :  { %v351_v27 = vmul.f32 %v349_v26, %v328_v60 }
 0x1e6   :  { %v2209_v28 = vpack.c.bf16 %v351_v27, %v351_v27 }
 0x1e8   :  { %v449_v30 = vunpack.c.l.b16 %v2209_v28 }
 0x1ea   :  { %v450_v31 = vpack.c.b16 %v449_v30, %v449_v30 }
 0x1ec   :  { %451 = vrot.lane.b32.xlu2 %v450_v31, %s2069_s29 }
 0x215   :  { %v433_v35 = vpop.permute.xlu1 %432 }
 0x216   :  { %v435_v37 = vmul.f32 %v433_v35, %v412_v11 }
 0x218   :  { %v2219_v38 = vpack.c.bf16 %v435_v37, %v435_v37 }
 0x21a   :  { %v532_v40 = vunpack.c.l.b16 %v2219_v38 }
 0x21c   :  { %v533_v42 = vpack.c.b16 %v532_v40, %v532_v40 }
 0x21e   :  { %534 = vrot.lane.b32.xlu0 %v533_v42, %s2069_s29 }
 0x246   :  { %v452_v46 = vpop.permute.xlu2 %451 }
 0x247   :  { %1744 = vmatmul.msk.bf16.vlgmr.msrb.gmra.mxu2 %vm72_vm0, %v452_v46 }
 0x290   :  { %v535_v47 = vpop.permute.xlu0 %534 }
 0x291   :  { %1755 = vmatmul.msk.bf16.vlgmr.msrb.gmra.mxu3 %vm72_vm0, %v535_v47  ;;  %v1909_v47 = vld [vmem:[%s2601_s4] sm:$0xff] }
 0x2ca   :  { %v477_v50 = vpop.f32.mrf.mxu2 }
 0x2cb   :  { %v481_v51 = vadd.f32 %v477_v50, %v158_v49 }
 0x2cd   :  { %1955 = vtanh.f32 %v481_v51  ;;  %v1745_v56 = vmul.f32 -1.442695, %v481_v51 }
 0x2d2   :  { %v479_v52 = vpop.f32.mrf.mxu2 }
 0x2d3   :  { %v1956_v53 = vpop.eup %1955 }
 0x2d4   :  { %504 = vrot.lane.b32.xlu1 %v1956_v53, %s2070_s1  ;;  %v1890_v53 = vld [vmem:[%s2605_s0 + $0x8] sm:$0xff] }
 0x2d5   :  { %1684 = vmatmul.msk.bf16.gmra.mxu0 %vm72_vm0, %v1890_v53 }
 0x314   :  { %v560_v54 = vpop.f32.mrf.mxu3 }
 0x315   :  { %v564_v55 = vadd.f32 %v560_v54, %v2196_v43  ;;  %v1912_v54 = vld [vmem:[%s2606_s5 + $0x8] sm:$0xff] }
 0x316   :  { %723 = vmatpush.bf16.msra.mxu3 %v1912_v54 }
 0x317   :  { %1957 = vtanh.f32 %v564_v55  ;;  %v1756_v8 = vmul.f32 -1.442695, %v564_v55  ;;  %v1911_v55 = vld [vmem:[%s2606_s5] sm:$0xff] }
 0x318   :  { %1959 = vpow2.f32 %v1745_v56 }
 0x31a   :  { %724 = vmatpush.bf16.msra.mxu3 %v1911_v55 }
 0x31c   :  { %v562_v57 = vpop.f32.mrf.mxu3 }
 0x31d   :  { %v1958_v58 = vpop.eup %1957 }
 0x31e   :  { %587 = vrot.lane.b32.xlu2 %v1958_v58, %s2070_s1  ;;  %v1960_v59 = vpop.eup %1959 }
 0x31f   :  { %v485_v60 = vadd.f32 1.0, %v1960_v59 }
 0x321   :  { %1961 = vrcp.f32 %v485_v60  ;;  %v497_v2 = vand.u32 2147483648, %v485_v60  ;;  %vm491_vm10 = vweird.f32 %v485_v60  ;;  %v495_v3 = vand.u32 2147483647, %v485_v60 }
 0x322   :  { %1963 = vpow2.f32 %v1756_v8 }
 0x323   :  { %v498_v4 = vor.u32 1.1754944e-38, %v497_v2  ;;  %vm496_vm12 = vcmp.eq.f32.partialorder %v495_v3, 8.507059e+37 }
 0x327   :  { %v1962_v61 = vpop.eup %1961 }
 0x328   :  { %v487_v62 = vmul.f32 %v1962_v61, %v485_v60  ;;  %vm492_vm9 = vweird.f32 %v1962_v61  ;;  %v1964_v9 = vpop.eup %1963 }
 0x329   :  { %vm493_vm11 = vmor %vm491_vm10, %vm492_vm9  ;;  %v568_v10 = vadd.f32 1.0, %v1964_v9 }
 0x32a   :  { %v488_v63 = vsub.f32 1.0, %v487_v62 }
 0x32b   :  { %1965 = vrcp.f32 %v568_v10  ;;  %v580_v16 = vand.u32 2147483648, %v568_v10  ;;  %vm574_vm14 = vweird.f32 %v568_v10  ;;  %v578_v18 = vand.u32 2147483647, %v568_v10 }
 0x32c   :  { %v489_v0 = vmul.f32 %v1962_v61, %v488_v63 }
 0x32d   :  { %v581_v20 = vor.u32 1.1754944e-38, %v580_v16  ;;  %vm579_vm1 = vcmp.eq.f32.partialorder %v578_v18, 8.507059e+37 }
 0x32e   :  { %v490_v1 = vadd.f32 %v1962_v61, %v489_v0 }
 0x330   :  { %v494_v43 = vsel %vm493_vm11, %v1962_v61, %v490_v1 }
 0x331   :  { %v499_v6 = vsel %vm496_vm12, %v498_v4, %v494_v43  ;;  %v1966_v11 = vpop.eup %1965 }
 0x332   :  { %v570_v12 = vmul.f32 %v1966_v11, %v568_v10  ;;  %vm575_vm13 = vweird.f32 %v1966_v11  ;;  %v502_v27 = vmul.f32 %v499_v6, %v2201_v17 }
 0x333   :  { %vm576_vm15 = vmor %vm574_vm14, %vm575_vm13 }
 0x334   :  { %v571_v13 = vsub.f32 1.0, %v570_v12 }
 0x336   :  { %v572_v14 = vmul.f32 %v1966_v11, %v571_v13 }
 0x338   :  { %v573_v15 = vadd.f32 %v1966_v11, %v572_v14 }
 0x33a   :  { %v577_v19 = vsel %vm576_vm15, %v1966_v11, %v573_v15 }
 0x33b   :  { %v582_v25 = vsel %vm579_vm1, %v581_v20, %v577_v19 }
 0x33c   :  { %v585_v34 = vmul.f32 %v582_v25, %v2205_v24  ;;  %v1910_v24 = vld [vmem:[%s2601_s4 + $0x8] sm:$0xff] }
 0x33d   :  { %640 = vmatpush.bf16.msra.mxu2 %v1910_v24 }
 0x341   :  { %641 = vmatpush.bf16.msra.mxu2 %v1909_v47 }
 0x346   :  { %v505_v5 = vpop.permute.xlu1 %504 }
 0x347   :  { %v507_v7 = vmul.f32 %v505_v5, %v499_v6 }
 0x349   :  { %509 = vrot.lane.b32.xlu0 %v507_v7, %s2069_s29 }
 0x352   :  { %v160_v58 = vpop.f32.mrf.mxu0 }
 0x353   :  { %v161_v59 = vadd.f32 %v2180_v22, %v160_v58  ;;  %v1913_v58 = vld [vmem:[%s2601_s4] sm:$0xff] }
 0x378   :  { %v588_v21 = vpop.permute.xlu2 %587 }
 0x379   :  { %v590_v26 = vmul.f32 %v588_v21, %v582_v25 }
 0x37b   :  { %592 = vrot.lane.b32.xlu1 %v590_v26, %s2069_s29 }
 0x3bb   :  { %v510_v30 = vpop.permute.xlu0 %509 }
 0x3bc   :  { %v2238_v31 = vadd.f32 %v510_v30, %v502_v27 }
 0x3be   :  { %1967 = vtanh.f32 %v2238_v31 }
 0x3c4   :  { %v1968_v32 = vpop.eup %1967 }
 0x3c5   :  { %515 = vrot.lane.b32.xlu2 %v1968_v32, %s2070_s1 }
 0x3ed   :  { %v593_v35 = vpop.permute.xlu1 %592 }
 0x3ee   :  { %v2243_v37 = vadd.f32 %v593_v35, %v585_v34 }
 0x3f0   :  { %1969 = vtanh.f32 %v2243_v37 }
 0x3f6   :  { %v1970_v40 = vpop.eup %1969 }
 0x3f7   :  { %598 = vrot.lane.b32.xlu0 %v1970_v40, %s2070_s1 }
 0x41f   :  { %v516_v42 = vpop.permute.xlu2 %515 }
 0x420   :  { %v518_v17 = vmul.f32 %v516_v42, %v499_v6 }
 0x422   :  { %v2247_v44 = vpack.c.bf16 %v518_v17, %v518_v17 }
 0x424   :  { %v615_v45 = vunpack.c.l.b16 %v2247_v44 }
 0x426   :  { %v616_v46 = vpack.c.b16 %v615_v45, %v615_v45 }
 0x428   :  { %617 = vrot.lane.b32.xlu1 %v616_v46, %s2069_s29 }
 0x469   :  { %v599_v48 = vpop.permute.xlu0 %598 }
 0x46a   :  { %v601_v49 = vmul.f32 %v599_v48, %v582_v25 }
 0x46c   :  { %v2257_v50 = vpack.c.bf16 %v601_v49, %v601_v49 }
 0x46e   :  { %v698_v51 = vunpack.c.l.b16 %v2257_v50 }
 0x470   :  { %v699_v52 = vpack.c.b16 %v698_v51, %v698_v51 }
 0x472   :  { %700 = vrot.lane.b32.xlu2 %v699_v52, %s2069_s29 }
 0x49a   :  { %v618_v56 = vpop.permute.xlu1 %617 }
 0x49b   :  { %1766 = vmatmul.msk.bf16.vlgmr.msra.gmra.mxu2 %vm72_vm0, %v618_v56 }
 0x4cc   :  { %v701_v57 = vpop.permute.xlu2 %700 }
 0x4cd   :  { %1777 = vmatmul.msk.bf16.vlgmr.msra.gmra.mxu3 %vm72_vm0, %v701_v57 }
 0x51e   :  { %v643_v60 = vpop.f32.mrf.mxu2 }
 0x51f   :  { %v647_v61 = vadd.f32 %v643_v60, %v161_v59 }
 0x521   :  { %1971 = vtanh.f32 %v647_v61  ;;  %v1767_v43 = vmul.f32 -1.442695, %v647_v61 }
 0x526   :  { %v645_v62 = vpop.f32.mrf.mxu2 }
 0x527   :  { %v1972_v63 = vpop.eup %1971 }
 0x528   :  { %670 = vrot.lane.b32.xlu0 %v1972_v63, %s2070_s1 }
 0x550   :  { %v726_v0 = vpop.f32.mrf.mxu3 }
 0x551   :  { %v730_v1 = vadd.f32 %v726_v0, %v2194_v41  ;;  %v1916_v0 = vld [vmem:[%s2606_s5 + $0x8] sm:$0xff] }
 0x552   :  { %889 = vmatpush.bf16.msrb.mxu3 %v1916_v0 }
 0x553   :  { %1973 = vtanh.f32 %v730_v1  ;;  %v1778_v18 = vmul.f32 -1.442695, %v730_v1  ;;  %v1915_v1 = vld [vmem:[%s2606_s5] sm:$0xff] }
 0x554   :  { %1975 = vpow2.f32 %v1767_v43  ;;  %v162_v43 = vpop.f32.mrf.mxu0 }
 0x556   :  { %890 = vmatpush.bf16.msrb.mxu3 %v1915_v1 }
 0x558   :  { %v728_v2 = vpop.f32.mrf.mxu3 }
 0x559   :  { %v1974_v3 = vpop.eup %1973 }
 0x55a   :  { %753 = vrot.lane.b32.xlu1 %v1974_v3, %s2070_s1  ;;  %v1976_v4 = vpop.eup %1975 }
 0x55b   :  { %v651_v5 = vadd.f32 1.0, %v1976_v4  ;;  %v163_v4 = vadd.f32 %v2180_v22, %v162_v43 }
 0x55d   :  { %1977 = vrcp.f32 %v651_v5  ;;  %v663_v11 = vand.u32 2147483648, %v651_v5  ;;  %vm657_vm3 = vweird.f32 %v651_v5  ;;  %v661_v12 = vand.u32 2147483647, %v651_v5 }
 0x55e   :  { %1979 = vpow2.f32 %v1778_v18 }
 0x55f   :  { %v664_v13 = vor.u32 1.1754944e-38, %v663_v11  ;;  %vm662_vm5 = vcmp.eq.f32.partialorder %v661_v12, 8.507059e+37 }
 0x563   :  { %v1978_v6 = vpop.eup %1977 }
 0x564   :  { %v653_v7 = vmul.f32 %v1978_v6, %v651_v5  ;;  %vm658_vm2 = vweird.f32 %v1978_v6  ;;  %v1980_v19 = vpop.eup %1979 }
 0x565   :  { %vm659_vm4 = vmor %vm657_vm3, %vm658_vm2  ;;  %v734_v20 = vadd.f32 1.0, %v1980_v19 }
 0x566   :  { %v654_v8 = vsub.f32 1.0, %v653_v7 }
 0x567   :  { %1981 = vrcp.f32 %v734_v20  ;;  %v746_v32 = vand.u32 2147483648, %v734_v20  ;;  %vm740_vm7 = vweird.f32 %v734_v20  ;;  %v744_v34 = vand.u32 2147483647, %v734_v20 }
 0x568   :  { %v655_v9 = vmul.f32 %v1978_v6, %v654_v8 }
 0x569   :  { %v747_v40 = vor.u32 1.1754944e-38, %v746_v32  ;;  %vm745_vm9 = vcmp.eq.f32.partialorder %v744_v34, 8.507059e+37 }
 0x56a   :  { %v656_v10 = vadd.f32 %v1978_v6, %v655_v9 }
 0x56c   :  { %v660_v41 = vsel %vm659_vm4, %v1978_v6, %v656_v10 }
 0x56d   :  { %v665_v14 = vsel %vm662_vm5, %v664_v13, %v660_v41  ;;  %v1982_v21 = vpop.eup %1981 }
 0x56e   :  { %v736_v25 = vmul.f32 %v1982_v21, %v734_v20  ;;  %vm741_vm6 = vweird.f32 %v1982_v21  ;;  %v668_v46 = vmul.f32 %v665_v14, %v2238_v31 }
 0x56f   :  { %vm742_vm8 = vmor %vm740_vm7, %vm741_vm6 }
 0x570   :  { %v737_v26 = vsub.f32 1.0, %v736_v25 }
 0x572   :  { %v738_v27 = vmul.f32 %v1982_v21, %v737_v26 }
 0x574   :  { %v739_v30 = vadd.f32 %v1982_v21, %v738_v27 }
 0x576   :  { %v743_v35 = vsel %vm742_vm8, %v1982_v21, %v739_v30 }
 0x577   :  { %v748_v17 = vsel %vm745_vm9, %v747_v40, %v743_v35 }
 0x578   :  { %v751_v49 = vmul.f32 %v748_v17, %v2243_v37  ;;  %v1914_v37 = vld [vmem:[%s2601_s4 + $0x8] sm:$0xff] }
 0x579   :  { %806 = vmatpush.bf16.msrb.mxu2 %v1914_v37 }
 0x57d   :  { %807 = vmatpush.bf16.msrb.mxu2 %v1913_v58 }
 0x59a   :  { %v671_v15 = vpop.permute.xlu0 %670 }
 0x59b   :  { %v673_v16 = vmul.f32 %v671_v15, %v665_v14 }
 0x59d   :  { %675 = vrot.lane.b32.xlu2 %v673_v16, %s2069_s29 }
 0x5cc   :  { %v754_v42 = vpop.permute.xlu1 %753 }
 0x5cd   :  { %v756_v45 = vmul.f32 %v754_v42, %v748_v17 }
 0x5cf   :  { %758 = vrot.lane.b32.xlu0 %v756_v45, %s2069_s29 }
 0x5f7   :  { %v676_v24 = vpop.permute.xlu2 %675 }
 0x5f8   :  { %v2280_v47 = vadd.f32 %v676_v24, %v668_v46 }
 0x5fa   :  { %1983 = vtanh.f32 %v2280_v47 }
 0x600   :  { %v1984_v48 = vpop.eup %1983 }
 0x601   :  { %681 = vrot.lane.b32.xlu1 %v1984_v48, %s2070_s1 }
 0x641   :  { %v759_v51 = vpop.permute.xlu0 %758 }
 0x642   :  { %v2285_v52 = vadd.f32 %v759_v51, %v751_v49 }
 0x644   :  { %1985 = vtanh.f32 %v2285_v52 }
 0x64a   :  { %v1986_v53 = vpop.eup %1985 }
 0x64b   :  { %764 = vrot.lane.b32.xlu2 %v1986_v53, %s2070_s1 }
 0x673   :  { %v682_v54 = vpop.permute.xlu1 %681 }
 0x674   :  { %v684_v31 = vmul.f32 %v682_v54, %v665_v14 }
 0x676   :  { %v2289_v55 = vpack.c.bf16 %v684_v31, %v684_v31 }
 0x678   :  { %v781_v56 = vunpack.c.l.b16 %v2289_v55 }
 0x67a   :  { %v782_v57 = vpack.c.b16 %v781_v56, %v781_v56 }
 0x67c   :  { %783 = vrot.lane.b32.xlu0 %v782_v57, %s2069_s29 }
 0x6a5   :  { %v765_v59 = vpop.permute.xlu2 %764 }
 0x6a6   :  { %v767_v60 = vmul.f32 %v765_v59, %v748_v17 }
 0x6a8   :  { %v2299_v61 = vpack.c.bf16 %v767_v60, %v767_v60 }
 0x6aa   :  { %v864_v62 = vunpack.c.l.b16 %v2299_v61 }
 0x6ac   :  { %v865_v63 = vpack.c.b16 %v864_v62, %v864_v62 }
 0x6ae   :  { %866 = vrot.lane.b32.xlu1 %v865_v63, %s2069_s29 }
 0x6ee   :  { %v784_v2 = vpop.permute.xlu0 %783 }
 0x6ef   :  { %1788 = vmatmul.msk.bf16.vlgmr.msrb.gmra.mxu2 %vm72_vm0, %v784_v2 }
 0x720   :  { %v867_v3 = vpop.permute.xlu1 %866 }
 0x721   :  { %1799 = vmatmul.msk.bf16.vlgmr.msrb.gmra.mxu3 %vm72_vm0, %v867_v3 }
 0x772   :  { %v809_v5 = vpop.f32.mrf.mxu2 }
 0x773   :  { %v813_v6 = vadd.f32 %v809_v5, %v163_v4  ;;  %v1918_v4 = vld [vmem:[%s2601_s4 + $0x8] sm:$0xff]  ;;  %v1917_v5 = vld [vmem:[%s2601_s4] sm:$0xff] }
 0x774   :  { %972 = vmatpush.bf16.msrb.mxu0 %v1918_v4 }
 0x775   :  { %1987 = vtanh.f32 %v813_v6  ;;  %v1789_v11 = vmul.f32 -1.442695, %v813_v6  ;;  %v1892_v6 = vld [vmem:[%s2605_s0 + $0x18] sm:$0xff] }
 0x778   :  { %973 = vmatpush.bf16.msrb.mxu0 %v1917_v5 }
 0x77a   :  { %v811_v7 = vpop.f32.mrf.mxu2 }
 0x77b   :  { %v1988_v8 = vpop.eup %1987 }
 0x77c   :  { %836 = vrot.lane.b32.xlu2 %v1988_v8, %s2070_s1 }
 0x7a4   :  { %v892_v9 = vpop.f32.mrf.mxu3 }
 0x7a5   :  { %v896_v10 = vadd.f32 %v892_v9, %v2192_v39 }
 0x7a7   :  { %1989 = vtanh.f32 %v896_v10  ;;  %v1800_v34 = vmul.f32 -1.442695, %v896_v10 }
 0x7a8   :  { %1991 = vpow2.f32 %v1789_v11 }
 0x7ac   :  { %v894_v12 = vpop.f32.mrf.mxu3 }
 0x7ad   :  { %v1990_v41 = vpop.eup %1989  ;;  %v1920_v12 = vld [vmem:[%s2606_s5 + $0x8] sm:$0xff] }
 0x7ae   :  { %919 = vrot.lane.b32.xlu0 %v1990_v41, %s2070_s1  ;;  %v1992_v13 = vpop.eup %1991  ;;  %1055 = vmatpush.bf16.msrb.mxu1 %v1920_v12  ;;  %v1919_v41 = vld [vmem:[%s2606_s5] sm:$0xff] }
 0x7af   :  { %v817_v14 = vadd.f32 1.0, %v1992_v13 }
 0x7b1   :  { %1993 = vrcp.f32 %v817_v14  ;;  %v829_v21 = vand.u32 2147483648, %v817_v14  ;;  %vm823_vm11 = vweird.f32 %v817_v14  ;;  %v827_v25 = vand.u32 2147483647, %v817_v14 }
 0x7b2   :  { %1995 = vpow2.f32 %v1800_v34  ;;  %1056 = vmatpush.bf16.msrb.mxu1 %v1919_v41 }
 0x7b3   :  { %v830_v26 = vor.u32 1.1754944e-38, %v829_v21  ;;  %vm828_vm13 = vcmp.eq.f32.partialorder %v827_v25, 8.507059e+37 }
 0x7b7   :  { %v1994_v15 = vpop.eup %1993 }
 0x7b8   :  { %v819_v16 = vmul.f32 %v1994_v15, %v817_v14  ;;  %vm824_vm10 = vweird.f32 %v1994_v15  ;;  %v1996_v35 = vpop.eup %1995 }
 0x7b9   :  { %vm825_vm12 = vmor %vm823_vm11, %vm824_vm10  ;;  %v900_v40 = vadd.f32 1.0, %v1996_v35 }
 0x7ba   :  { %v820_v18 = vsub.f32 1.0, %v819_v16 }
 0x7bb   :  { %1997 = vrcp.f32 %v900_v40  ;;  %v912_v48 = vand.u32 2147483648, %v900_v40  ;;  %vm906_vm15 = vweird.f32 %v900_v40  ;;  %v910_v49 = vand.u32 2147483647, %v900_v40 }
 0x7bc   :  { %v821_v19 = vmul.f32 %v1994_v15, %v820_v18 }
 0x7bd   :  { %v913_v53 = vor.u32 1.1754944e-38, %v912_v48  ;;  %vm911_vm2 = vcmp.eq.f32.partialorder %v910_v49, 8.507059e+37 }
 0x7be   :  { %v822_v20 = vadd.f32 %v1994_v15, %v821_v19 }
 0x7c0   :  { %v826_v39 = vsel %vm825_vm12, %v1994_v15, %v822_v20 }
 0x7c1   :  { %v831_v30 = vsel %vm828_vm13, %v830_v26, %v826_v39  ;;  %v1998_v42 = vpop.eup %1997 }
 0x7c2   :  { %v902_v17 = vmul.f32 %v1998_v42, %v900_v40  ;;  %vm907_vm14 = vweird.f32 %v1998_v42  ;;  %v834_v57 = vmul.f32 %v831_v30, %v2280_v47 }
 0x7c3   :  { %vm908_vm1 = vmor %vm906_vm15, %vm907_vm14 }
 0x7c4   :  { %v903_v45 = vsub.f32 1.0, %v902_v17 }
 0x7c6   :  { %v904_v46 = vmul.f32 %v1998_v42, %v903_v45 }
 0x7c8   :  { %v905_v24 = vadd.f32 %v1998_v42, %v904_v46 }
 0x7ca   :  { %v909_v51 = vsel %vm908_vm1, %v1998_v42, %v905_v24 }
 0x7cb   :  { %v914_v54 = vsel %vm911_vm2, %v913_v53, %v909_v51 }
 0x7cc   :  { %v917_v60 = vmul.f32 %v914_v54, %v2285_v52  ;;  %v1891_v52 = vld [vmem:[%s2605_s0 + $0x10] sm:$0xff] }
 0x7cd   :  { %1685 = vmatmul.msk.bf16.gmra.mxu0 %vm72_vm0, %v1891_v52 }
 0x7d6   :  { %v837_v27 = vpop.permute.xlu2 %836 }
 0x7d7   :  { %v839_v32 = vmul.f32 %v837_v27, %v831_v30 }
 0x7d9   :  { %841 = vrot.lane.b32.xlu1 %v839_v32, %s2069_s29 }
 0x7dd   :  { %1686 = vmatmul.msk.bf16.gmra.mxu0 %vm72_vm0, %v1892_v6 }
 0x820   :  { %v920_v31 = vpop.permute.xlu0 %919 }
 0x821   :  { %v922_v56 = vmul.f32 %v920_v31, %v914_v54 }
 0x823   :  { %924 = vrot.lane.b32.xlu2 %v922_v56, %s2069_s29 }
 0x84a   :  { %v165_v15 = vpop.f32.mrf.mxu0 }
 0x84b   :  { %v842_v37 = vpop.permute.xlu1 %841  ;;  %v166_v20 = vadd.f32 %v2180_v22, %v165_v15 }
 0x84c   :  { %v2318_v58 = vadd.f32 %v842_v37, %v834_v57 }
 0x84e   :  { %1999 = vtanh.f32 %v2318_v58 }
 0x852   :  { %v2357_v16 = vpop.f32.mrf.mxu0 }
 0x854   :  { %v2000_v59 = vpop.eup %1999 }
 0x855   :  { %847 = vrot.lane.b32.xlu0 %v2000_v59, %s2070_s1 }
 0x85a   :  { %v2359_v18 = vpop.f32.mrf.mxu0 }
 0x862   :  { %v2361_v19 = vpop.f32.mrf.mxu0 }
 0x87d   :  { %v925_v62 = vpop.permute.xlu2 %924 }
 0x87e   :  { %v2323_v63 = vadd.f32 %v925_v62, %v917_v60 }
 0x880   :  { %2001 = vtanh.f32 %v2323_v63 }
 0x886   :  { %v2002_v0 = vpop.eup %2001 }
 0x887   :  { %930 = vrot.lane.b32.xlu1 %v2002_v0, %s2070_s1 }
 0x8c7   :  { %v848_v1 = vpop.permute.xlu0 %847 }
 0x8c8   :  { %v850_v47 = vmul.f32 %v848_v1, %v831_v30 }
 0x8ca   :  { %v2327_v2 = vpack.c.bf16 %v850_v47, %v850_v47 }
 0x8cc   :  { %v947_v3 = vunpack.c.l.b16 %v2327_v2 }
 0x8ce   :  { %v948_v43 = vpack.c.b16 %v947_v3, %v947_v3 }
 0x8d0   :  { %949 = vrot.lane.b32.xlu2 %v948_v43, %s2069_s29 }
 0x8f9   :  { %v931_v7 = vpop.permute.xlu1 %930 }
 0x8fa   :  { %v933_v8 = vmul.f32 %v931_v7, %v914_v54 }
 0x8fc   :  { %v2345_v9 = vpack.c.bf16 %v933_v8, %v933_v8 }
 0x8fe   :  { %v1030_v10 = vunpack.c.l.b16 %v2345_v9 }
 0x900   :  { %v1031_v11 = vpack.c.b16 %v1030_v10, %v1030_v10 }
 0x902   :  { %1032 = vrot.lane.b32.xlu0 %v1031_v11, %s2069_s29 }
 0x92a   :  { %v950_v13 = vpop.permute.xlu2 %949 }
 0x92b   :  { %1810 = vmatmul.msk.bf16.vlgmr.msrb.gmra.mxu0 %vm72_vm0, %v950_v13 }
 0x974   :  { %v1033_v14 = vpop.permute.xlu0 %1032 }
 0x975   :  { %1821 = vmatmul.msk.bf16.vlgmr.msrb.gmra.mxu1 %vm72_vm0, %v1033_v14 }
 0x9a8   :  { %v975_v21 = vpop.f32.mrf.mxu0 }
 0x9a9   :  { %v979_v25 = vadd.f32 %v975_v21, %v166_v20 }
 0x9ab   :  { %2003 = vtanh.f32 %v979_v25  ;;  %v1811_v32 = vmul.f32 -1.442695, %v979_v25 }
 0x9b0   :  { %v977_v39 = vpop.f32.mrf.mxu0 }
 0x9b1   :  { %v2004_v26 = vpop.eup %2003 }
 0x9b2   :  { %1002 = vrot.lane.b32.xlu1 %v2004_v26, %s2070_s1  ;;  %v1921_v26 = vld [vmem:[%s2601_s4] sm:$0xff] }
 0x9f2   :  { %v1058_v27 = vpop.f32.mrf.mxu1 }
 0x9f3   :  { %v1062_v30 = vadd.f32 %v1058_v27, %v2190_v36 }
 0x9f5   :  { %2005 = vtanh.f32 %v1062_v30  ;;  %v1822_v57 = vmul.f32 -1.442695, %v1062_v30 }
 0x9f6   :  { %2007 = vpow2.f32 %v1811_v32 }
 0x9fa   :  { %v1060_v34 = vpop.f32.mrf.mxu1 }
 0x9fb   :  { %v2006_v35 = vpop.eup %2005 }
 0x9fc   :  { %1085 = vrot.lane.b32.xlu2 %v2006_v35, %s2070_s1  ;;  %v2008_v40 = vpop.eup %2007 }
 0x9fd   :  { %v983_v42 = vadd.f32 1.0, %v2008_v40  ;;  %v1924_v40 = vld [vmem:[%s2606_s5 + $0x8] sm:$0xff] }
 0x9fe   :  { %1221 = vmatpush.bf16.msra.mxu3 %v1924_v40 }
 0x9ff   :  { %2009 = vrcp.f32 %v983_v42  ;;  %v995_v49 = vand.u32 2147483648, %v983_v42  ;;  %vm989_vm4 = vweird.f32 %v983_v42  ;;  %v993_v51 = vand.u32 2147483647, %v983_v42 }
 0xa00   :  { %2011 = vpow2.f32 %v1822_v57 }
 0xa01   :  { %v996_v53 = vor.u32 1.1754944e-38, %v995_v49  ;;  %vm994_vm6 = vcmp.eq.f32.partialorder %v993_v51, 8.507059e+37 }
 0xa05   :  { %v2010_v17 = vpop.eup %2009 }
 0xa06   :  { %v985_v45 = vmul.f32 %v2010_v17, %v983_v42  ;;  %vm990_vm3 = vweird.f32 %v2010_v17  ;;  %v2012_v37 = vpop.eup %2011  ;;  %v1923_v42 = vld [vmem:[%s2606_s5] sm:$0xff] }
 0xa07   :  { %vm991_vm5 = vmor %vm989_vm4, %vm990_vm3  ;;  %v1066_v59 = vadd.f32 1.0, %v2012_v37  ;;  %1222 = vmatpush.bf16.msra.mxu3 %v1923_v42 }
 0xa08   :  { %v986_v46 = vsub.f32 1.0, %v985_v45 }
 0xa09   :  { %2013 = vrcp.f32 %v1066_v59  ;;  %v1078_v3 = vand.u32 2147483648, %v1066_v59  ;;  %vm1072_vm8 = vweird.f32 %v1066_v59  ;;  %v1076_v43 = vand.u32 2147483647, %v1066_v59 }
 0xa0a   :  { %v987_v24 = vmul.f32 %v2010_v17, %v986_v46  ;;  %v168_v46 = vadd.f32 %v2180_v22, %v2357_v16 }
 0xa0b   :  { %v1079_v4 = vor.u32 1.1754944e-38, %v1078_v3  ;;  %vm1077_vm10 = vcmp.eq.f32.partialorder %v1076_v43, 8.507059e+37 }
 0xa0c   :  { %v988_v48 = vadd.f32 %v2010_v17, %v987_v24 }
 0xa0e   :  { %v992_v36 = vsel %vm991_vm5, %v2010_v17, %v988_v48 }
 0xa0f   :  { %v997_v31 = vsel %vm994_vm6, %v996_v53, %v992_v36  ;;  %v2014_v60 = vpop.eup %2013 }
 0xa10   :  { %v1068_v62 = vmul.f32 %v2014_v60, %v1066_v59  ;;  %vm1073_vm7 = vweird.f32 %v2014_v60  ;;  %v1000_v8 = vmul.f32 %v997_v31, %v2318_v58 }
 0xa11   :  { %vm1074_vm9 = vmor %vm1072_vm8, %vm1073_vm7 }
 0xa12   :  { %v1069_v0 = vsub.f32 1.0, %v1068_v62 }
 0xa14   :  { %v1070_v1 = vmul.f32 %v2014_v60, %v1069_v0 }
 0xa16   :  { %v1071_v47 = vadd.f32 %v2014_v60, %v1070_v1 }
 0xa18   :  { %v1075_v52 = vsel %vm1074_vm9, %v2014_v60, %v1071_v47 }
 0xa19   :  { %v1080_v6 = vsel %vm1077_vm10, %v1079_v4, %v1075_v52 }
 0xa1a   :  { %v1083_v41 = vmul.f32 %v1080_v6, %v2323_v63  ;;  %v1922_v63 = vld [vmem:[%s2601_s4 + $0x8] sm:$0xff] }
 0xa1b   :  { %1138 = vmatpush.bf16.msra.mxu2 %v1922_v63 }
 0xa1f   :  { %1139 = vmatpush.bf16.msra.mxu2 %v1921_v26 }
 0xa24   :  { %v1003_v54 = vpop.permute.xlu1 %1002 }
 0xa25   :  { %v1005_v56 = vmul.f32 %v1003_v54, %v997_v31 }
 0xa27   :  { %1007 = vrot.lane.b32.xlu0 %v1005_v56, %s2069_s29 }
 0xa56   :  { %v1086_v5 = vpop.permute.xlu2 %1085 }
 0xa57   :  { %v1088_v7 = vmul.f32 %v1086_v5, %v1080_v6 }
 0xa59   :  { %1090 = vrot.lane.b32.xlu1 %v1088_v7, %s2069_s29 }
 0xa99   :  { %v1008_v10 = vpop.permute.xlu0 %1007 }
 0xa9a   :  { %v2370_v11 = vadd.f32 %v1008_v10, %v1000_v8 }
 0xa9c   :  { %2015 = vtanh.f32 %v2370_v11 }
 0xaa2   :  { %v2016_v12 = vpop.eup %2015 }
 0xaa3   :  { %1013 = vrot.lane.b32.xlu2 %v2016_v12, %s2070_s1 }
 0xacb   :  { %v1091_v13 = vpop.permute.xlu1 %1090 }
 0xacc   :  { %v2375_v14 = vadd.f32 %v1091_v13, %v1083_v41 }
 0xace   :  { %2017 = vtanh.f32 %v2375_v14 }
 0xad4   :  { %v2018_v15 = vpop.eup %2017 }
 0xad5   :  { %1096 = vrot.lane.b32.xlu0 %v2018_v15, %s2070_s1 }
 0xafd   :  { %v1014_v20 = vpop.permute.xlu2 %1013 }
 0xafe   :  { %v1016_v58 = vmul.f32 %v1014_v20, %v997_v31 }
 0xb00   :  { %v2379_v21 = vpack.c.bf16 %v1016_v58, %v1016_v58 }
 0xb02   :  { %v1113_v25 = vunpack.c.l.b16 %v2379_v21 }
 0xb04   :  { %v1114_v39 = vpack.c.b16 %v1113_v25, %v1113_v25 }
 0xb06   :  { %1115 = vrot.lane.b32.xlu1 %v1114_v39, %s2069_s29 }
 0xb47   :  { %v1097_v27 = vpop.permute.xlu0 %1096 }
 0xb48   :  { %v1099_v30 = vmul.f32 %v1097_v27, %v1080_v6 }
 0xb4a   :  { %v2389_v32 = vpack.c.bf16 %v1099_v30, %v1099_v30 }
 0xb4c   :  { %v1196_v34 = vunpack.c.l.b16 %v2389_v32 }
 0xb4e   :  { %v1197_v35 = vpack.c.b16 %v1196_v34, %v1196_v34 }
 0xb50   :  { %1198 = vrot.lane.b32.xlu2 %v1197_v35, %s2069_s29 }
 0xb78   :  { %v1116_v17 = vpop.permute.xlu1 %1115 }
 0xb79   :  { %1832 = vmatmul.msk.bf16.vlgmr.msra.gmra.mxu2 %vm72_vm0, %v1116_v17 }
 0xbaa   :  { %v1199_v45 = vpop.permute.xlu2 %1198 }
 0xbab   :  { %1843 = vmatmul.msk.bf16.vlgmr.msra.gmra.mxu3 %vm72_vm0, %v1199_v45 }
 0xbfc   :  { %v1141_v24 = vpop.f32.mrf.mxu2 }
 0xbfd   :  { %v1145_v48 = vadd.f32 %v1141_v24, %v168_v46 }
 0xbff   :  { %2019 = vtanh.f32 %v1145_v48  ;;  %v1833_v56 = vmul.f32 -1.442695, %v1145_v48 }
 0xc04   :  { %v1143_v49 = vpop.f32.mrf.mxu2 }
 0xc05   :  { %v2020_v51 = vpop.eup %2019  ;;  %v1925_v49 = vld [vmem:[%s2601_s4] sm:$0xff] }
 0xc06   :  { %1168 = vrot.lane.b32.xlu0 %v2020_v51, %s2070_s1 }
 0xc2e   :  { %v1224_v36 = vpop.f32.mrf.mxu3 }
 0xc2f   :  { %v1228_v53 = vadd.f32 %v1224_v36, %v2187_v33 }
 0xc31   :  { %2021 = vtanh.f32 %v1228_v53  ;;  %v1844_v4 = vmul.f32 -1.442695, %v1228_v53 }
 0xc32   :  { %2023 = vpow2.f32 %v1833_v56  ;;  %v1928_v56 = vld [vmem:[%s2606_s5 + $0x8] sm:$0xff] }
 0xc33   :  { %1387 = vmatpush.bf16.msra.mxu1 %v1928_v56 }
 0xc36   :  { %v1226_v54 = vpop.f32.mrf.mxu3 }
 0xc37   :  { %v2022_v31 = vpop.eup %2021 }
 0xc38   :  { %1251 = vrot.lane.b32.xlu1 %v2022_v31, %s2070_s1  ;;  %v2024_v57 = vpop.eup %2023 }
 0xc39   :  { %v1149_v37 = vadd.f32 1.0, %v2024_v57  ;;  %v1927_v57 = vld [vmem:[%s2606_s5] sm:$0xff] }
 0xc3a   :  { %1388 = vmatpush.bf16.msra.mxu1 %v1927_v57 }
 0xc3b   :  { %2025 = vrcp.f32 %v1149_v37  ;;  %v1161_v0 = vand.u32 2147483648, %v1149_v37  ;;  %vm1155_vm12 = vweird.f32 %v1149_v37  ;;  %v1159_v1 = vand.u32 2147483647, %v1149_v37 }
 0xc3c   :  { %2027 = vpow2.f32 %v1844_v4 }
 0xc3d   :  { %v1162_v47 = vor.u32 1.1754944e-38, %v1161_v0  ;;  %vm1160_vm14 = vcmp.eq.f32.partialorder %v1159_v1, 8.507059e+37 }
 0xc41   :  { %v2026_v22 = vpop.eup %2025 }
 0xc42   :  { %v1151_v16 = vmul.f32 %v2026_v22, %v1149_v37  ;;  %vm1156_vm11 = vweird.f32 %v2026_v22  ;;  %v2028_v5 = vpop.eup %2027 }
 0xc43   :  { %vm1157_vm13 = vmor %vm1155_vm12, %vm1156_vm11  ;;  %v1232_v6 = vadd.f32 1.0, %v2028_v5 }
 0xc44   :  { %v1152_v59 = vsub.f32 1.0, %v1151_v16  ;;  %v2443_v16 = vld [vmem:[%s2607_s6] ss:$0 sm:$0xff] }
 0xc45   :  { %2029 = vrcp.f32 %v1232_v6  ;;  %v1244_v13 = vand.u32 2147483648, %v1232_v6  ;;  %vm1238_vm1 = vweird.f32 %v1232_v6  ;;  %v1242_v15 = vand.u32 2147483647, %v1232_v6 }
 0xc46   :  { %v1153_v60 = vmul.f32 %v2026_v22, %v1152_v59  ;;  %v171_v59 = vadd.f32 %v2443_v16, %v2359_v18 }
 0xc47   :  { %v1245_v58 = vor.u32 1.1754944e-38, %v1244_v13  ;;  %vm1243_vm3 = vcmp.eq.f32.partialorder %v1242_v15, 8.507059e+37 }
 0xc48   :  { %v1154_v62 = vadd.f32 %v2026_v22, %v1153_v60 }
 0xc4a   :  { %v1158_v33 = vsel %vm1157_vm13, %v2026_v22, %v1154_v62 }
 0xc4b   :  { %v1163_v3 = vsel %vm1160_vm14, %v1162_v47, %v1158_v33  ;;  %v2030_v7 = vpop.eup %2029 }
 0xc4c   :  { %v1234_v8 = vmul.f32 %v2030_v7, %v1232_v6  ;;  %vm1239_vm15 = vweird.f32 %v2030_v7  ;;  %v1166_v26 = vmul.f32 %v1163_v3, %v2370_v11 }
 0xc4d   :  { %vm1240_vm2 = vmor %vm1238_vm1, %vm1239_vm15 }
 0xc4e   :  { %v1235_v10 = vsub.f32 1.0, %v1234_v8 }
 0xc50   :  { %v1236_v12 = vmul.f32 %v2030_v7, %v1235_v10 }
 0xc52   :  { %v1237_v41 = vadd.f32 %v2030_v7, %v1236_v12 }
 0xc54   :  { %v1241_v20 = vsel %vm1240_vm2, %v2030_v7, %v1237_v41 }
 0xc55   :  { %v1246_v39 = vsel %vm1243_vm3, %v1245_v58, %v1241_v20 }
 0xc56   :  { %v1249_v35 = vmul.f32 %v1246_v39, %v2375_v14  ;;  %v1926_v14 = vld [vmem:[%s2601_s4 + $0x8] sm:$0xff] }
 0xc57   :  { %1304 = vmatpush.bf16.msra.mxu0 %v1926_v14 }
 0xc5b   :  { %1305 = vmatpush.bf16.msra.mxu0 %v1925_v49 }
 0xc78   :  { %v1169_v43 = vpop.permute.xlu0 %1168 }
 0xc79   :  { %v1171_v52 = vmul.f32 %v1169_v43, %v1163_v3 }
 0xc7b   :  { %1173 = vrot.lane.b32.xlu2 %v1171_v52, %s2069_s29 }
 0xcaa   :  { %v1252_v25 = vpop.permute.xlu1 %1251 }
 0xcab   :  { %v1254_v63 = vmul.f32 %v1252_v25, %v1246_v39 }
 0xcad   :  { %1256 = vrot.lane.b32.xlu0 %v1254_v63, %s2069_s29 }
 0xcd5   :  { %v1174_v27 = vpop.permute.xlu2 %1173 }
 0xcd6   :  { %v2409_v30 = vadd.f32 %v1174_v27, %v1166_v26 }
 0xcd8   :  { %2031 = vtanh.f32 %v2409_v30 }
 0xcde   :  { %v2032_v34 = vpop.eup %2031 }
 0xcdf   :  { %1179 = vrot.lane.b32.xlu1 %v2032_v34, %s2070_s1 }
 0xd1f   :  { %v1257_v40 = vpop.permute.xlu0 %1256 }
 0xd20   :  { %v2414_v42 = vadd.f32 %v1257_v40, %v1249_v35 }
 0xd22   :  { %2033 = vtanh.f32 %v2414_v42 }
 0xd28   :  { %v2034_v17 = vpop.eup %2033 }
 0xd29   :  { %1262 = vrot.lane.b32.xlu2 %v2034_v17, %s2070_s1 }
 0xd51   :  { %v1180_v45 = vpop.permute.xlu1 %1179 }
 0xd52   :  { %v1182_v11 = vmul.f32 %v1180_v45, %v1163_v3 }
 0xd54   :  { %v2418_v46 = vpack.c.bf16 %v1182_v11, %v1182_v11 }
 0xd56   :  { %v1279_v24 = vunpack.c.l.b16 %v2418_v46 }
 0xd58   :  { %v1280_v48 = vpack.c.b16 %v1279_v24, %v1279_v24 }
 0xd5a   :  { %1281 = vrot.lane.b32.xlu0 %v1280_v48, %s2069_s29 }
 0xd83   :  { %v1263_v51 = vpop.permute.xlu2 %1262 }
 0xd84   :  { %v1265_v36 = vmul.f32 %v1263_v51, %v1246_v39 }
 0xd86   :  { %v2428_v53 = vpack.c.bf16 %v1265_v36, %v1265_v36 }
 0xd88   :  { %v1362_v54 = vunpack.c.l.b16 %v2428_v53 }
 0xd8a   :  { %v1363_v31 = vpack.c.b16 %v1362_v54, %v1362_v54 }
 0xd8c   :  { %1364 = vrot.lane.b32.xlu1 %v1363_v31, %s2069_s29 }
 0xdcc   :  { %v1282_v37 = vpop.permute.xlu0 %1281 }
 0xdcd   :  { %1854 = vmatmul.msk.bf16.vlgmr.msra.gmra.mxu0 %vm72_vm0, %v1282_v37 }
 0xdfe   :  { %v1365_v22 = vpop.permute.xlu1 %1364 }
 0xdff   :  { %1865 = vmatmul.msk.bf16.vlgmr.msra.gmra.mxu1 %vm72_vm0, %v1365_v22 }
 0xe4a   :  { %v1307_v60 = vpop.f32.mrf.mxu0 }
 0xe4b   :  { %v1311_v62 = vadd.f32 %v1307_v60, %v171_v59 }
 0xe4d   :  { %2035 = vtanh.f32 %v1311_v62  ;;  %v1855_v3 = vmul.f32 -1.442695, %v1311_v62 }
 0xe52   :  { %v1309_v0 = vpop.f32.mrf.mxu0 }
 0xe53   :  { %v2036_v1 = vpop.eup %2035 }
 0xe54   :  { %1334 = vrot.lane.b32.xlu2 %v2036_v1, %s2070_s1  ;;  %v1929_v1 = vld [vmem:[%s2601_s4] sm:$0xff] }
 0xe7c   :  { %v1390_v33 = vpop.f32.mrf.mxu1 }
 0xe7d   :  { %v1394_v47 = vadd.f32 %v1390_v33, %v2185_v29 }
 0xe7f   :  { %2037 = vtanh.f32 %v1394_v47  ;;  %v1866_v25 = vmul.f32 -1.442695, %v1394_v47 }
 0xe80   :  { %2039 = vpow2.f32 %v1855_v3 }
 0xe84   :  { %v1392_v43 = vpop.f32.mrf.mxu1 }
 0xe85   :  { %v2038_v52 = vpop.eup %2037 }
 0xe86   :  { %1417 = vrot.lane.b32.xlu0 %v2038_v52, %s2070_s1  ;;  %v2040_v4 = vpop.eup %2039 }
 0xe87   :  { %v1315_v5 = vadd.f32 1.0, %v2040_v4  ;;  %v1932_v4 = vld [vmem:[%s2606_s5 + $0x8] sm:$0xff] }
 0xe88   :  { %1552 = vmatpush.bf16.msrb.mxu3 %v1932_v4 }
 0xe89   :  { %2041 = vrcp.f32 %v1315_v5  ;;  %v1327_v12 = vand.u32 2147483648, %v1315_v5  ;;  %vm1321_vm5 = vweird.f32 %v1315_v5  ;;  %v1325_v41 = vand.u32 2147483647, %v1315_v5 }
 0xe8a   :  { %2043 = vpow2.f32 %v1866_v25 }
 0xe8b   :  { %v1328_v13 = vor.u32 1.1754944e-38, %v1327_v12  ;;  %vm1326_vm7 = vcmp.eq.f32.partialorder %v1325_v41, 8.507059e+37 }
 0xe8f   :  { %v2042_v18 = vpop.eup %2041 }
 0xe90   :  { %v1317_v6 = vmul.f32 %v2042_v18, %v1315_v5  ;;  %vm1322_vm4 = vweird.f32 %v2042_v18  ;;  %v2044_v39 = vpop.eup %2043  ;;  %v1931_v5 = vld [vmem:[%s2606_s5] sm:$0xff] }
 0xe91   :  { %vm1323_vm6 = vmor %vm1321_vm5, %vm1322_vm4  ;;  %v1398_v63 = vadd.f32 1.0, %v2044_v39  ;;  %1553 = vmatpush.bf16.msrb.mxu3 %v1931_v5  ;;  %vm357_vm5 = vcmask 257024  }
 0xe92   :  { %v1318_v7 = vsub.f32 1.0, %v1317_v6 }
 0xe93   :  { %2045 = vrcp.f32 %v1398_v63  ;;  %v1410_v17 = vand.u32 2147483648, %v1398_v63  ;;  %vm1404_vm9 = vweird.f32 %v1398_v63  ;;  %v1408_v45 = vand.u32 2147483647, %v1398_v63 }
 0xe94   :  { %v1319_v8 = vmul.f32 %v2042_v18, %v1318_v7  ;;  %v173_v7 = vadd.f32 %v2443_v16, %v2361_v19 }
 0xe95   :  { %v1411_v24 = vor.u32 1.1754944e-38, %v1410_v17  ;;  %vm1409_vm11 = vcmp.eq.f32.partialorder %v1408_v45, 8.507059e+37 }
 0xe96   :  { %v1320_v10 = vadd.f32 %v2042_v18, %v1319_v8 }
 0xe98   :  { %v1324_v29 = vsel %vm1323_vm6, %v2042_v18, %v1320_v10 }
 0xe99   :  { %v1329_v20 = vsel %vm1326_vm7, %v1328_v13, %v1324_v29  ;;  %v2046_v26 = vpop.eup %2045 }
 0xe9a   :  { %v1400_v27 = vmul.f32 %v2046_v26, %v1398_v63  ;;  %vm1405_vm8 = vweird.f32 %v2046_v26  ;;  %v1332_v51 = vmul.f32 %v1329_v20, %v2409_v30 }
 0xe9b   :  { %vm1406_vm10 = vmor %vm1404_vm9, %vm1405_vm8 }
 0xe9c   :  { %v1401_v34 = vsub.f32 1.0, %v1400_v27 }
 0xe9e   :  { %v1402_v35 = vmul.f32 %v2046_v26, %v1401_v34 }
 0xea0   :  { %v1403_v40 = vadd.f32 %v2046_v26, %v1402_v35 }
 0xea2   :  { %v1407_v11 = vsel %vm1406_vm10, %v2046_v26, %v1403_v40 }
 0xea3   :  { %v1412_v48 = vsel %vm1409_vm11, %v1411_v24, %v1407_v11 }
 0xea4   :  { %v1415_v56 = vmul.f32 %v1412_v48, %v2414_v42  ;;  %v1930_v42 = vld [vmem:[%s2601_s4 + $0x8] sm:$0xff] }
 0xea5   :  { %1470 = vmatpush.bf16.msrb.mxu2 %v1930_v42 }
 0xea9   :  { %1471 = vmatpush.bf16.msrb.mxu2 %v1929_v1 }
 0xeae   :  { %v1335_v15 = vpop.permute.xlu2 %1334 }
 0xeaf   :  { %v1337_v58 = vmul.f32 %v1335_v15, %v1329_v20 }
 0xeb1   :  { %1339 = vrot.lane.b32.xlu1 %v1337_v58, %s2069_s29 }
 0xef8   :  { %v1418_v14 = vpop.permute.xlu0 %1417 }
 0xef9   :  { %v1420_v49 = vmul.f32 %v1418_v14, %v1412_v48 }
 0xefb   :  { %1422 = vrot.lane.b32.xlu2 %v1420_v49, %s2069_s29 }
 0xf23   :  { %v1340_v36 = vpop.permute.xlu1 %1339 }
 0xf24   :  { %v2453_v54 = vadd.f32 %v1340_v36, %v1332_v51 }
 0xf26   :  { %2047 = vtanh.f32 %v2453_v54 }
 0xf2c   :  { %v2048_v31 = vpop.eup %2047 }
 0xf2d   :  { %1345 = vrot.lane.b32.xlu0 %v2048_v31, %s2070_s1 }
 0xf55   :  { %v1423_v57 = vpop.permute.xlu2 %1422 }
 0xf56   :  { %v2458_v37 = vadd.f32 %v1423_v57, %v1415_v56 }
 0xf58   :  { %2049 = vtanh.f32 %v2458_v37 }
 0xf5e   :  { %v2050_v22 = vpop.eup %2049 }
 0xf5f   :  { %1428 = vrot.lane.b32.xlu1 %v2050_v22, %s2070_s1 }
 0xf9f   :  { %v1346_v59 = vpop.permute.xlu0 %1345 }
 0xfa0   :  { %v1348_v30 = vmul.f32 %v1346_v59, %v1329_v20 }
 0xfa2   :  { %v2462_v60 = vpack.c.bf16 %v1348_v30, %v1348_v30 }
 0xfa4   :  { %v1445_v62 = vunpack.c.l.b16 %v2462_v60 }
 0xfa6   :  { %v1446_v0 = vpack.c.b16 %v1445_v62, %v1445_v62 }
 0xfa8   :  { %1447 = vrot.lane.b32.xlu2 %v1446_v0, %s2069_s29 }
 0xfd1   :  { %v1429_v33 = vpop.permute.xlu1 %1428 }
 0xfd2   :  { %v1431_v47 = vmul.f32 %v1429_v33, %v1412_v48 }
 0xfd4   :  { %v2472_v3 = vpack.c.bf16 %v1431_v47, %v1431_v47 }
 0xfd6   :  { %v1527_v43 = vunpack.c.l.b16 %v2472_v3 }
 0xfd8   :  { %v1528_v52 = vpack.c.b16 %v1527_v43, %v1527_v43 }
 0xfda   :  { %1529 = vrot.lane.b32.xlu0 %v1528_v52, %s2069_s29 }
0x1002   :  { %v1448_v18 = vpop.permute.xlu2 %1447 }
0x1003   :  { %1876 = vmatmul.msk.bf16.vlgmr.msrb.gmra.mxu2 %vm72_vm0, %v1448_v18 }
0x104c   :  { %v1530_v6 = vpop.permute.xlu0 %1529 }
0x104d   :  { %1887 = vmatmul.msk.bf16.vlgmr.msrb.gmra.mxu3 %vm72_vm0, %v1530_v6 }
0x1086   :  { %v1473_v8 = vpop.f32.mrf.mxu2 }
0x1087   :  { %v1477_v10 = vadd.f32 %v1473_v8, %v173_v7 }
0x1089   :  { %2051 = vtanh.f32 %v1477_v10  ;;  %v1877_v15 = vmul.f32 -1.442695, %v1477_v10 }
0x108e   :  { %v1475_v12 = vpop.f32.mrf.mxu2 }
0x108f   :  { %v2052_v41 = vpop.eup %2051 }
0x1090   :  { %1500 = vrot.lane.b32.xlu1 %v2052_v41, %s2070_s1 }
0x10d0   :  { %v1555_v29 = vpop.f32.mrf.mxu3 }
0x10d1   :  { %v1559_v13 = vadd.f32 %v1555_v29, %v2182_v23 }
0x10d3   :  { %2053 = vtanh.f32 %v1559_v13 }
0x10d4   :  { %2055 = vpow2.f32 %v1877_v15 }
0x10d8   :  { %v1557_v20 = vpop.f32.mrf.mxu3 }
0x10d9   :  { %v2054_v58 = vpop.eup %2053 }
0x10da   :  { %1582 = vrot.lane.b32.xlu2 %v2054_v58, %s2070_s1  ;;  %v2056_v25 = vpop.eup %2055 }
0x10db   :  { %v1481_v39 = vadd.f32 1.0, %v2056_v25 }
0x10dd   :  { %2057 = vrcp.f32 %v1481_v39  ;;  %v1493_v23 = vand.u32 2147483648, %v1481_v39  ;;  %vm1487_vm13 = vweird.f32 %v1481_v39  ;;  %v1491_v34 = vand.u32 2147483647, %v1481_v39 }
0x10df   :  { %v1494_v40 = vor.u32 1.1754944e-38, %v1493_v23  ;;  %vm1492_vm15 = vcmp.eq.f32.partialorder %v1491_v34, 8.507059e+37 }
0x10e2   :  { %438 = vrot.lane.b32.xlu2 %v2219_v38, %s2069_s29  ;;  %v1888_v38 = vmul.f32 -1.442695, %v1559_v13 }
0x10e3   :  { %v2058_v19 = vpop.eup %2057 }
0x10e4   :  { %v1483_v16 = vmul.f32 %v2058_v19, %v1481_v39  ;;  %vm1488_vm12 = vweird.f32 %v2058_v19  ;;  %2059 = vpow2.f32 %v1888_v38 }
0x10e5   :  { %vm1489_vm14 = vmor %vm1487_vm13, %vm1488_vm12 }
0x10e6   :  { %v1484_v63 = vsub.f32 1.0, %v1483_v16 }
0x10e8   :  { %v1485_v26 = vmul.f32 %v2058_v19, %v1484_v63 }
0x10ea   :  { %v1486_v27 = vadd.f32 %v2058_v19, %v1485_v26  ;;  %v2060_v24 = vpop.eup %2059 }
0x10eb   :  { %v1563_v48 = vadd.f32 1.0, %v2060_v24 }
0x10ec   :  { %v1490_v35 = vsel %vm1489_vm14, %v2058_v19, %v1486_v27 }
0x10ed   :  { %v2491_v45 = vsel %vm1492_vm15, %v1494_v40, %v1490_v35  ;;  %2061 = vrcp.f32 %v1563_v48  ;;  %v1575_v56 = vand.u32 2147483648, %v1563_v48  ;;  %vm1569_vm2 = vweird.f32 %v1563_v48 }
0x10ee   :  { %v1573_v57 = vand.u32 2147483647, %v1563_v48  ;;  %v1498_v1 = vmul.f32 %v2491_v45, %v2453_v54 }
0x10ef   :  { %v1576_v59 = vor.u32 1.1754944e-38, %v1575_v56 }
0x10f0   :  { %vm1574_vm4 = vcmp.eq.f32.partialorder %v1573_v57, 8.507059e+37 }
0x10f3   :  { %v2062_v14 = vpop.eup %2061 }
0x10f4   :  { %v1565_v49 = vmul.f32 %v2062_v14, %v1563_v48  ;;  %vm1570_vm1 = vweird.f32 %v2062_v14 }
0x10f5   :  { %vm1571_vm3 = vmor %vm1569_vm2, %vm1570_vm1 }
0x10f6   :  { %v1566_v51 = vsub.f32 1.0, %v1565_v49 }
0x10f8   :  { %v1567_v36 = vmul.f32 %v2062_v14, %v1566_v51 }
0x10fa   :  { %v1568_v31 = vadd.f32 %v2062_v14, %v1567_v36 }
0x10fc   :  { %v1572_v22 = vsel %vm1571_vm3, %v2062_v14, %v1568_v31 }
0x10fd   :  { %v1577_v62 = vsel %vm1574_vm4, %v1576_v59, %v1572_v22 }
0x1102   :  { %v1501_v17 = vpop.permute.xlu1 %1500 }
0x1103   :  { %v1503_v11 = vmul.f32 %v1501_v17, %v2491_v45 }
0x1105   :  { %1505 = vrot.lane.b32.xlu0 %v1503_v11, %s2069_s29 }
0x1134   :  { %v1583_v30 = vpop.permute.xlu2 %1582 }
0x1135   :  { %v1585_v0 = vmul.f32 %v1583_v30, %v1577_v62 }
0x1137   :  { %1587 = vrot.lane.b32.xlu1 %v1585_v0, %s2069_s29 }
0x113c   :  { %v439_v42 = vpop.permute.xlu2 %438 }
0x113d   :  { %1735 = vst.msk [vmem:[%s2608_s9 + $0x1c] sm:$0xf] %vm357_vm5, %v439_v42 }
0x113f   :  { %354 = vrot.lane.b32.xlu1 %v2209_v28, %s2069_s29  ;;  %v1580_v28 = vmul.f32 %v1577_v62, %v2458_v37 }
0x1147   :  { %604 = vrot.lane.b32.xlu1 %v2257_v50, %s2069_s29 }
0x114f   :  { %853 = vrot.lane.b32.xlu1 %v2327_v2, %s2069_s29 }
0x1157   :  { %1102 = vrot.lane.b32.xlu1 %v2389_v32, %s2069_s29 }
0x115f   :  { %1351 = vrot.lane.b32.xlu1 %v2462_v60, %s2069_s29 }
0x1177   :  { %v1506_v33 = vpop.permute.xlu0 %1505 }
0x1178   :  { %v1508_v47 = vadd.f32 %v1506_v33, %v1498_v1 }
0x117a   :  { %2063 = vtanh.f32 %v1508_v47 }
0x1180   :  { %v2064_v43 = vpop.eup %2063 }
0x1181   :  { %1511 = vrot.lane.b32.xlu2 %v2064_v43, %s2070_s1 }
0x1189   :  { %687 = vrot.lane.b32.xlu2 %v2289_v55, %s2069_s29 }
0x1191   :  { %936 = vrot.lane.b32.xlu2 %v2345_v9, %s2069_s29 }
0x1199   :  { %1185 = vrot.lane.b32.xlu2 %v2418_v46, %s2069_s29 }
0x11a1   :  { %1434 = vrot.lane.b32.xlu2 %v2472_v3, %s2069_s29 }
0x11a9   :  { %v1588_v50 = vpop.permute.xlu1 %1587 }
0x11aa   :  { %v1590_v2 = vadd.f32 %v1588_v50, %v1580_v28 }
0x11ac   :  { %2065 = vtanh.f32 %v1590_v2 }
0x11b1   :  { %v355_v32 = vpop.permute.xlu1 %354 }
0x11b2   :  { %v2066_v54 = vpop.eup %2065  ;;  %358 = vst.msk [vmem:[%s2609_s8] sm:$0xf] %vm357_vm5, %v355_v32 }
0x11b3   :  { %1593 = vrot.lane.b32.xlu0 %v2066_v54, %s2070_s1 }
0x11b9   :  { %v605_v55 = vpop.permute.xlu1 %604 }
0x11ba   :  { %1757 = vst.msk [vmem:[%s2608_s9 + $0x18] sm:$0xf] %vm357_vm5, %v605_v55 }
0x11bb   :  { %521 = vrot.lane.b32.xlu0 %v2247_v44, %s2069_s29 }
0x11c1   :  { %v854_v9 = vpop.permute.xlu1 %853 }
0x11c2   :  { %1790 = vst.msk [vmem:[%s2609_s8 + $0xc] sm:$0xf] %vm357_vm5, %v854_v9 }
0x11c3   :  { %770 = vrot.lane.b32.xlu0 %v2299_v61, %s2069_s29 }
0x11c9   :  { %v1103_v46 = vpop.permute.xlu1 %1102 }
0x11ca   :  { %1823 = vst.msk [vmem:[%s2608_s9 + $0xc] sm:$0xf] %vm357_vm5, %v1103_v46 }
0x11cb   :  { %1019 = vrot.lane.b32.xlu0 %v2379_v21, %s2069_s29 }
0x11d1   :  { %v1352_v37 = vpop.permute.xlu1 %1351 }
0x11d2   :  { %1856 = vst.msk [vmem:[%s2609_s8 + $0x18] sm:$0xf] %vm357_vm5, %v1352_v37 }
0x11d3   :  { %1268 = vrot.lane.b32.xlu0 %v2428_v53, %s2069_s29 }
0x11db   :  { %v1512_v44 = vpop.permute.xlu2 %1511 }
0x11dc   :  { %v1514_v61 = vmul.f32 %v1512_v44, %v2491_v45 }
0x11de   :  { %v1515_v60 = vpack.c.bf16 %v1514_v61, %v1514_v61  ;;  %1604 = vrot.lane.b32.xlu2 %v1514_v61, %s2069_s29 }
0x11e0   :  { %1517 = vrot.lane.b32.xlu0 %v1515_v60, %s2069_s29 }
0x11e3   :  { %v688_v3 = vpop.permute.xlu2 %687 }
0x11e4   :  { %1768 = vst.msk [vmem:[%s2609_s8 + $0x8] sm:$0xf] %vm357_vm5, %v688_v3 }
0x11e6   :  { %1619 = vrot.lane.b32.xlu2 %v1590_v2, %s2071_s19 }
0x11e8   :  { %1609 = vrot.lane.b32.xlu0 %v1508_v47, %s2071_s19 }
0x11eb   :  { %v937_v21 = vpop.permute.xlu2 %936 }
0x11ec   :  { %1801 = vst.msk [vmem:[%s2608_s9 + $0x10] sm:$0xf] %vm357_vm5, %v937_v21 }
0x11f3   :  { %v1186_v53 = vpop.permute.xlu2 %1185 }
0x11f4   :  { %1834 = vst.msk [vmem:[%s2609_s8 + $0x14] sm:$0xf] %vm357_vm5, %v1186_v53 }
0x11fb   :  { %v1435_v52 = vpop.permute.xlu2 %1434 }
0x11fc   :  { %1867 = vst.msk [vmem:[%s2608_s9 + $0x4] sm:$0xf] %vm357_vm5, %v1435_v52 }
0x1225   :  { %v1594_v4 = vpop.permute.xlu0 %1593 }
0x1226   :  { %v1596_v5 = vmul.f32 %v1594_v4, %v1577_v62 }
0x1228   :  { %v1597_v18 = vpack.c.bf16 %v1596_v5, %v1596_v5 }
0x122a   :  { %1599 = vrot.lane.b32.xlu1 %v1597_v18, %s2069_s29 }
0x122d   :  { %v522_v6 = vpop.permute.xlu0 %521 }
0x122e   :  { %1746 = vst.msk [vmem:[%s2609_s8 + $0x4] sm:$0xf] %vm357_vm5, %v522_v6 }
0x1232   :  { %1614 = vrot.lane.b32.xlu1 %v1596_v5, %s2069_s29 }
0x1235   :  { %v771_v7 = vpop.permute.xlu0 %770 }
0x1236   :  { %1779 = vst.msk [vmem:[%s2608_s9 + $0x14] sm:$0xf] %vm357_vm5, %v771_v7 }
0x1238   :  { %v1605_v8 = vpop.permute.xlu2 %1604 }
0x1239   :  { %1607 = vst.msk [vmem:[#allocation2] sm:$0xff] %vm72_vm0, %v1605_v8 }
0x123d   :  { %v1020_v10 = vpop.permute.xlu0 %1019 }
0x123e   :  { %1812 = vst.msk [vmem:[%s2609_s8 + $0x10] sm:$0xf] %vm357_vm5, %v1020_v10 }
0x1240   :  { %v1620_v12 = vpop.permute.xlu2 %1619 }
0x1241   :  { %1622 = vst.msk [vmem:[#allocation5] sm:$0xff] %vm72_vm0, %v1620_v12 }
0x1245   :  { %v1269_v41 = vpop.permute.xlu0 %1268 }
0x1246   :  { %1845 = vst.msk [vmem:[%s2608_s9 + $0x8] sm:$0xf] %vm357_vm5, %v1269_v41 }
0x1252   :  { %v1518_v29 = vpop.permute.xlu0 %1517 }
0x1253   :  { %1878 = vst.msk [vmem:[%s2609_s8 + $0x1c] sm:$0xf] %vm357_vm5, %v1518_v29 }
0x125a   :  { %v1610_v13 = vpop.permute.xlu0 %1609 }
0x125b   :  { %1612 = vst.msk [vmem:[#allocation3] sm:$0xff] %vm72_vm0, %v1610_v13 }
0x129c   :  { %v1600_v15 = vpop.permute.xlu1 %1599 }
0x129d   :  { %1602 = vst.msk [vmem:[%s2608_s9] sm:$0xf] %vm357_vm5, %v1600_v15 }
0x12a4   :  { %v1615_v20 = vpop.permute.xlu1 %1614 }
0x12a5   :  { %1617 = vst.msk [vmem:[#allocation4] sm:$0xff] %vm72_vm0, %v1615_v20 }

// kernel: bert_bilstm_classifier_forward.3
= control target key start
LH: loop header
LB: loop body
LE: loop exit
PB: predicated region body
PF: predicated region fallthrough
CT: control target
= control target key end

     0   :  { %vm72_vm0 = vcmask 261120   ;;  %v2121_v2 = vmov 0.0   ;;  %vm149_vm1 = vcmask 523264   ;;  %s2122_s16 = smov 32   ;;  %s2124_s27 = smov 96   ;;  %s2662_s2 = inlined_call_operand.vmem [shape: bf16[64,128], index: 2, kind: input, shape index: {}]   ;;  %s2663_s3 = inlined_call_operand.vmem [shape: bf16[64,128], index: 3, kind: input, shape index: {}]   ;;  %s2664_s4 = inlined_call_operand.vmem [shape: bf16[32,128], index: 4, kind: input, shape index: {}]   ;;  %s2665_s6 = inlined_call_operand.vmem [shape: f32[1,128], index: 6, kind: input, shape index: {}]   ;;  %s2666_s0 = inlined_call_operand.vmem [shape: bf16[8,8,64], index: 0, kind: input, shape index: {}, may-alias: {0,1}]   ;;  %s2667_s1 = inlined_call_operand.vmem [shape: bf16[8,8,64], index: 1, kind: input, shape index: {}, may-alias: {0,1}]   ;;  %s2668_s7 = inlined_call_operand.vmem [shape: f32[1,128], index: 7, kind: input, shape index: {}]   ;;  %s2669_s5 = inlined_call_operand.vmem [shape: bf16[32,128], index: 5, kind: input, shape index: {}]   ;;  %s2670_s9 = inlined_call_operand.vmem [shape: bf16[8,8,32], index: 9, kind: output, shape index: {1}]   ;;  %s2671_s8 = inlined_call_operand.vmem [shape: bf16[8,8,32], index: 8, kind: output, shape index: {0}]  }
   0x1   :  { %v1949_v0 = vld [vmem:[%s2662_s2 + $0x18] sm:$0xff]  ;;  %73 = vst.msk [vmem:[#allocation2] sm:$0xff] %vm72_vm0, %v2121_v2  ;;  %v1955_v3 = vld [vmem:[%s2664_s4 + $0x8] sm:$0xff]  ;;  %v1948_v4 = vld [vmem:[%s2662_s2 + $0x10] sm:$0xff] }
   0x2   :  { %v1953_v1 = vld [vmem:[%s2663_s3 + $0x18] sm:$0xff]  ;;  %74 = vst.msk [vmem:[#allocation3] sm:$0xff] %vm72_vm0, %v2121_v2  ;;  %166 = vmatpush.bf16.msra.mxu0 %v1949_v0  ;;  %v1952_v5 = vld [vmem:[%s2663_s3 + $0x10] sm:$0xff]  ;;  %336 = vmatpush.bf16.msra.mxu2 %v1955_v3  ;;  %v1954_v6 = vld [vmem:[%s2664_s4] sm:$0xff] }
   0x3   :  { %271 = vmatpush.bf16.msra.mxu1 %v1953_v1  ;;  %75 = vst.msk [vmem:[#allocation4] sm:$0xff] %vm72_vm0, %v2121_v2  ;;  %v1947_v7 = vld [vmem:[%s2662_s2 + $0x8] sm:$0xff]  ;;  %v1946_v11 = vld [vmem:[%s2662_s2] sm:$0xff]  ;;  %v1944_v22 = vld [vmem:[%s2667_s1 + $0x10] sm:$0xff] }
   0x4   :  { %76 = vst.msk [vmem:[#allocation5] sm:$0xff] %vm72_vm0, %v2121_v2  ;;  %v1951_v8 = vld [vmem:[%s2663_s3 + $0x8] sm:$0xff]  ;;  %v1950_v12 = vld [vmem:[%s2663_s3] sm:$0xff]  ;;  %v1945_v23 = vld [vmem:[%s2667_s1 + $0x18] sm:$0xff] }
   0x5   :  { %v1938_v13 = vld [vmem:[%s2666_s0] sm:$0xff]  ;;  %v1957_v15 = vld [vmem:[%s2669_s5 + $0x8] sm:$0xff] }
   0x6   :  { %167 = vmatpush.bf16.msra.mxu0 %v1948_v4  ;;  %337 = vmatpush.bf16.msra.mxu2 %v1954_v6  ;;  %v1942_v14 = vld [vmem:[%s2667_s1] sm:$0xff]  ;;  %v1943_v19 = vld [vmem:[%s2667_s1 + $0x8] sm:$0xff]  ;;  %s2123_s1 = smov 64  }
   0x7   :  { %272 = vmatpush.bf16.msra.mxu1 %v1952_v5  ;;  %420 = vmatpush.bf16.msra.mxu3 %v1957_v15  ;;  %v1956_v16 = vld [vmem:[%s2669_s5] sm:$0xff] }
   0x8   :  { %v304_v9 = vld [vmem:[#allocation2] sm:$0xff] }
   0x9   :  { %v309_v10 = vpack.c.bf16 %v304_v9, %v304_v9  ;;  %v305_v20 = vld [vmem:[#allocation3] sm:$0xff]  ;;  %v2242_v24 = vld [vmem:[%s2665_s6] ss:$0 sm:$0xff] }
   0xa   :  { %168 = vmatpush.bf16.msra.mxu0 %v1947_v7  ;;  %v306_v17 = vld [vmem:[#allocation4] sm:$0xff]  ;;  %365 = vrot.lane.b32.xlu1 %v305_v20, %s2122_s16  ;;  %v1991_v25 = vld [vmem:[%s2668_s7] ss:$0 sm:$0xff] }
   0xb   :  { %273 = vmatpush.bf16.msra.mxu1 %v1951_v8  ;;  %1772 = vmatmul.msk.bf16.vlgmr.msra.gmra.mxu2 %vm72_vm0, %v309_v10  ;;  %v394_v18 = vpack.c.bf16 %v306_v17, %v306_v17  ;;  %v307_v21 = vld [vmem:[#allocation5] sm:$0xff] }
   0xc   :  { %421 = vmatpush.bf16.msra.mxu3 %v1956_v16 }
   0xe   :  { %169 = vmatpush.bf16.msra.mxu0 %v1946_v11 }
   0xf   :  { %274 = vmatpush.bf16.msra.mxu1 %v1950_v12  ;;  %1782 = vmatmul.msk.bf16.vlgmr.msra.gmra.mxu3 %vm72_vm0, %v394_v18 }
  0x11   :  { %1724 = vmatmul.msk.bf16.vlgmr.msra.gmra.mxu0 %vm149_vm1, %v1938_v13 }
  0x12   :  { %1760 = vmatmul.msk.bf16.vlgmr.msra.gmra.mxu1 %vm149_vm1, %v1942_v14  ;;  %449 = vrot.lane.b32.xlu1 %v307_v21, %s2122_s16 }
  0x22   :  { %1761 = vmatmul.msk.bf16.gmra.mxu1 %vm149_vm1, %v1943_v19 }
  0x32   :  { %1762 = vmatmul.msk.bf16.gmra.mxu1 %vm149_vm1, %v1944_v22 }
  0x42   :  { %1763 = vmatmul.msk.bf16.gmra.mxu1 %vm149_vm1, %v1945_v23 }
  0x7c   :  { %v366_v18 = vpop.permute.xlu1 %365 }
  0x84   :  { %v450_v23 = vpop.permute.xlu1 %449 }
  0x8e   :  { %v171_v26 = vpop.f32.mrf.mxu0  ;;  %v339_v30 = vpop.f32.mrf.mxu2 }
  0x8f   :  { %v276_v27 = vpop.f32.mrf.mxu1  ;;  %v172_v28 = vadd.f32 %v2242_v24, %v171_v26 }
  0x90   :  { %v2248_v29 = vadd.f32 %v1991_v25, %v276_v27 }
  0x91   :  { %v343_v31 = vadd.f32 %v339_v30, %v172_v28 }
  0x92   :  { %v423_v38 = vpop.f32.mrf.mxu3 }
  0x93   :  { %1992 = vtanh.f32 %v343_v31  ;;  %v1773_v52 = vmul.f32 -1.442695, %v343_v31 }
  0x96   :  { %v341_v34 = vpop.f32.mrf.mxu2 }
  0x97   :  { %v278_v32 = vpop.f32.mrf.mxu1 }
  0x98   :  { %v2250_v33 = vadd.f32 %v1991_v25, %v278_v32 }
  0x99   :  { %v1993_v35 = vpop.eup %1992 }
  0x9a   :  { %370 = vrot.lane.b32.xlu0 %v1993_v35, %s2123_s1  ;;  %v425_v41 = vpop.f32.mrf.mxu3 }
  0x9f   :  { %v281_v36 = vpop.f32.mrf.mxu1 }
  0xa0   :  { %v2253_v37 = vadd.f32 %v1991_v25, %v281_v36  ;;  %v1959_v36 = vld [vmem:[%s2664_s4 + $0x8] sm:$0xff] }
  0xa1   :  { %507 = vmatpush.bf16.msrb.mxu2 %v1959_v36 }
  0xa7   :  { %v283_v39 = vpop.f32.mrf.mxu1 }
  0xa8   :  { %v2255_v40 = vadd.f32 %v1991_v25, %v283_v39 }
  0xaf   :  { %v286_v42 = vpop.f32.mrf.mxu1 }
  0xb0   :  { %v2257_v43 = vadd.f32 %v1991_v25, %v286_v42 }
  0xb7   :  { %v288_v44 = vpop.f32.mrf.mxu1 }
  0xb8   :  { %v2259_v45 = vadd.f32 %v1991_v25, %v288_v44 }
  0xbf   :  { %v291_v46 = vpop.f32.mrf.mxu1 }
  0xc0   :  { %v2261_v47 = vadd.f32 %v1991_v25, %v291_v46 }
  0xc7   :  { %v293_v48 = vpop.f32.mrf.mxu1 }
  0xc8   :  { %v294_v49 = vadd.f32 %v1991_v25, %v293_v48  ;;  %v1961_v48 = vld [vmem:[%s2669_s5 + $0x8] sm:$0xff] }
  0xc9   :  { %590 = vmatpush.bf16.msrb.mxu3 %v1961_v48 }
  0xca   :  { %v427_v50 = vadd.f32 %v423_v38, %v294_v49  ;;  %v1958_v38 = vld [vmem:[%s2664_s4] sm:$0xff] }
  0xcb   :  { %508 = vmatpush.bf16.msrb.mxu2 %v1958_v38  ;;  %v1960_v49 = vld [vmem:[%s2669_s5] sm:$0xff] }
  0xcc   :  { %1994 = vtanh.f32 %v427_v50  ;;  %v1783_v3 = vmul.f32 -1.442695, %v427_v50 }
  0xcd   :  { %1996 = vpow2.f32 %v1773_v52  ;;  %591 = vmatpush.bf16.msrb.mxu3 %v1960_v49  ;;  %v173_v52 = vpop.f32.mrf.mxu0 }
  0xd2   :  { %v1995_v51 = vpop.eup %1994 }
  0xd3   :  { %454 = vrot.lane.b32.xlu0 %v1995_v51, %s2123_s1  ;;  %v1997_v53 = vpop.eup %1996 }
  0xd4   :  { %v347_v54 = vadd.f32 1.0, %v1997_v53  ;;  %v174_v53 = vadd.f32 %v2242_v24, %v173_v52 }
  0xd6   :  { %1998 = vrcp.f32 %v347_v54  ;;  %vm353_vm2 = vweird.f32 %v347_v54  ;;  %v359_v59 = vand.u32 2147483648, %v347_v54  ;;  %v357_v61 = vand.u32 2147483647, %v347_v54 }
  0xd7   :  { %2000 = vpow2.f32 %v1783_v3 }
  0xd8   :  { %v360_v62 = vor.u32 1.1754944e-38, %v359_v59  ;;  %vm358_vm5 = vcmp.eq.f32.partialorder %v357_v61, 8.507059e+37 }
  0xdc   :  { %v1999_v55 = vpop.eup %1998 }
  0xdd   :  { %v349_v56 = vmul.f32 %v1999_v55, %v347_v54  ;;  %vm354_vm3 = vweird.f32 %v1999_v55  ;;  %v2001_v4 = vpop.eup %2000 }
  0xde   :  { %vm355_vm4 = vmor %vm353_vm2, %vm354_vm3  ;;  %v431_v5 = vadd.f32 1.0, %v2001_v4 }
  0xdf   :  { %v350_v57 = vsub.f32 1.0, %v349_v56 }
  0xe0   :  { %2002 = vrcp.f32 %v431_v5  ;;  %v443_v11 = vand.u32 2147483648, %v431_v5  ;;  %vm437_vm7 = vweird.f32 %v431_v5  ;;  %v441_v12 = vand.u32 2147483647, %v431_v5 }
  0xe1   :  { %v351_v58 = vmul.f32 %v1999_v55, %v350_v57 }
  0xe2   :  { %v444_v14 = vor.u32 1.1754944e-38, %v443_v11  ;;  %vm442_vm9 = vcmp.eq.f32.partialorder %v441_v12, 8.507059e+37 }
  0xe3   :  { %v352_v60 = vadd.f32 %v1999_v55, %v351_v58 }
  0xe5   :  { %v356_v63 = vsel %vm355_vm4, %v1999_v55, %v352_v60 }
  0xe6   :  { %v361_v0 = vsel %vm358_vm5, %v360_v62, %v356_v63  ;;  %v2003_v6 = vpop.eup %2002 }
  0xe7   :  { %v433_v7 = vmul.f32 %v2003_v6, %v431_v5  ;;  %vm438_vm6 = vweird.f32 %v2003_v6  ;;  %v368_v19 = vmul.f32 %v366_v18, %v361_v0 }
  0xe8   :  { %vm439_vm8 = vmor %vm437_vm7, %vm438_vm6 }
  0xe9   :  { %v434_v8 = vsub.f32 1.0, %v433_v7 }
  0xeb   :  { %v435_v9 = vmul.f32 %v2003_v6, %v434_v8 }
  0xed   :  { %v436_v10 = vadd.f32 %v2003_v6, %v435_v9 }
  0xef   :  { %v440_v13 = vsel %vm439_vm8, %v2003_v6, %v436_v10 }
  0xf0   :  { %v445_v15 = vsel %vm442_vm9, %v444_v14, %v440_v13 }
  0xf1   :  { %v452_v25 = vmul.f32 %v450_v23, %v445_v15 }
 0x10c   :  { %v371_v1 = vpop.permute.xlu0 %370 }
 0x10d   :  { %v373_v2 = vmul.f32 %v371_v1, %v361_v0 }
 0x10f   :  { %375 = vrot.lane.b32.xlu2 %v373_v2, %s2122_s16 }
 0x145   :  { %v455_v16 = vpop.permute.xlu0 %454 }
 0x146   :  { %v457_v17 = vmul.f32 %v455_v16, %v445_v15 }
 0x148   :  { %459 = vrot.lane.b32.xlu2 %v457_v17, %s2122_s16 }
 0x169   :  { %v376_v20 = vpop.permute.xlu2 %375 }
 0x16a   :  { %v2266_v21 = vadd.f32 %v376_v20, %v368_v19 }
 0x16c   :  { %2004 = vtanh.f32 %v2266_v21 }
 0x172   :  { %v2005_v22 = vpop.eup %2004 }
 0x173   :  { %381 = vrot.lane.b32.xlu0 %v2005_v22, %s2123_s1 }
 0x1a2   :  { %v460_v26 = vpop.permute.xlu2 %459 }
 0x1a3   :  { %v2270_v27 = vadd.f32 %v460_v26, %v452_v25 }
 0x1a5   :  { %2006 = vtanh.f32 %v2270_v27 }
 0x1ab   :  { %v2007_v28 = vpop.eup %2006 }
 0x1ac   :  { %465 = vrot.lane.b32.xlu1 %v2007_v28, %s2123_s1 }
 0x1e5   :  { %v382_v30 = vpop.permute.xlu0 %381 }
 0x1e6   :  { %v384_v31 = vmul.f32 %v382_v30, %v361_v0 }
 0x1e8   :  { %v2274_v32 = vpack.c.bf16 %v384_v31, %v384_v31 }
 0x1ea   :  { %v482_v34 = vunpack.c.l.b16 %v2274_v32 }
 0x1ec   :  { %v483_v35 = vpack.c.b16 %v482_v34, %v482_v34 }
 0x1ee   :  { %484 = vrot.lane.b32.xlu2 %v483_v35, %s2122_s16 }
 0x21e   :  { %v466_v39 = vpop.permute.xlu1 %465 }
 0x21f   :  { %v468_v41 = vmul.f32 %v466_v39, %v445_v15 }
 0x221   :  { %v2284_v42 = vpack.c.bf16 %v468_v41, %v468_v41 }
 0x223   :  { %v565_v44 = vunpack.c.l.b16 %v2284_v42 }
 0x225   :  { %v566_v46 = vpack.c.b16 %v565_v44, %v565_v44 }
 0x227   :  { %567 = vrot.lane.b32.xlu0 %v566_v46, %s2122_s16 }
 0x248   :  { %v485_v50 = vpop.permute.xlu2 %484 }
 0x249   :  { %1793 = vmatmul.msk.bf16.vlgmr.msrb.gmra.mxu2 %vm72_vm0, %v485_v50 }
 0x299   :  { %v568_v51 = vpop.permute.xlu0 %567 }
 0x29a   :  { %1804 = vmatmul.msk.bf16.vlgmr.msrb.gmra.mxu3 %vm72_vm0, %v568_v51  ;;  %v1962_v51 = vld [vmem:[%s2664_s4] sm:$0xff] }
 0x2cc   :  { %v510_v54 = vpop.f32.mrf.mxu2 }
 0x2cd   :  { %v514_v55 = vadd.f32 %v510_v54, %v174_v53 }
 0x2cf   :  { %2008 = vtanh.f32 %v514_v55  ;;  %v1794_v58 = vmul.f32 -1.442695, %v514_v55 }
 0x2d1   :  { %2010 = vpow2.f32 %v1794_v58  ;;  %v1965_v58 = vld [vmem:[%s2669_s5 + $0x8] sm:$0xff] }
 0x2d2   :  { %756 = vmatpush.bf16.msra.mxu3 %v1965_v58 }
 0x2d4   :  { %v512_v56 = vpop.f32.mrf.mxu2 }
 0x2d5   :  { %v2009_v57 = vpop.eup %2008 }
 0x2d6   :  { %537 = vrot.lane.b32.xlu1 %v2009_v57, %s2123_s1  ;;  %v1939_v57 = vld [vmem:[%s2666_s0 + $0x8] sm:$0xff] }
 0x2d7   :  { %v2011_v61 = vpop.eup %2010  ;;  %1725 = vmatmul.msk.bf16.gmra.mxu0 %vm149_vm1, %v1939_v57 }
 0x2d8   :  { %v518_v0 = vadd.f32 1.0, %v2011_v61 }
 0x2da   :  { %v530_v6 = vand.u32 2147483648, %v518_v0  ;;  %vm524_vm11 = vweird.f32 %v518_v0  ;;  %v528_v7 = vand.u32 2147483647, %v518_v0 }
 0x2dc   :  { %v531_v8 = vor.u32 1.1754944e-38, %v530_v6  ;;  %vm529_vm13 = vcmp.eq.f32.partialorder %v528_v7, 8.507059e+37 }
 0x31d   :  { %v593_v59 = vpop.f32.mrf.mxu3 }
 0x31e   :  { %v597_v60 = vadd.f32 %v593_v59, %v2261_v47  ;;  %v1964_v59 = vld [vmem:[%s2669_s5] sm:$0xff] }
 0x31f   :  { %757 = vmatpush.bf16.msra.mxu3 %v1964_v59 }
 0x320   :  { %2012 = vtanh.f32 %v597_v60  ;;  %v1805_v12 = vmul.f32 -1.442695, %v597_v60 }
 0x321   :  { %2014 = vrcp.f32 %v518_v0 }
 0x322   :  { %2016 = vpow2.f32 %v1805_v12 }
 0x325   :  { %v595_v62 = vpop.f32.mrf.mxu3 }
 0x326   :  { %v2013_v63 = vpop.eup %2012 }
 0x327   :  { %620 = vrot.lane.b32.xlu2 %v2013_v63, %s2123_s1  ;;  %v2015_v1 = vpop.eup %2014 }
 0x328   :  { %v520_v2 = vmul.f32 %v2015_v1, %v518_v0  ;;  %vm525_vm10 = vweird.f32 %v2015_v1  ;;  %v2017_v13 = vpop.eup %2016 }
 0x329   :  { %vm526_vm12 = vmor %vm524_vm11, %vm525_vm10  ;;  %v601_v14 = vadd.f32 1.0, %v2017_v13 }
 0x32a   :  { %v521_v3 = vsub.f32 1.0, %v520_v2 }
 0x32b   :  { %2018 = vrcp.f32 %v601_v14  ;;  %v613_v20 = vand.u32 2147483648, %v601_v14  ;;  %vm607_vm15 = vweird.f32 %v601_v14  ;;  %v611_v22 = vand.u32 2147483647, %v601_v14 }
 0x32c   :  { %v522_v4 = vmul.f32 %v2015_v1, %v521_v3 }
 0x32d   :  { %v614_v25 = vor.u32 1.1754944e-38, %v613_v20  ;;  %vm612_vm3 = vcmp.eq.f32.partialorder %v611_v22, 8.507059e+37 }
 0x32e   :  { %v523_v5 = vadd.f32 %v2015_v1, %v522_v4 }
 0x330   :  { %v527_v47 = vsel %vm526_vm12, %v2015_v1, %v523_v5 }
 0x331   :  { %v532_v10 = vsel %vm529_vm13, %v531_v8, %v527_v47  ;;  %v2019_v15 = vpop.eup %2018 }
 0x332   :  { %v603_v16 = vmul.f32 %v2019_v15, %v601_v14  ;;  %vm608_vm14 = vweird.f32 %v2019_v15  ;;  %v535_v31 = vmul.f32 %v532_v10, %v2266_v21 }
 0x333   :  { %vm609_vm2 = vmor %vm607_vm15, %vm608_vm14 }
 0x334   :  { %v604_v17 = vsub.f32 1.0, %v603_v16 }
 0x336   :  { %v605_v18 = vmul.f32 %v2019_v15, %v604_v17 }
 0x338   :  { %v606_v19 = vadd.f32 %v2019_v15, %v605_v18 }
 0x33a   :  { %v610_v23 = vsel %vm609_vm2, %v2019_v15, %v606_v19 }
 0x33b   :  { %v615_v28 = vsel %vm612_vm3, %v614_v25, %v610_v23 }
 0x33c   :  { %v618_v38 = vmul.f32 %v615_v28, %v2270_v27  ;;  %v1963_v27 = vld [vmem:[%s2664_s4 + $0x8] sm:$0xff] }
 0x33d   :  { %673 = vmatpush.bf16.msra.mxu2 %v1963_v27 }
 0x341   :  { %674 = vmatpush.bf16.msra.mxu2 %v1962_v51 }
 0x348   :  { %v538_v9 = vpop.permute.xlu1 %537 }
 0x349   :  { %v540_v11 = vmul.f32 %v538_v9, %v532_v10 }
 0x34b   :  { %542 = vrot.lane.b32.xlu0 %v540_v11, %s2122_s16 }
 0x354   :  { %v176_v62 = vpop.f32.mrf.mxu0 }
 0x355   :  { %v177_v63 = vadd.f32 %v2242_v24, %v176_v62  ;;  %v1966_v62 = vld [vmem:[%s2664_s4] sm:$0xff] }
 0x381   :  { %v621_v26 = vpop.permute.xlu2 %620 }
 0x382   :  { %v623_v30 = vmul.f32 %v621_v26, %v615_v28 }
 0x384   :  { %625 = vrot.lane.b32.xlu1 %v623_v30, %s2122_s16 }
 0x3bd   :  { %v543_v34 = vpop.permute.xlu0 %542 }
 0x3be   :  { %v2303_v35 = vadd.f32 %v543_v34, %v535_v31 }
 0x3c0   :  { %2020 = vtanh.f32 %v2303_v35 }
 0x3c6   :  { %v2021_v36 = vpop.eup %2020 }
 0x3c7   :  { %548 = vrot.lane.b32.xlu2 %v2021_v36, %s2123_s1 }
 0x3f6   :  { %v626_v39 = vpop.permute.xlu1 %625 }
 0x3f7   :  { %v2308_v41 = vadd.f32 %v626_v39, %v618_v38 }
 0x3f9   :  { %2022 = vtanh.f32 %v2308_v41 }
 0x3ff   :  { %v2023_v44 = vpop.eup %2022 }
 0x400   :  { %631 = vrot.lane.b32.xlu0 %v2023_v44, %s2123_s1 }
 0x421   :  { %v549_v46 = vpop.permute.xlu2 %548 }
 0x422   :  { %v551_v21 = vmul.f32 %v549_v46, %v532_v10 }
 0x424   :  { %v2312_v48 = vpack.c.bf16 %v551_v21, %v551_v21 }
 0x426   :  { %v648_v49 = vunpack.c.l.b16 %v2312_v48 }
 0x428   :  { %v649_v50 = vpack.c.b16 %v648_v49, %v648_v49 }
 0x42a   :  { %650 = vrot.lane.b32.xlu1 %v649_v50, %s2122_s16 }
 0x472   :  { %v632_v52 = vpop.permute.xlu0 %631 }
 0x473   :  { %v634_v53 = vmul.f32 %v632_v52, %v615_v28 }
 0x475   :  { %v2322_v54 = vpack.c.bf16 %v634_v53, %v634_v53 }
 0x477   :  { %v731_v55 = vunpack.c.l.b16 %v2322_v54 }
 0x479   :  { %v732_v56 = vpack.c.b16 %v731_v55, %v731_v55 }
 0x47b   :  { %733 = vrot.lane.b32.xlu2 %v732_v56, %s2122_s16 }
 0x49c   :  { %v651_v60 = vpop.permute.xlu1 %650 }
 0x49d   :  { %1815 = vmatmul.msk.bf16.vlgmr.msra.gmra.mxu2 %vm72_vm0, %v651_v60 }
 0x4d5   :  { %v734_v61 = vpop.permute.xlu2 %733 }
 0x4d6   :  { %1826 = vmatmul.msk.bf16.vlgmr.msra.gmra.mxu3 %vm72_vm0, %v734_v61 }
 0x520   :  { %v676_v0 = vpop.f32.mrf.mxu2 }
 0x521   :  { %v680_v1 = vadd.f32 %v676_v0, %v177_v63 }
 0x523   :  { %2024 = vtanh.f32 %v680_v1  ;;  %v1816_v47 = vmul.f32 -1.442695, %v680_v1 }
 0x528   :  { %v678_v2 = vpop.f32.mrf.mxu2 }
 0x529   :  { %v2025_v3 = vpop.eup %2024 }
 0x52a   :  { %703 = vrot.lane.b32.xlu0 %v2025_v3, %s2123_s1 }
 0x559   :  { %v759_v4 = vpop.f32.mrf.mxu3 }
 0x55a   :  { %v763_v5 = vadd.f32 %v759_v4, %v2259_v45  ;;  %v1969_v4 = vld [vmem:[%s2669_s5 + $0x8] sm:$0xff] }
 0x55b   :  { %922 = vmatpush.bf16.msrb.mxu3 %v1969_v4 }
 0x55c   :  { %2026 = vtanh.f32 %v763_v5  ;;  %v1827_v22 = vmul.f32 -1.442695, %v763_v5  ;;  %v1968_v5 = vld [vmem:[%s2669_s5] sm:$0xff] }
 0x55d   :  { %2028 = vpow2.f32 %v1816_v47  ;;  %v178_v47 = vpop.f32.mrf.mxu0 }
 0x55f   :  { %923 = vmatpush.bf16.msrb.mxu3 %v1968_v5 }
 0x561   :  { %v761_v6 = vpop.f32.mrf.mxu3 }
 0x562   :  { %v2027_v7 = vpop.eup %2026 }
 0x563   :  { %786 = vrot.lane.b32.xlu1 %v2027_v7, %s2123_s1  ;;  %v2029_v8 = vpop.eup %2028 }
 0x564   :  { %v684_v9 = vadd.f32 1.0, %v2029_v8  ;;  %v179_v8 = vadd.f32 %v2242_v24, %v178_v47 }
 0x566   :  { %2030 = vrcp.f32 %v684_v9  ;;  %v696_v15 = vand.u32 2147483648, %v684_v9  ;;  %vm690_vm5 = vweird.f32 %v684_v9  ;;  %v694_v16 = vand.u32 2147483647, %v684_v9 }
 0x567   :  { %2032 = vpow2.f32 %v1827_v22 }
 0x568   :  { %v697_v17 = vor.u32 1.1754944e-38, %v696_v15  ;;  %vm695_vm7 = vcmp.eq.f32.partialorder %v694_v16, 8.507059e+37 }
 0x56c   :  { %v2031_v10 = vpop.eup %2030 }
 0x56d   :  { %v686_v11 = vmul.f32 %v2031_v10, %v684_v9  ;;  %vm691_vm4 = vweird.f32 %v2031_v10  ;;  %v2033_v23 = vpop.eup %2032 }
 0x56e   :  { %vm692_vm6 = vmor %vm690_vm5, %vm691_vm4  ;;  %v767_v25 = vadd.f32 1.0, %v2033_v23 }
 0x56f   :  { %v687_v12 = vsub.f32 1.0, %v686_v11 }
 0x570   :  { %2034 = vrcp.f32 %v767_v25  ;;  %v779_v36 = vand.u32 2147483648, %v767_v25  ;;  %vm773_vm9 = vweird.f32 %v767_v25  ;;  %v777_v38 = vand.u32 2147483647, %v767_v25 }
 0x571   :  { %v688_v13 = vmul.f32 %v2031_v10, %v687_v12 }
 0x572   :  { %v780_v44 = vor.u32 1.1754944e-38, %v779_v36  ;;  %vm778_vm11 = vcmp.eq.f32.partialorder %v777_v38, 8.507059e+37 }
 0x573   :  { %v689_v14 = vadd.f32 %v2031_v10, %v688_v13 }
 0x575   :  { %v693_v45 = vsel %vm692_vm6, %v2031_v10, %v689_v14 }
 0x576   :  { %v698_v18 = vsel %vm695_vm7, %v697_v17, %v693_v45  ;;  %v2035_v26 = vpop.eup %2034 }
 0x577   :  { %v769_v28 = vmul.f32 %v2035_v26, %v767_v25  ;;  %vm774_vm8 = vweird.f32 %v2035_v26  ;;  %v701_v50 = vmul.f32 %v698_v18, %v2303_v35 }
 0x578   :  { %vm775_vm10 = vmor %vm773_vm9, %vm774_vm8 }
 0x579   :  { %v770_v30 = vsub.f32 1.0, %v769_v28 }
 0x57b   :  { %v771_v31 = vmul.f32 %v2035_v26, %v770_v30 }
 0x57d   :  { %v772_v34 = vadd.f32 %v2035_v26, %v771_v31 }
 0x57f   :  { %v776_v39 = vsel %vm775_vm10, %v2035_v26, %v772_v34 }
 0x580   :  { %v781_v21 = vsel %vm778_vm11, %v780_v44, %v776_v39 }
 0x581   :  { %v784_v53 = vmul.f32 %v781_v21, %v2308_v41  ;;  %v1967_v41 = vld [vmem:[%s2664_s4 + $0x8] sm:$0xff] }
 0x582   :  { %839 = vmatpush.bf16.msrb.mxu2 %v1967_v41 }
 0x586   :  { %840 = vmatpush.bf16.msrb.mxu2 %v1966_v62 }
 0x59c   :  { %v704_v19 = vpop.permute.xlu0 %703 }
 0x59d   :  { %v706_v20 = vmul.f32 %v704_v19, %v698_v18 }
 0x59f   :  { %708 = vrot.lane.b32.xlu2 %v706_v20, %s2122_s16 }
 0x5d5   :  { %v787_v46 = vpop.permute.xlu1 %786 }
 0x5d6   :  { %v789_v49 = vmul.f32 %v787_v46, %v781_v21 }
 0x5d8   :  { %791 = vrot.lane.b32.xlu0 %v789_v49, %s2122_s16 }
 0x5f9   :  { %v709_v27 = vpop.permute.xlu2 %708 }
 0x5fa   :  { %v2345_v51 = vadd.f32 %v709_v27, %v701_v50 }
 0x5fc   :  { %2036 = vtanh.f32 %v2345_v51 }
 0x602   :  { %v2037_v52 = vpop.eup %2036 }
 0x603   :  { %714 = vrot.lane.b32.xlu1 %v2037_v52, %s2123_s1 }
 0x64a   :  { %v792_v55 = vpop.permute.xlu0 %791 }
 0x64b   :  { %v2350_v56 = vadd.f32 %v792_v55, %v784_v53 }
 0x64d   :  { %2038 = vtanh.f32 %v2350_v56 }
 0x653   :  { %v2039_v57 = vpop.eup %2038 }
 0x654   :  { %797 = vrot.lane.b32.xlu2 %v2039_v57, %s2123_s1 }
 0x675   :  { %v715_v58 = vpop.permute.xlu1 %714 }
 0x676   :  { %v717_v35 = vmul.f32 %v715_v58, %v698_v18 }
 0x678   :  { %v2354_v59 = vpack.c.bf16 %v717_v35, %v717_v35 }
 0x67a   :  { %v814_v60 = vunpack.c.l.b16 %v2354_v59 }
 0x67c   :  { %v815_v61 = vpack.c.b16 %v814_v60, %v814_v60 }
 0x67e   :  { %816 = vrot.lane.b32.xlu0 %v815_v61, %s2122_s16 }
 0x6ae   :  { %v798_v63 = vpop.permute.xlu2 %797 }
 0x6af   :  { %v800_v0 = vmul.f32 %v798_v63, %v781_v21 }
 0x6b1   :  { %v2364_v1 = vpack.c.bf16 %v800_v0, %v800_v0 }
 0x6b3   :  { %v897_v2 = vunpack.c.l.b16 %v2364_v1 }
 0x6b5   :  { %v898_v3 = vpack.c.b16 %v897_v2, %v897_v2 }
 0x6b7   :  { %899 = vrot.lane.b32.xlu1 %v898_v3, %s2122_s16 }
 0x6f0   :  { %v817_v6 = vpop.permute.xlu0 %816 }
 0x6f1   :  { %1837 = vmatmul.msk.bf16.vlgmr.msrb.gmra.mxu2 %vm72_vm0, %v817_v6 }
 0x729   :  { %v900_v7 = vpop.permute.xlu1 %899 }
 0x72a   :  { %1848 = vmatmul.msk.bf16.vlgmr.msrb.gmra.mxu3 %vm72_vm0, %v900_v7 }
 0x774   :  { %v842_v9 = vpop.f32.mrf.mxu2 }
 0x775   :  { %v846_v10 = vadd.f32 %v842_v9, %v179_v8  ;;  %v1970_v8 = vld [vmem:[%s2664_s4] sm:$0xff] }
 0x777   :  { %2040 = vtanh.f32 %v846_v10  ;;  %v1838_v13 = vmul.f32 -1.442695, %v846_v10 }
 0x779   :  { %2042 = vpow2.f32 %v1838_v13 }
 0x77c   :  { %v844_v11 = vpop.f32.mrf.mxu2 }
 0x77d   :  { %v2041_v12 = vpop.eup %2040 }
 0x77e   :  { %869 = vrot.lane.b32.xlu2 %v2041_v12, %s2123_s1 }
 0x77f   :  { %v2043_v16 = vpop.eup %2042 }
 0x780   :  { %v850_v18 = vadd.f32 1.0, %v2043_v16  ;;  %v1972_v16 = vld [vmem:[%s2669_s5] sm:$0xff] }
 0x782   :  { %v862_v26 = vand.u32 2147483648, %v850_v18  ;;  %vm856_vm13 = vweird.f32 %v850_v18  ;;  %v860_v28 = vand.u32 2147483647, %v850_v18 }
 0x784   :  { %v863_v30 = vor.u32 1.1754944e-38, %v862_v26  ;;  %vm861_vm15 = vcmp.eq.f32.partialorder %v860_v28, 8.507059e+37 }
 0x7ad   :  { %v925_v14 = vpop.f32.mrf.mxu3 }
 0x7ae   :  { %v929_v15 = vadd.f32 %v925_v14, %v2257_v43  ;;  %v1940_v14 = vld [vmem:[%s2666_s0 + $0x10] sm:$0xff] }
 0x7af   :  { %1726 = vmatmul.msk.bf16.gmra.mxu0 %vm149_vm1, %v1940_v14 }
 0x7b0   :  { %2044 = vtanh.f32 %v929_v15  ;;  %v1849_v38 = vmul.f32 -1.442695, %v929_v15  ;;  %v1973_v15 = vld [vmem:[%s2669_s5 + $0x8] sm:$0xff] }
 0x7b1   :  { %2046 = vrcp.f32 %v850_v18  ;;  %1088 = vmatpush.bf16.msra.mxu3 %v1973_v15 }
 0x7b2   :  { %2048 = vpow2.f32 %v1849_v38 }
 0x7b5   :  { %v927_v45 = vpop.f32.mrf.mxu3  ;;  %1089 = vmatpush.bf16.msra.mxu3 %v1972_v16 }
 0x7b6   :  { %v2045_v17 = vpop.eup %2044 }
 0x7b7   :  { %952 = vrot.lane.b32.xlu0 %v2045_v17, %s2123_s1  ;;  %v2047_v19 = vpop.eup %2046 }
 0x7b8   :  { %v852_v20 = vmul.f32 %v2047_v19, %v850_v18  ;;  %vm857_vm12 = vweird.f32 %v2047_v19  ;;  %v2049_v39 = vpop.eup %2048 }
 0x7b9   :  { %vm858_vm14 = vmor %vm856_vm13, %vm857_vm12  ;;  %v933_v44 = vadd.f32 1.0, %v2049_v39 }
 0x7ba   :  { %v853_v22 = vsub.f32 1.0, %v852_v20 }
 0x7bb   :  { %2050 = vrcp.f32 %v933_v44  ;;  %v945_v52 = vand.u32 2147483648, %v933_v44  ;;  %vm939_vm3 = vweird.f32 %v933_v44  ;;  %v943_v53 = vand.u32 2147483647, %v933_v44 }
 0x7bc   :  { %v854_v23 = vmul.f32 %v2047_v19, %v853_v22 }
 0x7bd   :  { %v946_v57 = vor.u32 1.1754944e-38, %v945_v52  ;;  %vm944_vm5 = vcmp.eq.f32.partialorder %v943_v53, 8.507059e+37 }
 0x7be   :  { %v855_v25 = vadd.f32 %v2047_v19, %v854_v23 }
 0x7c0   :  { %v859_v43 = vsel %vm858_vm14, %v2047_v19, %v855_v25 }
 0x7c1   :  { %v864_v34 = vsel %vm861_vm15, %v863_v30, %v859_v43  ;;  %v2051_v46 = vpop.eup %2050 }
 0x7c2   :  { %v935_v21 = vmul.f32 %v2051_v46, %v933_v44  ;;  %vm940_vm2 = vweird.f32 %v2051_v46  ;;  %v867_v61 = vmul.f32 %v864_v34, %v2345_v51 }
 0x7c3   :  { %vm941_vm4 = vmor %vm939_vm3, %vm940_vm2 }
 0x7c4   :  { %v936_v49 = vsub.f32 1.0, %v935_v21 }
 0x7c6   :  { %v937_v50 = vmul.f32 %v2051_v46, %v936_v49 }
 0x7c8   :  { %v938_v27 = vadd.f32 %v2051_v46, %v937_v50 }
 0x7ca   :  { %v942_v55 = vsel %vm941_vm4, %v2051_v46, %v938_v27 }
 0x7cb   :  { %v947_v58 = vsel %vm944_vm5, %v946_v57, %v942_v55 }
 0x7cc   :  { %v950_v0 = vmul.f32 %v947_v58, %v2350_v56  ;;  %v1971_v56 = vld [vmem:[%s2664_s4 + $0x8] sm:$0xff] }
 0x7cd   :  { %1005 = vmatpush.bf16.msra.mxu2 %v1971_v56 }
 0x7d1   :  { %1006 = vmatpush.bf16.msra.mxu2 %v1970_v8 }
 0x7d8   :  { %v870_v31 = vpop.permute.xlu2 %869 }
 0x7d9   :  { %v872_v36 = vmul.f32 %v870_v31, %v864_v34 }
 0x7db   :  { %874 = vrot.lane.b32.xlu1 %v872_v36, %s2122_s16 }
 0x829   :  { %v953_v35 = vpop.permute.xlu0 %952 }
 0x82a   :  { %v955_v60 = vmul.f32 %v953_v35, %v947_v58 }
 0x82c   :  { %957 = vrot.lane.b32.xlu2 %v955_v60, %s2122_s16  ;;  %v181_v18 = vpop.f32.mrf.mxu0 }
 0x82d   :  { %v182_v19 = vadd.f32 %v2242_v24, %v181_v18 }
 0x84d   :  { %v875_v41 = vpop.permute.xlu1 %874 }
 0x84e   :  { %v2383_v62 = vadd.f32 %v875_v41, %v867_v61 }
 0x850   :  { %2052 = vtanh.f32 %v2383_v62 }
 0x856   :  { %v2053_v63 = vpop.eup %2052 }
 0x857   :  { %880 = vrot.lane.b32.xlu0 %v2053_v63, %s2123_s1 }
 0x886   :  { %v958_v2 = vpop.permute.xlu2 %957 }
 0x887   :  { %v2388_v3 = vadd.f32 %v958_v2, %v950_v0 }
 0x889   :  { %2054 = vtanh.f32 %v2388_v3 }
 0x88f   :  { %v2055_v4 = vpop.eup %2054 }
 0x890   :  { %963 = vrot.lane.b32.xlu1 %v2055_v4, %s2123_s1 }
 0x8c9   :  { %v881_v5 = vpop.permute.xlu0 %880 }
 0x8ca   :  { %v883_v51 = vmul.f32 %v881_v5, %v864_v34 }
 0x8cc   :  { %v2392_v6 = vpack.c.bf16 %v883_v51, %v883_v51 }
 0x8ce   :  { %v980_v7 = vunpack.c.l.b16 %v2392_v6 }
 0x8d0   :  { %v981_v47 = vpack.c.b16 %v980_v7, %v980_v7 }
 0x8d2   :  { %982 = vrot.lane.b32.xlu2 %v981_v47, %s2122_s16 }
 0x902   :  { %v964_v9 = vpop.permute.xlu1 %963 }
 0x903   :  { %v966_v10 = vmul.f32 %v964_v9, %v947_v58 }
 0x905   :  { %v2402_v11 = vpack.c.bf16 %v966_v10, %v966_v10 }
 0x907   :  { %v1063_v12 = vunpack.c.l.b16 %v2402_v11 }
 0x909   :  { %v1064_v13 = vpack.c.b16 %v1063_v12, %v1063_v12 }
 0x90b   :  { %1065 = vrot.lane.b32.xlu0 %v1064_v13, %s2122_s16 }
 0x92c   :  { %v983_v45 = vpop.permute.xlu2 %982 }
 0x92d   :  { %1859 = vmatmul.msk.bf16.vlgmr.msra.gmra.mxu2 %vm72_vm0, %v983_v45 }
 0x97d   :  { %v1066_v17 = vpop.permute.xlu0 %1065 }
 0x97e   :  { %1870 = vmatmul.msk.bf16.vlgmr.msra.gmra.mxu3 %vm72_vm0, %v1066_v17 }
 0x9b0   :  { %v1008_v20 = vpop.f32.mrf.mxu2 }
 0x9b1   :  { %v1012_v22 = vadd.f32 %v1008_v20, %v182_v19  ;;  %v1977_v20 = vld [vmem:[%s2669_s5 + $0x8] sm:$0xff] }
 0x9b2   :  { %1254 = vmatpush.bf16.msrb.mxu1 %v1977_v20 }
 0x9b3   :  { %2056 = vtanh.f32 %v1012_v22  ;;  %v1860_v26 = vmul.f32 -1.442695, %v1012_v22  ;;  %v1975_v22 = vld [vmem:[%s2664_s4 + $0x8] sm:$0xff] }
 0x9b4   :  { %1171 = vmatpush.bf16.msrb.mxu0 %v1975_v22 }
 0x9b5   :  { %2058 = vpow2.f32 %v1860_v26 }
 0x9b8   :  { %v1010_v23 = vpop.f32.mrf.mxu2 }
 0x9b9   :  { %v2057_v25 = vpop.eup %2056  ;;  %v1974_v23 = vld [vmem:[%s2664_s4] sm:$0xff] }
 0x9ba   :  { %1035 = vrot.lane.b32.xlu1 %v2057_v25, %s2123_s1  ;;  %1172 = vmatpush.bf16.msrb.mxu0 %v1974_v23 }
 0x9bb   :  { %v2059_v30 = vpop.eup %2058 }
 0x9bc   :  { %v1016_v36 = vadd.f32 1.0, %v2059_v30 }
 0x9be   :  { %v1028_v49 = vand.u32 2147483648, %v1016_v36  ;;  %vm1022_vm7 = vweird.f32 %v1016_v36  ;;  %v1026_v50 = vand.u32 2147483647, %v1016_v36 }
 0x9c0   :  { %v1029_v27 = vor.u32 1.1754944e-38, %v1028_v49  ;;  %vm1027_vm9 = vcmp.eq.f32.partialorder %v1026_v50, 8.507059e+37 }
 0xa01   :  { %v1091_v28 = vpop.f32.mrf.mxu3 }
 0xa02   :  { %v1095_v43 = vadd.f32 %v1091_v28, %v2255_v40 }
 0xa04   :  { %2060 = vtanh.f32 %v1095_v43  ;;  %v1871_v57 = vmul.f32 -1.442695, %v1095_v43 }
 0xa05   :  { %2062 = vrcp.f32 %v1016_v36 }
 0xa06   :  { %2064 = vpow2.f32 %v1871_v57 }
 0xa09   :  { %v1093_v31 = vpop.f32.mrf.mxu3 }
 0xa0a   :  { %v2061_v34 = vpop.eup %2060  ;;  %v1976_v31 = vld [vmem:[%s2669_s5] sm:$0xff] }
 0xa0b   :  { %1118 = vrot.lane.b32.xlu2 %v2061_v34, %s2123_s1  ;;  %v2063_v38 = vpop.eup %2062  ;;  %1255 = vmatpush.bf16.msrb.mxu1 %v1976_v31 }
 0xa0c   :  { %v1018_v39 = vmul.f32 %v2063_v38, %v1016_v36  ;;  %vm1023_vm6 = vweird.f32 %v2063_v38  ;;  %v2065_v58 = vpop.eup %2064 }
 0xa0d   :  { %vm1024_vm8 = vmor %vm1022_vm7, %vm1023_vm6  ;;  %v1099_v35 = vadd.f32 1.0, %v2065_v58 }
 0xa0e   :  { %v1019_v44 = vsub.f32 1.0, %v1018_v39 }
 0xa0f   :  { %2066 = vrcp.f32 %v1099_v35  ;;  %v1111_v2 = vand.u32 2147483648, %v1099_v35  ;;  %vm1105_vm11 = vweird.f32 %v1099_v35  ;;  %v1109_v4 = vand.u32 2147483647, %v1099_v35 }
 0xa10   :  { %v1020_v46 = vmul.f32 %v2063_v38, %v1019_v44 }
 0xa11   :  { %v1112_v51 = vor.u32 1.1754944e-38, %v1111_v2  ;;  %vm1110_vm13 = vcmp.eq.f32.partialorder %v1109_v4, 8.507059e+37 }
 0xa12   :  { %v1021_v21 = vadd.f32 %v2063_v38, %v1020_v46 }
 0xa14   :  { %v1025_v40 = vsel %vm1024_vm8, %v2063_v38, %v1021_v21  ;;  %v183_v38 = vpop.f32.mrf.mxu0 }
 0xa15   :  { %v1030_v53 = vsel %vm1027_vm9, %v1029_v27, %v1025_v40  ;;  %v2067_v60 = vpop.eup %2066  ;;  %v184_v46 = vadd.f32 %v2242_v24, %v183_v38 }
 0xa16   :  { %v1101_v61 = vmul.f32 %v2067_v60, %v1099_v35  ;;  %vm1106_vm10 = vweird.f32 %v2067_v60  ;;  %v1033_v8 = vmul.f32 %v1030_v53, %v2383_v62 }
 0xa17   :  { %vm1107_vm12 = vmor %vm1105_vm11, %vm1106_vm10 }
 0xa18   :  { %v1102_v41 = vsub.f32 1.0, %v1101_v61 }
 0xa1a   :  { %v1103_v63 = vmul.f32 %v2067_v60, %v1102_v41 }
 0xa1c   :  { %v1104_v0 = vadd.f32 %v2067_v60, %v1103_v63 }
 0xa1e   :  { %v1108_v5 = vsel %vm1107_vm12, %v2067_v60, %v1104_v0 }
 0xa1f   :  { %v1113_v47 = vsel %vm1110_vm13, %v1112_v51, %v1108_v5 }
 0xa20   :  { %v1116_v13 = vmul.f32 %v1113_v47, %v2388_v3  ;;  %v1941_v3 = vld [vmem:[%s2666_s0 + $0x18] sm:$0xff] }
 0xa21   :  { %1727 = vmatmul.msk.bf16.gmra.mxu0 %vm149_vm1, %v1941_v3 }
 0xa2c   :  { %v1036_v52 = vpop.permute.xlu1 %1035 }
 0xa2d   :  { %v1038_v55 = vmul.f32 %v1036_v52, %v1030_v53 }
 0xa2f   :  { %1040 = vrot.lane.b32.xlu0 %v1038_v55, %s2122_s16 }
 0xa65   :  { %v1119_v7 = vpop.permute.xlu2 %1118 }
 0xa66   :  { %v1121_v56 = vmul.f32 %v1119_v7, %v1113_v47 }
 0xa68   :  { %1123 = vrot.lane.b32.xlu1 %v1121_v56, %s2122_s16 }
 0xa9e   :  { %v2460_v39 = vpop.f32.mrf.mxu0 }
 0xaa1   :  { %v1041_v9 = vpop.permute.xlu0 %1040 }
 0xaa2   :  { %v2425_v10 = vadd.f32 %v1041_v9, %v1033_v8 }
 0xaa4   :  { %2068 = vtanh.f32 %v2425_v10 }
 0xaa6   :  { %v2462_v44 = vpop.f32.mrf.mxu0 }
 0xaaa   :  { %v2069_v12 = vpop.eup %2068 }
 0xaab   :  { %1046 = vrot.lane.b32.xlu2 %v2069_v12, %s2123_s1 }
 0xada   :  { %v1124_v14 = vpop.permute.xlu1 %1123 }
 0xadb   :  { %v2430_v15 = vadd.f32 %v1124_v14, %v1116_v13 }
 0xadd   :  { %2070 = vtanh.f32 %v2430_v15 }
 0xae3   :  { %v2071_v16 = vpop.eup %2070 }
 0xae4   :  { %1129 = vrot.lane.b32.xlu0 %v2071_v16, %s2123_s1 }
 0xb05   :  { %v1047_v45 = vpop.permute.xlu2 %1046 }
 0xb06   :  { %v1049_v62 = vmul.f32 %v1047_v45, %v1030_v53 }
 0xb08   :  { %v2434_v17 = vpack.c.bf16 %v1049_v62, %v1049_v62 }
 0xb0a   :  { %v1146_v18 = vunpack.c.l.b16 %v2434_v17 }
 0xb0c   :  { %v1147_v19 = vpack.c.b16 %v1146_v18, %v1146_v18 }
 0xb0e   :  { %1148 = vrot.lane.b32.xlu1 %v1147_v19, %s2122_s16 }
 0xb56   :  { %v1130_v25 = vpop.permute.xlu0 %1129 }
 0xb57   :  { %v1132_v26 = vmul.f32 %v1130_v25, %v1113_v47 }
 0xb59   :  { %v2451_v28 = vpack.c.bf16 %v1132_v26, %v1132_v26 }
 0xb5b   :  { %v1229_v43 = vunpack.c.l.b16 %v2451_v28 }
 0xb5d   :  { %v1230_v30 = vpack.c.b16 %v1229_v43, %v1229_v43 }
 0xb5f   :  { %1231 = vrot.lane.b32.xlu2 %v1230_v30, %s2122_s16 }
 0xb80   :  { %v1149_v34 = vpop.permute.xlu1 %1148 }
 0xb81   :  { %1881 = vmatmul.msk.bf16.vlgmr.msrb.gmra.mxu0 %vm72_vm0, %v1149_v34 }
 0xbb9   :  { %v1232_v36 = vpop.permute.xlu2 %1231 }
 0xbba   :  { %1892 = vmatmul.msk.bf16.vlgmr.msrb.gmra.mxu1 %vm72_vm0, %v1232_v36 }
 0xbfe   :  { %v1174_v21 = vpop.f32.mrf.mxu0 }
 0xbff   :  { %v1178_v49 = vadd.f32 %v1174_v21, %v184_v46 }
 0xc01   :  { %2072 = vtanh.f32 %v1178_v49  ;;  %v1882_v57 = vmul.f32 -1.442695, %v1178_v49 }
 0xc06   :  { %v1176_v50 = vpop.f32.mrf.mxu0 }
 0xc07   :  { %v2073_v40 = vpop.eup %2072  ;;  %v1978_v50 = vld [vmem:[%s2664_s4] sm:$0xff] }
 0xc08   :  { %1201 = vrot.lane.b32.xlu0 %v2073_v40, %s2123_s1 }
 0xc37   :  { %v1257_v27 = vpop.f32.mrf.mxu1 }
 0xc38   :  { %v1261_v52 = vadd.f32 %v1257_v27, %v2253_v37 }
 0xc3a   :  { %2074 = vtanh.f32 %v1261_v52  ;;  %v1893_v47 = vmul.f32 -1.442695, %v1261_v52 }
 0xc3b   :  { %2076 = vpow2.f32 %v1882_v57  ;;  %v1981_v57 = vld [vmem:[%s2669_s5 + $0x8] sm:$0xff] }
 0xc3c   :  { %1420 = vmatpush.bf16.msrb.mxu3 %v1981_v57 }
 0xc3f   :  { %v1259_v53 = vpop.f32.mrf.mxu1 }
 0xc40   :  { %v2075_v55 = vpop.eup %2074 }
 0xc41   :  { %1284 = vrot.lane.b32.xlu1 %v2075_v55, %s2123_s1  ;;  %v2077_v58 = vpop.eup %2076 }
 0xc42   :  { %v1182_v35 = vadd.f32 1.0, %v2077_v58  ;;  %v1980_v58 = vld [vmem:[%s2669_s5] sm:$0xff] }
 0xc43   :  { %1421 = vmatpush.bf16.msrb.mxu3 %v1980_v58 }
 0xc44   :  { %2078 = vrcp.f32 %v1182_v35  ;;  %v1194_v0 = vand.u32 2147483648, %v1182_v35  ;;  %vm1188_vm14 = vweird.f32 %v1182_v35  ;;  %v1192_v2 = vand.u32 2147483647, %v1182_v35 }
 0xc45   :  { %2080 = vpow2.f32 %v1893_v47 }
 0xc46   :  { %v1195_v4 = vor.u32 1.1754944e-38, %v1194_v0  ;;  %vm1193_vm2 = vcmp.eq.f32.partialorder %v1192_v2, 8.507059e+37 }
 0xc4a   :  { %v2079_v24 = vpop.eup %2078 }
 0xc4b   :  { %v1184_v60 = vmul.f32 %v2079_v24, %v1182_v35  ;;  %vm1189_vm1 = vweird.f32 %v2079_v24  ;;  %v2081_v56 = vpop.eup %2080 }
 0xc4c   :  { %vm1190_vm15 = vmor %vm1188_vm14, %vm1189_vm1  ;;  %v1265_v8 = vadd.f32 1.0, %v2081_v56 }
 0xc4d   :  { %v1185_v61 = vsub.f32 1.0, %v1184_v60  ;;  %v2505_v60 = vld [vmem:[%s2665_s6] ss:$0 sm:$0xff] }
 0xc4e   :  { %2082 = vrcp.f32 %v1265_v8  ;;  %v1277_v45 = vand.u32 2147483648, %v1265_v8  ;;  %vm1271_vm4 = vweird.f32 %v1265_v8  ;;  %v1275_v62 = vand.u32 2147483647, %v1265_v8 }
 0xc4f   :  { %v1186_v41 = vmul.f32 %v2079_v24, %v1185_v61  ;;  %v187_v61 = vadd.f32 %v2505_v60, %v2460_v39 }
 0xc50   :  { %v1278_v19 = vor.u32 1.1754944e-38, %v1277_v45  ;;  %vm1276_vm6 = vcmp.eq.f32.partialorder %v1275_v62, 8.507059e+37 }
 0xc51   :  { %v1187_v63 = vadd.f32 %v2079_v24, %v1186_v41 }
 0xc53   :  { %v1191_v37 = vsel %vm1190_vm15, %v2079_v24, %v1187_v63 }
 0xc54   :  { %v1196_v5 = vsel %vm1193_vm2, %v1195_v4, %v1191_v37  ;;  %v2083_v9 = vpop.eup %2082 }
 0xc55   :  { %v1267_v12 = vmul.f32 %v2083_v9, %v1265_v8  ;;  %vm1272_vm3 = vweird.f32 %v2083_v9  ;;  %v1199_v23 = vmul.f32 %v1196_v5, %v2425_v10 }
 0xc56   :  { %vm1273_vm5 = vmor %vm1271_vm4, %vm1272_vm3 }
 0xc57   :  { %v1268_v13 = vsub.f32 1.0, %v1267_v12 }
 0xc59   :  { %v1269_v14 = vmul.f32 %v2083_v9, %v1268_v13 }
 0xc5b   :  { %v1270_v16 = vadd.f32 %v2083_v9, %v1269_v14 }
 0xc5d   :  { %v1274_v18 = vsel %vm1273_vm5, %v2083_v9, %v1270_v16 }
 0xc5e   :  { %v1279_v20 = vsel %vm1276_vm6, %v1278_v19, %v1274_v18 }
 0xc5f   :  { %v1282_v30 = vmul.f32 %v1279_v20, %v2430_v15  ;;  %v1979_v15 = vld [vmem:[%s2664_s4 + $0x8] sm:$0xff] }
 0xc60   :  { %1337 = vmatpush.bf16.msrb.mxu2 %v1979_v15 }
 0xc64   :  { %1338 = vmatpush.bf16.msrb.mxu2 %v1978_v50 }
 0xc7a   :  { %v1202_v51 = vpop.permute.xlu0 %1201 }
 0xc7b   :  { %v1204_v7 = vmul.f32 %v1202_v51, %v1196_v5 }
 0xc7d   :  { %1206 = vrot.lane.b32.xlu2 %v1204_v7, %s2122_s16 }
 0xcb3   :  { %v1285_v3 = vpop.permute.xlu1 %1284 }
 0xcb4   :  { %v1287_v22 = vmul.f32 %v1285_v3, %v1279_v20 }
 0xcb6   :  { %1289 = vrot.lane.b32.xlu0 %v1287_v22, %s2122_s16 }
 0xcd7   :  { %v1207_v25 = vpop.permute.xlu2 %1206 }
 0xcd8   :  { %v2471_v26 = vadd.f32 %v1207_v25, %v1199_v23 }
 0xcda   :  { %2084 = vtanh.f32 %v2471_v26 }
 0xce0   :  { %v2085_v43 = vpop.eup %2084 }
 0xce1   :  { %1212 = vrot.lane.b32.xlu1 %v2085_v43, %s2123_s1 }
 0xd28   :  { %v1290_v31 = vpop.permute.xlu0 %1289 }
 0xd29   :  { %v2476_v34 = vadd.f32 %v1290_v31, %v1282_v30 }
 0xd2b   :  { %2086 = vtanh.f32 %v2476_v34 }
 0xd31   :  { %v2087_v36 = vpop.eup %2086 }
 0xd32   :  { %1295 = vrot.lane.b32.xlu2 %v2087_v36, %s2123_s1 }
 0xd53   :  { %v1213_v38 = vpop.permute.xlu1 %1212 }
 0xd54   :  { %v1215_v10 = vmul.f32 %v1213_v38, %v1196_v5 }
 0xd56   :  { %v2480_v46 = vpack.c.bf16 %v1215_v10, %v1215_v10 }
 0xd58   :  { %v1312_v21 = vunpack.c.l.b16 %v2480_v46 }
 0xd5a   :  { %v1313_v49 = vpack.c.b16 %v1312_v21, %v1312_v21 }
 0xd5c   :  { %1314 = vrot.lane.b32.xlu0 %v1313_v49, %s2122_s16 }
 0xd8c   :  { %v1296_v40 = vpop.permute.xlu2 %1295 }
 0xd8d   :  { %v1298_v27 = vmul.f32 %v1296_v40, %v1279_v20 }
 0xd8f   :  { %v2490_v52 = vpack.c.bf16 %v1298_v27, %v1298_v27 }
 0xd91   :  { %v1395_v53 = vunpack.c.l.b16 %v2490_v52 }
 0xd93   :  { %v1396_v55 = vpack.c.b16 %v1395_v53, %v1395_v53 }
 0xd95   :  { %1397 = vrot.lane.b32.xlu1 %v1396_v55, %s2122_s16 }
 0xdce   :  { %v1315_v35 = vpop.permute.xlu0 %1314 }
 0xdcf   :  { %1903 = vmatmul.msk.bf16.vlgmr.msrb.gmra.mxu2 %vm72_vm0, %v1315_v35 }
 0xe07   :  { %v1398_v24 = vpop.permute.xlu1 %1397 }
 0xe08   :  { %1914 = vmatmul.msk.bf16.vlgmr.msrb.gmra.mxu3 %vm72_vm0, %v1398_v24 }
 0xe52   :  { %v1340_v41 = vpop.f32.mrf.mxu2 }
 0xe53   :  { %v1344_v63 = vadd.f32 %v1340_v41, %v187_v61 }
 0xe55   :  { %2088 = vtanh.f32 %v1344_v63  ;;  %v1904_v37 = vmul.f32 -1.442695, %v1344_v63 }
 0xe57   :  { %2090 = vpow2.f32 %v1904_v37 }
 0xe5a   :  { %v1342_v0 = vpop.f32.mrf.mxu2 }
 0xe5b   :  { %v2089_v2 = vpop.eup %2088 }
 0xe5c   :  { %1367 = vrot.lane.b32.xlu2 %v2089_v2, %s2123_s1  ;;  %v1982_v2 = vld [vmem:[%s2664_s4] sm:$0xff] }
 0xe5d   :  { %v2091_v51 = vpop.eup %2090 }
 0xe5e   :  { %v1348_v56 = vadd.f32 1.0, %v2091_v51 }
 0xe60   :  { %v1360_v14 = vand.u32 2147483648, %v1348_v56  ;;  %vm1354_vm8 = vweird.f32 %v1348_v56  ;;  %v1358_v16 = vand.u32 2147483647, %v1348_v56 }
 0xe62   :  { %v1361_v45 = vor.u32 1.1754944e-38, %v1360_v14  ;;  %vm1359_vm10 = vcmp.eq.f32.partialorder %v1358_v16, 8.507059e+37 }
 0xe8b   :  { %v1423_v4 = vpop.f32.mrf.mxu3 }
 0xe8c   :  { %v1427_v5 = vadd.f32 %v1423_v4, %v2250_v33 }
 0xe8e   :  { %2092 = vtanh.f32 %v1427_v5  ;;  %v1915_v3 = vmul.f32 -1.442695, %v1427_v5 }
 0xe8f   :  { %2094 = vrcp.f32 %v1348_v56 }
 0xe90   :  { %2096 = vpow2.f32 %v1915_v3 }
 0xe93   :  { %v1425_v7 = vpop.f32.mrf.mxu3 }
 0xe94   :  { %v2093_v47 = vpop.eup %2092 }
 0xe95   :  { %1450 = vrot.lane.b32.xlu0 %v2093_v47, %s2123_s1  ;;  %v2095_v39 = vpop.eup %2094  ;;  %v1985_v47 = vld [vmem:[%s2669_s5 + $0x8] sm:$0xff] }
 0xe96   :  { %v1350_v8 = vmul.f32 %v2095_v39, %v1348_v56  ;;  %vm1355_vm7 = vweird.f32 %v2095_v39  ;;  %v2097_v20 = vpop.eup %2096  ;;  %1585 = vmatpush.bf16.msra.mxu1 %v1985_v47  ;;  %v1984_v56 = vld [vmem:[%s2669_s5] sm:$0xff] }
 0xe97   :  { %vm1356_vm9 = vmor %vm1354_vm8, %vm1355_vm7  ;;  %v1431_v22 = vadd.f32 1.0, %v2097_v20  ;;  %vm390_vm8 = vcmask 257024  }
 0xe98   :  { %v1351_v9 = vsub.f32 1.0, %v1350_v8 }
 0xe99   :  { %2098 = vrcp.f32 %v1431_v22  ;;  %v1443_v36 = vand.u32 2147483648, %v1431_v22  ;;  %vm1437_vm12 = vweird.f32 %v1431_v22  ;;  %v1441_v38 = vand.u32 2147483647, %v1431_v22 }
 0xe9a   :  { %v1352_v12 = vmul.f32 %v2095_v39, %v1351_v9  ;;  %1586 = vmatpush.bf16.msra.mxu1 %v1984_v56  ;;  %v189_v9 = vadd.f32 %v2505_v60, %v2462_v44 }
 0xe9b   :  { %v1444_v21 = vor.u32 1.1754944e-38, %v1443_v36  ;;  %vm1442_vm1 = vcmp.eq.f32.partialorder %v1441_v38, 8.507059e+37 }
 0xe9c   :  { %v1353_v13 = vadd.f32 %v2095_v39, %v1352_v12 }
 0xe9e   :  { %v1357_v33 = vsel %vm1356_vm9, %v2095_v39, %v1353_v13 }
 0xe9f   :  { %v1362_v18 = vsel %vm1359_vm10, %v1361_v45, %v1357_v33  ;;  %v2099_v23 = vpop.eup %2098 }
 0xea0   :  { %v1433_v25 = vmul.f32 %v2099_v23, %v1431_v22  ;;  %vm1438_vm11 = vweird.f32 %v2099_v23  ;;  %v1365_v40 = vmul.f32 %v1362_v18, %v2471_v26 }
 0xea1   :  { %vm1439_vm13 = vmor %vm1437_vm12, %vm1438_vm11 }
 0xea2   :  { %v1434_v43 = vsub.f32 1.0, %v1433_v25 }
 0xea4   :  { %v1435_v30 = vmul.f32 %v2099_v23, %v1434_v43 }
 0xea6   :  { %v1436_v31 = vadd.f32 %v2099_v23, %v1435_v30 }
 0xea8   :  { %v1440_v10 = vsel %vm1439_vm13, %v2099_v23, %v1436_v31 }
 0xea9   :  { %v1445_v49 = vsel %vm1442_vm1, %v1444_v21, %v1440_v10 }
 0xeaa   :  { %v1448_v57 = vmul.f32 %v1445_v49, %v2476_v34  ;;  %v1983_v34 = vld [vmem:[%s2664_s4 + $0x8] sm:$0xff] }
 0xeab   :  { %1503 = vmatpush.bf16.msra.mxu0 %v1983_v34 }
 0xeaf   :  { %1504 = vmatpush.bf16.msra.mxu0 %v1982_v2 }
 0xeb6   :  { %v1368_v62 = vpop.permute.xlu2 %1367 }
 0xeb7   :  { %v1370_v19 = vmul.f32 %v1368_v62, %v1362_v18 }
 0xeb9   :  { %1372 = vrot.lane.b32.xlu1 %v1370_v19, %s2122_s16 }
 0xf07   :  { %v1451_v15 = vpop.permute.xlu0 %1450 }
 0xf08   :  { %v1453_v50 = vmul.f32 %v1451_v15, %v1445_v49 }
 0xf0a   :  { %1455 = vrot.lane.b32.xlu2 %v1453_v50, %s2122_s16 }
 0xf2b   :  { %v1373_v27 = vpop.permute.xlu1 %1372 }
 0xf2c   :  { %v2515_v53 = vadd.f32 %v1373_v27, %v1365_v40 }
 0xf2e   :  { %2100 = vtanh.f32 %v2515_v53 }
 0xf34   :  { %v2101_v55 = vpop.eup %2100 }
 0xf35   :  { %1378 = vrot.lane.b32.xlu0 %v2101_v55, %s2123_s1 }
 0xf64   :  { %v1456_v58 = vpop.permute.xlu2 %1455 }
 0xf65   :  { %v2520_v35 = vadd.f32 %v1456_v58, %v1448_v57 }
 0xf67   :  { %2102 = vtanh.f32 %v2520_v35 }
 0xf6d   :  { %v2103_v24 = vpop.eup %2102 }
 0xf6e   :  { %1461 = vrot.lane.b32.xlu1 %v2103_v24, %s2123_s1 }
 0xfa7   :  { %v1379_v61 = vpop.permute.xlu0 %1378 }
 0xfa8   :  { %v1381_v26 = vmul.f32 %v1379_v61, %v1362_v18 }
 0xfaa   :  { %v2524_v41 = vpack.c.bf16 %v1381_v26, %v1381_v26 }
 0xfac   :  { %v1478_v63 = vunpack.c.l.b16 %v2524_v41 }
 0xfae   :  { %v1479_v0 = vpack.c.b16 %v1478_v63, %v1478_v63 }
 0xfb0   :  { %1480 = vrot.lane.b32.xlu2 %v1479_v0, %s2122_s16 }
 0xfe0   :  { %v1462_v37 = vpop.permute.xlu1 %1461 }
 0xfe1   :  { %v1464_v4 = vmul.f32 %v1462_v37, %v1445_v49 }
 0xfe3   :  { %v2534_v5 = vpack.c.bf16 %v1464_v4, %v1464_v4 }
 0xfe5   :  { %v1560_v51 = vunpack.c.l.b16 %v2534_v5 }
 0xfe7   :  { %v1561_v7 = vpack.c.b16 %v1560_v51, %v1560_v51 }
 0xfe9   :  { %1562 = vrot.lane.b32.xlu0 %v1561_v7, %s2122_s16 }
0x100a   :  { %v1481_v39 = vpop.permute.xlu2 %1480 }
0x100b   :  { %1925 = vmatmul.msk.bf16.vlgmr.msra.gmra.mxu0 %vm72_vm0, %v1481_v39 }
0x105b   :  { %v1563_v8 = vpop.permute.xlu0 %1562 }
0x105c   :  { %1936 = vmatmul.msk.bf16.vlgmr.msra.gmra.mxu1 %vm72_vm0, %v1563_v8 }
0x1088   :  { %v1506_v12 = vpop.f32.mrf.mxu0 }
0x1089   :  { %v1510_v13 = vadd.f32 %v1506_v12, %v189_v9 }
0x108b   :  { %2104 = vtanh.f32 %v1510_v13  ;;  %v1926_v33 = vmul.f32 -1.442695, %v1510_v13 }
0x108d   :  { %2106 = vpow2.f32 %v1926_v33 }
0x1090   :  { %v1508_v14 = vpop.f32.mrf.mxu0 }
0x1091   :  { %v2105_v16 = vpop.eup %2104 }
0x1092   :  { %1533 = vrot.lane.b32.xlu1 %v2105_v16, %s2123_s1 }
0x1093   :  { %v2107_v18 = vpop.eup %2106 }
0x1094   :  { %v1514_v20 = vadd.f32 1.0, %v2107_v18 }
0x1096   :  { %v1526_v43 = vand.u32 2147483648, %v1514_v20  ;;  %vm1520_vm15 = vweird.f32 %v1514_v20 }
0x1098   :  { %v1527_v31 = vor.u32 1.1754944e-38, %v1526_v43 }
0x10d9   :  { %v1588_v45 = vpop.f32.mrf.mxu1 }
0x10da   :  { %v1592_v62 = vadd.f32 %v1588_v45, %v2248_v29  ;;  %v1524_v29 = vand.u32 2147483647, %v1514_v20 }
0x10dc   :  { %2108 = vtanh.f32 %v1592_v62  ;;  %vm1525_vm3 = vcmp.eq.f32.partialorder %v1524_v29, 8.507059e+37 }
0x10dd   :  { %2110 = vrcp.f32 %v1514_v20 }
0x10e1   :  { %v1590_v19 = vpop.f32.mrf.mxu1 }
0x10e2   :  { %v2109_v3 = vpop.eup %2108 }
0x10e3   :  { %1615 = vrot.lane.b32.xlu2 %v2109_v3, %s2123_s1  ;;  %v2111_v44 = vpop.eup %2110 }
0x10e4   :  { %v1516_v60 = vmul.f32 %v2111_v44, %v1514_v20  ;;  %vm1521_vm14 = vweird.f32 %v2111_v44 }
0x10e5   :  { %vm1522_vm2 = vmor %vm1520_vm15, %vm1521_vm14 }
0x10e6   :  { %v1517_v22 = vsub.f32 1.0, %v1516_v60 }
0x10e8   :  { %v1518_v23 = vmul.f32 %v2111_v44, %v1517_v22 }
0x10ea   :  { %v1519_v25 = vadd.f32 %v2111_v44, %v1518_v23 }
0x10eb   :  { %471 = vrot.lane.b32.xlu2 %v2284_v42, %s2122_s16  ;;  %v1937_v42 = vmul.f32 -1.442695, %v1592_v62 }
0x10ec   :  { %v1523_v30 = vsel %vm1522_vm2, %v2111_v44, %v1519_v25 }
0x10ed   :  { %v2553_v38 = vsel %vm1525_vm3, %v1527_v31, %v1523_v30  ;;  %2112 = vpow2.f32 %v1937_v42 }
0x10ee   :  { %v1531_v2 = vmul.f32 %v2553_v38, %v2515_v53 }
0x10f3   :  { %v2113_v21 = vpop.eup %2112 }
0x10f4   :  { %v1596_v49 = vadd.f32 1.0, %v2113_v21 }
0x10f6   :  { %2114 = vrcp.f32 %v1596_v49  ;;  %v1608_v57 = vand.u32 2147483648, %v1596_v49  ;;  %vm1602_vm5 = vweird.f32 %v1596_v49  ;;  %v1606_v58 = vand.u32 2147483647, %v1596_v49 }
0x10f8   :  { %v1609_v61 = vor.u32 1.1754944e-38, %v1608_v57  ;;  %vm1607_vm7 = vcmp.eq.f32.partialorder %v1606_v58, 8.507059e+37 }
0x10fc   :  { %v2115_v15 = vpop.eup %2114 }
0x10fd   :  { %v1598_v50 = vmul.f32 %v2115_v15, %v1596_v49  ;;  %vm1603_vm4 = vweird.f32 %v2115_v15 }
0x10fe   :  { %vm1604_vm6 = vmor %vm1602_vm5, %vm1603_vm4 }
0x10ff   :  { %v1599_v40 = vsub.f32 1.0, %v1598_v50 }
0x1101   :  { %v1600_v27 = vmul.f32 %v2115_v15, %v1599_v40 }
0x1103   :  { %v1601_v55 = vadd.f32 %v2115_v15, %v1600_v27 }
0x1104   :  { %v1534_v36 = vpop.permute.xlu1 %1533 }
0x1105   :  { %v1536_v10 = vmul.f32 %v1534_v36, %v2553_v38  ;;  %v1605_v24 = vsel %vm1604_vm6, %v2115_v15, %v1601_v55 }
0x1106   :  { %v1610_v63 = vsel %vm1607_vm7, %v1609_v61, %v1605_v24 }
0x1107   :  { %1538 = vrot.lane.b32.xlu0 %v1536_v10, %s2122_s16 }
0x113d   :  { %v1616_v26 = vpop.permute.xlu2 %1615 }
0x113e   :  { %v1618_v0 = vmul.f32 %v1616_v26, %v1610_v63 }
0x1140   :  { %1620 = vrot.lane.b32.xlu1 %v1618_v0, %s2122_s16 }
0x1145   :  { %v472_v34 = vpop.permute.xlu2 %471 }
0x1146   :  { %1784 = vst.msk [vmem:[%s2670_s9 + $0x1c] sm:$0xf] %vm390_vm8, %v472_v34 }
0x1148   :  { %387 = vrot.lane.b32.xlu1 %v2274_v32, %s2122_s16  ;;  %v1613_v32 = vmul.f32 %v1610_v63, %v2520_v35 }
0x1150   :  { %637 = vrot.lane.b32.xlu1 %v2322_v54, %s2122_s16 }
0x1158   :  { %886 = vrot.lane.b32.xlu1 %v2392_v6, %s2122_s16 }
0x1160   :  { %1135 = vrot.lane.b32.xlu1 %v2451_v28, %s2122_s16 }
0x1168   :  { %1384 = vrot.lane.b32.xlu1 %v2524_v41, %s2122_s16 }
0x1179   :  { %v1539_v37 = vpop.permute.xlu0 %1538 }
0x117a   :  { %v1541_v4 = vadd.f32 %v1539_v37, %v1531_v2 }
0x117c   :  { %2116 = vtanh.f32 %v1541_v4 }
0x1182   :  { %v2117_v51 = vpop.eup %2116 }
0x1183   :  { %1544 = vrot.lane.b32.xlu2 %v2117_v51, %s2123_s1 }
0x118b   :  { %720 = vrot.lane.b32.xlu2 %v2354_v59, %s2122_s16 }
0x1193   :  { %969 = vrot.lane.b32.xlu2 %v2402_v11, %s2122_s16 }
0x119b   :  { %1218 = vrot.lane.b32.xlu2 %v2480_v46, %s2122_s16 }
0x11a3   :  { %1467 = vrot.lane.b32.xlu2 %v2534_v5, %s2122_s16 }
0x11b2   :  { %v1621_v54 = vpop.permute.xlu1 %1620 }
0x11b3   :  { %v1623_v6 = vadd.f32 %v1621_v54, %v1613_v32 }
0x11b5   :  { %2118 = vtanh.f32 %v1623_v6 }
0x11ba   :  { %v388_v28 = vpop.permute.xlu1 %387 }
0x11bb   :  { %v2119_v53 = vpop.eup %2118  ;;  %391 = vst.msk [vmem:[%s2671_s8] sm:$0xf] %vm390_vm8, %v388_v28 }
0x11bc   :  { %1626 = vrot.lane.b32.xlu0 %v2119_v53, %s2123_s1 }
0x11c2   :  { %v638_v59 = vpop.permute.xlu1 %637 }
0x11c3   :  { %1806 = vst.msk [vmem:[%s2670_s9 + $0x18] sm:$0xf] %vm390_vm8, %v638_v59 }
0x11c4   :  { %554 = vrot.lane.b32.xlu0 %v2312_v48, %s2122_s16 }
0x11ca   :  { %v887_v11 = vpop.permute.xlu1 %886 }
0x11cb   :  { %1839 = vst.msk [vmem:[%s2671_s8 + $0xc] sm:$0xf] %vm390_vm8, %v887_v11 }
0x11cc   :  { %803 = vrot.lane.b32.xlu0 %v2364_v1, %s2122_s16 }
0x11d2   :  { %v1136_v46 = vpop.permute.xlu1 %1135 }
0x11d3   :  { %1872 = vst.msk [vmem:[%s2670_s9 + $0xc] sm:$0xf] %vm390_vm8, %v1136_v46 }
0x11d4   :  { %1052 = vrot.lane.b32.xlu0 %v2434_v17, %s2122_s16 }
0x11da   :  { %v1385_v35 = vpop.permute.xlu1 %1384 }
0x11db   :  { %1905 = vst.msk [vmem:[%s2671_s8 + $0x18] sm:$0xf] %vm390_vm8, %v1385_v35 }
0x11dc   :  { %1301 = vrot.lane.b32.xlu0 %v2490_v52, %s2122_s16 }
0x11dd   :  { %v1545_v48 = vpop.permute.xlu2 %1544 }
0x11de   :  { %v1547_v1 = vmul.f32 %v1545_v48, %v2553_v38 }
0x11e0   :  { %v1548_v41 = vpack.c.bf16 %v1547_v1, %v1547_v1  ;;  %1637 = vrot.lane.b32.xlu2 %v1547_v1, %s2122_s16 }
0x11e4   :  { %1550 = vrot.lane.b32.xlu0 %v1548_v41, %s2122_s16 }
0x11e5   :  { %v721_v5 = vpop.permute.xlu2 %720 }
0x11e6   :  { %1817 = vst.msk [vmem:[%s2671_s8 + $0x8] sm:$0xf] %vm390_vm8, %v721_v5 }
0x11e8   :  { %1652 = vrot.lane.b32.xlu2 %v1623_v6, %s2124_s27 }
0x11ec   :  { %1642 = vrot.lane.b32.xlu0 %v1541_v4, %s2124_s27 }
0x11ed   :  { %v970_v17 = vpop.permute.xlu2 %969 }
0x11ee   :  { %1850 = vst.msk [vmem:[%s2670_s9 + $0x10] sm:$0xf] %vm390_vm8, %v970_v17 }
0x11f5   :  { %v1219_v52 = vpop.permute.xlu2 %1218 }
0x11f6   :  { %1883 = vst.msk [vmem:[%s2671_s8 + $0x14] sm:$0xf] %vm390_vm8, %v1219_v52 }
0x11fd   :  { %v1468_v7 = vpop.permute.xlu2 %1467 }
0x11fe   :  { %1916 = vst.msk [vmem:[%s2670_s9 + $0x4] sm:$0xf] %vm390_vm8, %v1468_v7 }
0x122e   :  { %v1627_v47 = vpop.permute.xlu0 %1626 }
0x122f   :  { %v1629_v56 = vmul.f32 %v1627_v47, %v1610_v63 }
0x1231   :  { %v1630_v39 = vpack.c.bf16 %v1629_v56, %v1629_v56 }
0x1233   :  { %1632 = vrot.lane.b32.xlu1 %v1630_v39, %s2122_s16 }
0x1236   :  { %v555_v8 = vpop.permute.xlu0 %554 }
0x1237   :  { %1795 = vst.msk [vmem:[%s2671_s8 + $0x4] sm:$0xf] %vm390_vm8, %v555_v8 }
0x123a   :  { %v1638_v9 = vpop.permute.xlu2 %1637 }
0x123b   :  { %1647 = vrot.lane.b32.xlu1 %v1629_v56, %s2122_s16  ;;  %1640 = vst.msk [vmem:[#allocation2] sm:$0xff] %vm72_vm0, %v1638_v9 }
0x123e   :  { %v804_v12 = vpop.permute.xlu0 %803 }
0x123f   :  { %1828 = vst.msk [vmem:[%s2670_s9 + $0x14] sm:$0xf] %vm390_vm8, %v804_v12 }
0x1242   :  { %v1653_v13 = vpop.permute.xlu2 %1652 }
0x1243   :  { %1655 = vst.msk [vmem:[#allocation5] sm:$0xff] %vm72_vm0, %v1653_v13 }
0x1246   :  { %v1053_v14 = vpop.permute.xlu0 %1052 }
0x1247   :  { %1861 = vst.msk [vmem:[%s2671_s8 + $0x10] sm:$0xf] %vm390_vm8, %v1053_v14 }
0x124e   :  { %v1302_v16 = vpop.permute.xlu0 %1301 }
0x124f   :  { %1894 = vst.msk [vmem:[%s2670_s9 + $0x8] sm:$0xf] %vm390_vm8, %v1302_v16 }
0x1256   :  { %v1551_v33 = vpop.permute.xlu0 %1550 }
0x1257   :  { %1927 = vst.msk [vmem:[%s2671_s8 + $0x1c] sm:$0xf] %vm390_vm8, %v1551_v33 }
0x125e   :  { %v1643_v45 = vpop.permute.xlu0 %1642 }
0x125f   :  { %1645 = vst.msk [vmem:[#allocation3] sm:$0xff] %vm72_vm0, %v1643_v45 }
0x12a5   :  { %v1633_v62 = vpop.permute.xlu1 %1632 }
0x12a6   :  { %1635 = vst.msk [vmem:[%s2670_s9] sm:$0xf] %vm390_vm8, %v1633_v62 }
0x12ad   :  { %v1648_v18 = vpop.permute.xlu1 %1647 }
0x12ae   :  { %1650 = vst.msk [vmem:[#allocation4] sm:$0xff] %vm72_vm0, %v1648_v18 }

</bundles_post_ra>
